<compile_context>
chip_gen: v7x
topology: tpu7x:2x2x1
jax: 0.10.0
libtpu: 0.0.40
codegen_flags: <defaults>
</compile_context>

<pallas_src>
import jax
import jax.numpy as jnp
from jax import lax
from jax.experimental import pallas as pl
from jax.experimental.pallas import tpu as pltpu

_VMEM_LIMIT_BYTES = 32 * 1024 * 1024   # fits v7x scoped budget; > v5e 16 MiB default
_MAX_TILE_ROWS = 512                   # amortizes the ~0.35 us per-grid-step overhead
_LANE = 128
_SUBLANE = 8                           # f32 sublane granule (activation refs stay f32)

_SUBPIX_OFFS = ((0, 0), (0, 1), (1, 0), (1, 1))


def _round_up(x, m):
    return (x + m - 1) // m * m


def _ceil_div(a, b):
    return -(-a // b)


def _conv_out_dim(in_dim, k, s, p):
    return (in_dim + 2 * p - k) // s + 1


def _row_tiling(m):
    """Balanced row tiling: minimal number of <=512-row tiles, 8-row aligned."""
    num_tiles = max(1, _ceil_div(m, _MAX_TILE_ROWS))
    tile_m = _round_up(_ceil_div(m, num_tiles), _SUBLANE)
    return tile_m, tile_m * num_tiles, num_tiles


# ---------------------------------------------------------------------------
# Pallas kernels
# ---------------------------------------------------------------------------
def _make_linear_kernel(relu: bool):
    """o = relu?(x @ w + b); x:[tm,K] f32 (cast to bf16), w:[K,N] bf16 resident, b:[1,N] f32."""
    def kernel(x_ref, w_ref, b_ref, o_ref):
        x = x_ref[...].astype(jnp.bfloat16)
        acc = jnp.dot(x, w_ref[...], preferred_element_type=jnp.float32)
        acc = acc + b_ref[...]              # f32 bias, implicit (1, N) broadcast
        if relu:
            acc = jnp.maximum(acc, 0.0)
        o_ref[...] = acc.astype(o_ref.dtype)
    return kernel


def _mlp_core_kernel(x_ref, w1_ref, b1_ref, w2_ref, b2_ref,
                     w3_ref, b3_ref, w4_ref, b4_ref, z_ref, h_ref):
    """Fused FC bottleneck: relu(fc1) -> fc2 (=z) -> relu(dfc2) -> relu(dfc1).

    Weights are bf16 residents; accumulation, bias and ReLU are f32.
    """
    f32, bf16 = jnp.float32, jnp.bfloat16
    h = x_ref[...].astype(bf16)
    h = jnp.maximum(jnp.dot(h, w1_ref[...], preferred_element_type=f32) + b1_ref[...], 0.0)
    z = jnp.dot(h.astype(bf16), w2_ref[...], preferred_element_type=f32) + b2_ref[...]
    z_ref[...] = z.astype(z_ref.dtype)
    h = jnp.maximum(jnp.dot(z.astype(bf16), w3_ref[...], preferred_element_type=f32)
                    + b3_ref[...], 0.0)
    h = jnp.maximum(jnp.dot(h.astype(bf16), w4_ref[...], preferred_element_type=f32)
                    + b4_ref[...], 0.0)
    h_ref[...] = h.astype(h_ref.dtype)


# ---------------------------------------------------------------------------
# Pallas call wrappers
# ---------------------------------------------------------------------------
def _pallas_linear(x, w, b, *, relu):
    """Row-tiled GEMM: x:[M,K] f32 @ w:[K,N] (cast bf16) + b:[N]; lane-padded output."""
    M, K = x.shape
    N = w.shape[1]
    n_pad = _round_up(N, _LANE)                    # lane-dense (unmasked) output stores
    tile_m, m_pad, num_tiles = _row_tiling(M)

    if m_pad != M:
        x = jnp.pad(x, ((0, m_pad - M), (0, 0)))
    if n_pad != N:
        w = jnp.pad(w, ((0, 0), (0, n_pad - N)))
        b = jnp.pad(b, (0, n_pad - N))
    w_bf = w.astype(jnp.bfloat16)                  # bf16 resident weights (half VMEM/HBM)
    b2 = b.reshape(1, n_pad).astype(jnp.float32)

    cost = pl.CostEstimate(
        flops=2 * m_pad * K * n_pad,
        transcendentals=0,
        bytes_accessed=4 * m_pad * K + 2 * K * n_pad + 4 * n_pad + 4 * m_pad * n_pad)

    out = pl.pallas_call(
        _make_linear_kernel(relu),
        out_shape=jax.ShapeDtypeStruct((m_pad, n_pad), jnp.float32),
        grid=(num_tiles,),
        in_specs=[
            pl.BlockSpec((tile_m, K), lambda i: (i, 0)),
            pl.BlockSpec((K, n_pad), lambda i: (0, 0)),   # weights resident across grid
            pl.BlockSpec((1, n_pad), lambda i: (0, 0)),   # bias resident
        ],
        out_specs=pl.BlockSpec((tile_m, n_pad), lambda i: (i, 0)),
        compiler_params=pltpu.CompilerParams(
            dimension_semantics=("parallel",),
            vmem_limit_bytes=_VMEM_LIMIT_BYTES),
        cost_estimate=cost,
    )(x, w_bf, b2)
    if m_pad != M or n_pad != N:
        out = out[:M, :N]
    return out


def _pallas_fc_bottleneck(x_flat, params):
    """Fused encode_fc1/encode_fc2/decode_fc2/decode_fc1, batch-tiled, returns (z, h)."""
    w1, b1 = params["encode_fc1"]
    w2, b2 = params["encode_fc2"]
    w3, b3 = params["decode_fc2"]
    w4, b4 = params["decode_fc1"]

    B, K = x_flat.shape
    hid = w1.shape[1]
    latent = w2.shape[1]
    flat_out = w4.shape[1]                         # 128 * d3 * d3 (always mult. of 128)
    lat_pad = _round_up(latent, _LANE)

    # Lane-pad the latent dim with zeros: dense z stores; padded columns hit zero rows
    # of w3 so the decode path is numerically unchanged.
    w2p = jnp.pad(w2, ((0, 0), (0, lat_pad - latent)))
    b2p = jnp.pad(b2, (0, lat_pad - latent))
    w3p = jnp.pad(w3, ((0, lat_pad - latent), (0, 0)))

    tile_b, b_pad, num_tiles = _row_tiling(B)
    xp = jnp.pad(x_flat, ((0, b_pad - B), (0, 0))) if b_pad != B else x_flat

    bf = lambda a: a.astype(jnp.bfloat16)
    row = lambda i: (i, 0)
    const = lambda i: (0, 0)

    macs = K * hid + hid * lat_pad + lat_pad * hid + hid * flat_out
    cost = pl.CostEstimate(
        flops=2 * b_pad * macs,
        transcendentals=0,
        bytes_accessed=(4 * b_pad * K + 2 * macs
                        + 4 * (2 * hid + lat_pad + flat_out)
                        + 4 * b_pad * (lat_pad + flat_out)))

    z, h_dec = pl.pallas_call(
        _mlp_core_kernel,
        out_shape=(jax.ShapeDtypeStruct((b_pad, lat_pad), jnp.float32),
                   jax.ShapeDtypeStruct((b_pad, flat_out), jnp.float32)),
        grid=(num_tiles,),
        in_specs=[
            pl.BlockSpec((tile_b, K), row),
            pl.BlockSpec((K, hid), const), pl.BlockSpec((1, hid), const),
            pl.BlockSpec((hid, lat_pad), const), pl.BlockSpec((1, lat_pad), const),
            pl.BlockSpec((lat_pad, hid), const), pl.BlockSpec((1, hid), const),
            pl.BlockSpec((hid, flat_out), const), pl.BlockSpec((1, flat_out), const),
        ],
        out_specs=(pl.BlockSpec((tile_b, lat_pad), row),
                   pl.BlockSpec((tile_b, flat_out), row)),
        compiler_params=pltpu.CompilerParams(
            dimension_semantics=("parallel",),
            vmem_limit_bytes=_VMEM_LIMIT_BYTES),
        cost_estimate=cost,
    )(xp, bf(w1), b1.reshape(1, -1), bf(w2p), b2p.reshape(1, -1),
      bf(w3p), b3.reshape(1, -1), bf(w4), b4.reshape(1, -1))
    return z[:B, :latent], h_dec[:B]


def _conv2d_block(x_nhwc, w_oihw, b, *, stride, padding, relu):
    """Conv2d + bias (+ReLU): im2col in XLA (tiny here), GEMM in Pallas."""
    B, H, W, Cin = x_nhwc.shape
    Cout, _, kh, kw = w_oihw.shape
    Ho = (H + 2 * padding - kh) // stride + 1
    Wo = (W + 2 * padding - kw) // stride + 1
    xp = x_nhwc
    if padding:
        xp = jnp.pad(x_nhwc, ((0, 0), (padding, padding), (padding, padding), (0, 0)))
    cols = []
    for i in range(kh):
        for j in range(kw):
            cols.append(lax.slice(
                xp, (0, i, j, 0),
                (B, i + (Ho - 1) * stride + 1, j + (Wo - 1) * stride + 1, Cin),
                (1, stride, stride, 1)))
    patches = jnp.concatenate(cols, axis=-1).reshape(B * Ho * Wo, kh * kw * Cin)
    # Pre-transpose once to MXU-native RHS layout: [kh*kw*Cin, Cout]
    w_mat = jnp.transpose(w_oihw, (2, 3, 1, 0)).reshape(kh * kw * Cin, Cout)
    y = _pallas_linear(patches, w_mat, b, relu=relu)
    return y.reshape(B, Ho, Wo, Cout)


def _conv_transpose2d_block(x_nhwc, w_iohw, b, *, stride, padding, output_padding, relu):
    """ConvTranspose2d(k=3, s=2, p=1) via the sub-pixel (pixel-shuffle) decomposition.

    out[b, 2m+py, 2n+px, :] = sum_{dy,dx} x[b, m+dy, n+dx, :] @ w[:, :, py-2dy+1, px-2dx+1]
    (zero contribution when the kernel index falls outside [0, 3)).  This removes all
    structural zeros of the zero-dilation lowering: one (B*H*W, 4*Cin) @ (4*Cin, 4*Cout)
    GEMM per layer, then a pixel-shuffle of the 4 parity channel groups.
    """
    assert stride == 2 and padding == 1, "module always uses k=3, s=2, p=1"
    assert 0 <= output_padding < stride
    B, H, W, Cin = x_nhwc.shape
    cin_w, Cout, k, _ = w_iohw.shape
    assert k == 3 and cin_w == Cin
    Ho = (H - 1) * stride - 2 * padding + k + output_padding
    Wo = (W - 1) * stride - 2 * padding + k + output_padding

    # Patches: 4 shifted copies (dy, dx in {0,1}) of the high-padded input, channel-major.
    xp = jnp.pad(x_nhwc, ((0, 0), (0, 1), (0, 1), (0, 0)))
    patches = jnp.concatenate(
        [xp[:, dy:dy + H, dx:dx + W, :] for dy, dx in _SUBPIX_OFFS], axis=-1)
    patches = patches.reshape(B * H * W, 4 * Cin)

    # Weight matrix: K block (dy,dx) x N block (py,px) = w[:, :, py-2dy+1, px-2dx+1].
    zeros = jnp.zeros((Cin, Cout), w_iohw.dtype)
    k_blocks = []
    for dy, dx in _SUBPIX_OFFS:
        n_blocks = []
        for py, px in _SUBPIX_OFFS:
            ky, kx = py - 2 * dy + 1, px - 2 * dx + 1
            if 0 <= ky < k and 0 <= kx < k:
                n_blocks.append(w_iohw[:, :, ky, kx])
            else:
                n_blocks.append(zeros)
        k_blocks.append(jnp.concatenate(n_blocks, axis=1))
    w_mat = jnp.concatenate(k_blocks, axis=0)           # (4*Cin, 4*Cout)
    b4 = jnp.tile(b, 4)                                  # bias per parity group

    y = _pallas_linear(patches, w_mat, b4, relu=relu)    # (B*H*W, 4*Cout)
    y = y.reshape(B, H, W, 2, 2, Cout)                   # (..., py, px, Cout)
    y = jnp.transpose(y, (0, 1, 3, 2, 4, 5)).reshape(B, 2 * H, 2 * W, Cout)
    return y[:, :Ho, :Wo, :]                             # handles output_padding == 0


# ---------------------------------------------------------------------------
# Full forward (Pallas path) and pure-JAX reference
# ---------------------------------------------------------------------------
@jax.jit
def ae_cnn_forward(x, params):
    """Pallas equivalent of AeCnn.forward (conv_dim=2): returns (z, x_rec)."""
    B, _, H, _ = x.shape
    d1 = _conv_out_dim(H, 3, 2, 1)
    d2 = _conv_out_dim(d1, 3, 2, 1)
    d3 = _conv_out_dim(d2, 3, 2, 1)
    op3 = d2 - ((d3 - 1) * 2 - 2 + 3)
    op2 = d1 - ((d2 - 1) * 2 - 2 + 3)
    op1 = H - ((d1 - 1) * 2 - 2 + 3)

    h = jnp.transpose(x, (0, 2, 3, 1))                  # NCHW -> NHWC (C on lanes)
    h = _conv2d_block(h, *params["conv_block1"], stride=2, padding=1, relu=True)
    h = _conv2d_block(h, *params["conv_block2"], stride=2, padding=1, relu=True)
    h = _conv2d_block(h, *params["conv_block3"], stride=2, padding=1, relu=True)
    h = jnp.transpose(h, (0, 3, 1, 2)).reshape(B, -1)   # PyTorch NCHW flatten order

    z, h = _pallas_fc_bottleneck(h, params)

    h = h.reshape(B, 128, d3, d3)
    h = jnp.transpose(h, (0, 2, 3, 1))                  # NCHW -> NHWC
    h = _conv_transpose2d_block(h, *params["conv_transpose_block3"], stride=2,
                                padding=1, output_padding=op3, relu=True)
    h = _conv_transpose2d_block(h, *params["conv_transpose_block2"], stride=2,
                                padding=1, output_padding=op2, relu=True)
    h = _conv_transpose2d_block(h, *params["conv_transpose_block1"], stride=2,
                                padding=1, output_padding=op1, relu=False)
    x_rec = jnp.transpose(h, (0, 3, 1, 2))              # NHWC -> NCHW
    return z, x_rec


@jax.jit
def _reference_forward(x, params):
    """Pure-JAX (XLA conv) f32 reference for correctness checking."""
    B, _, H, _ = x.shape
    d1 = _conv_out_dim(H, 3, 2, 1)
    d2 = _conv_out_dim(d1, 3, 2, 1)
    d3 = _conv_out_dim(d2, 3, 2, 1)
    op3 = d2 - ((d3 - 1) * 2 - 2 + 3)
    op2 = d1 - ((d2 - 1) * 2 - 2 + 3)
    op1 = H - ((d1 - 1) * 2 - 2 + 3)

    def conv(h, wb, relu):
        w, b = wb
        y = lax.conv_general_dilated(h, w, (2, 2), [(1, 1), (1, 1)],
                                     dimension_numbers=("NCHW", "OIHW", "NCHW"))
        y = y + b[None, :, None, None]
        return jnp.maximum(y, 0.0) if relu else y

    def convt(h, wb, op, relu):
        w, b = wb
        k = w.shape[-1]
        w_eq = jnp.transpose(w[:, :, ::-1, ::-1], (1, 0, 2, 3))
        lo = k - 1 - 1
        y = lax.conv_general_dilated(h, w_eq, (1, 1), [(lo, lo + op)] * 2,
                                     lhs_dilation=(2, 2),
                                     dimension_numbers=("NCHW", "OIHW", "NCHW"))
        y = y + b[None, :, None, None]
        return jnp.maximum(y, 0.0) if relu else y

    def lin(h, wb, relu):
        w, b = wb
        y = h @ w + b
        return jnp.maximum(y, 0.0) if relu else y

    h = conv(x, params["conv_block1"], True)
    h = conv(h, params["conv_block2"], True)
    h = conv(h, params["conv_block3"], True)
    h = h.reshape(B, -1)
    h = lin(h, params["encode_fc1"], True)
    z = lin(h, params["encode_fc2"], False)
    h = lin(z, params["decode_fc2"], True)
    h = lin(h, params["decode_fc1"], True)
    h = h.reshape(B, 128, d3, d3)
    h = convt(h, params["conv_transpose_block3"], op3, True)
    h = convt(h, params["conv_transpose_block2"], op2, True)
    x_rec = convt(h, params["conv_transpose_block1"], op1, False)
    return z, x_rec


# ---------------------------------------------------------------------------
# Deterministic parameter init (PyTorch layouts; Linear stored pre-transposed [in,out])
# ---------------------------------------------------------------------------
def init_ae_cnn_params(key, in_channels, in_dim, latent_dim):
    d1 = _conv_out_dim(in_dim, 3, 2, 1)
    d2 = _conv_out_dim(d1, 3, 2, 1)
    d3 = _conv_out_dim(d2, 3, 2, 1)
    flat = 128 * d3 * d3

    keys = iter(jax.random.split(key, 20))

    def u(shape, fan_in):
        bound = 1.0 / (fan_in ** 0.5)
        return jax.random.uniform(next(keys), shape, jnp.float32, -bound, bound)

    def conv_p(cin, cout, k=3):            # PyTorch Conv2d: [O, I, kh, kw]
        fan_in = cin * k * k
        return u((cout, cin, k, k), fan_in), u((cout,), fan_in)

    def convt_p(cin, cout, k=3):           # PyTorch ConvTranspose2d: [I, O, kh, kw]
        fan_in = cout * k * k
        return u((cin, cout, k, k), fan_in), u((cout,), fan_in)

    def lin_p(fin, fout):                  # pre-transposed to [in, out]
        return u((fin, fout), fin), u((fout,), fin)

    return {
        "conv_block1": conv_p(in_channels, 32),
        "conv_block2": conv_p(32, 64),
        "conv_block3": conv_p(64, 128),
        "encode_fc1": lin_p(flat, 1024),
        "encode_fc2": lin_p(1024, latent_dim),
        "decode_fc2": lin_p(latent_dim, 1024),
        "decode_fc1": lin_p(1024, flat),
        "conv_transpose_block3": convt_p(128, 64),
        "conv_transpose_block2": convt_p(64, 32),
        "conv_transpose_block1": convt_p(32, in_channels),
    }


if __name__ == "__main__":
    in_channels, in_dim, latent_dim, batch = 4, 16, 64, 2

    key = jax.random.PRNGKey(0)
    key, kx, kp = jax.random.split(key, 3)
    x = jax.random.normal(kx, (batch, in_channels, in_dim, in_dim), jnp.float32)
    params = init_ae_cnn_params(kp, in_channels, in_dim, latent_dim)

    z, x_rec = ae_cnn_forward(x, params)
    jax.block_until_ready((z, x_rec))

    assert z.shape == (batch, latent_dim)
    assert x_rec.shape == x.shape

    # Tolerance is set for the bf16 MXU path (f32 accumulation, f32 bias/ReLU).
    z_ref, x_rec_ref = _reference_forward(x, params)
    assert jnp.allclose(z, z_ref, atol=5e-2, rtol=5e-2), \
        float(jnp.max(jnp.abs(z - z_ref)))
    assert jnp.allclose(x_rec, x_rec_ref, atol=5e-2, rtol=5e-2), \
        float(jnp.max(jnp.abs(x_rec - x_rec_ref)))

    print("KERNEL_OK")
</pallas_src>

<mosaic_0001>
module attributes {stable_mosaic.version = 11 : i64} {
  func.func @kernel(%arg0: i32, %arg1: memref<128x36xf32, #tpu.memory_space<vmem>>, %arg2: memref<36x128xbf16, #tpu.memory_space<vmem>>, %arg3: memref<1x128xf32, #tpu.memory_space<vmem>>, %arg4: memref<128x128xf32, #tpu.memory_space<vmem>>) attributes {dimension_semantics = [#tpu.dimension_semantics<parallel>], iteration_bounds = array<i64: 1>, scalar_prefetch = 0 : i64, scratch_operands = 0 : i64, tpu.core_type = #tpu.core_type<tc>, window_params = [{transform_indices = @transform_0, window_bounds = array<i64: 128, 36>}, {pipeline_mode = #tpu.pipeline_mode<synchronous>, transform_indices = @transform_1, window_bounds = array<i64: 36, 128>}, {pipeline_mode = #tpu.pipeline_mode<synchronous>, transform_indices = @transform_2, window_bounds = array<i64: 1, 128>}, {transform_indices = @transform_3, window_bounds = array<i64: 128, 128>}]} {
    %c0 = arith.constant 0 : index
    %c0_0 = arith.constant 0 : index
    %0 = vector.load %arg1[%c0, %c0_0] : memref<128x36xf32, #tpu.memory_space<vmem>>, vector<128x36xf32>
    %1 = arith.truncf %0 : vector<128x36xf32> to vector<128x36xbf16>
    %c0_1 = arith.constant 0 : index
    %c0_2 = arith.constant 0 : index
    %2 = vector.load %arg2[%c0_1, %c0_2] : memref<36x128xbf16, #tpu.memory_space<vmem>>, vector<36x128xbf16>
    %cst = arith.constant dense<0.000000e+00> : vector<128x128xf32>
    %3 = tpu.matmul %1, %2, %cst {dimension_numbers = #tpu.dot_dimension_numbers<[1], [0], [0], [1], [0, 0, 1, 1], [], []>} : vector<128x36xbf16>, vector<36x128xbf16>, vector<128x128xf32> -> vector<128x128xf32>
    %c0_3 = arith.constant 0 : index
    %c0_4 = arith.constant 0 : index
    %4 = vector.load %arg3[%c0_3, %c0_4] : memref<1x128xf32, #tpu.memory_space<vmem>>, vector<1x128xf32>
    %5 = vector.broadcast %4 : vector<1x128xf32> to vector<128x128xf32>
    %6 = arith.addf %3, %5 : vector<128x128xf32>
    %cst_5 = arith.constant 0.000000e+00 : f32
    %7 = vector.broadcast %cst_5 : f32 to vector<128x128xf32>
    %8 = arith.maximumf %6, %7 : vector<128x128xf32>
    %c0_6 = arith.constant 0 : index
    %c0_7 = arith.constant 0 : index
    %9 = vector.load %arg4[%c0_6, %c0_7] : memref<128x128xf32, #tpu.memory_space<vmem>>, vector<128x128xf32>
    tpu.vector_store %arg4[%c0_6, %c0_7], %8 {strides = array<i32>} : memref<128x128xf32, #tpu.memory_space<vmem>>, vector<128x128xf32>,
    return
  }
  func.func @transform_0(%arg0: i32) -> (i32, i32) {
    %c0_i32 = arith.constant 0 : i32
    %c0_i32_0 = arith.constant 0 : i32
    return %arg0, %c0_i32 : i32, i32
  }
  func.func @transform_1(%arg0: i32) -> (i32, i32) {
    %c0_i32 = arith.constant 0 : i32
    %c0_i32_0 = arith.constant 0 : i32
    %c0_i32_1 = arith.constant 0 : i32
    return %c0_i32, %c0_i32_0 : i32, i32
  }
  func.func @transform_2(%arg0: i32) -> (i32, i32) {
    %c0_i32 = arith.constant 0 : i32
    %c0_i32_0 = arith.constant 0 : i32
    %c0_i32_1 = arith.constant 0 : i32
    return %c0_i32, %c0_i32_0 : i32, i32
  }
  func.func @transform_3(%arg0: i32) -> (i32, i32) {
    %c0_i32 = arith.constant 0 : i32
    %c0_i32_0 = arith.constant 0 : i32
    return %arg0, %c0_i32 : i32, i32
  }
}

module attributes {stable_mosaic.version = 11 : i64} {
  func.func @kernel(%arg0: i32, %arg1: memref<32x288xf32, #tpu.memory_space<vmem>>, %arg2: memref<288x128xbf16, #tpu.memory_space<vmem>>, %arg3: memref<1x128xf32, #tpu.memory_space<vmem>>, %arg4: memref<32x128xf32, #tpu.memory_space<vmem>>) attributes {dimension_semantics = [#tpu.dimension_semantics<parallel>], iteration_bounds = array<i64: 1>, scalar_prefetch = 0 : i64, scratch_operands = 0 : i64, tpu.core_type = #tpu.core_type<tc>, window_params = [{transform_indices = @transform_0, window_bounds = array<i64: 32, 288>}, {pipeline_mode = #tpu.pipeline_mode<synchronous>, transform_indices = @transform_1, window_bounds = array<i64: 288, 128>}, {pipeline_mode = #tpu.pipeline_mode<synchronous>, transform_indices = @transform_2, window_bounds = array<i64: 1, 128>}, {transform_indices = @transform_3, window_bounds = array<i64: 32, 128>}]} {
    %c0 = arith.constant 0 : index
    %c0_0 = arith.constant 0 : index
    %0 = vector.load %arg1[%c0, %c0_0] : memref<32x288xf32, #tpu.memory_space<vmem>>, vector<32x288xf32>
    %1 = arith.truncf %0 : vector<32x288xf32> to vector<32x288xbf16>
    %c0_1 = arith.constant 0 : index
    %c0_2 = arith.constant 0 : index
    %2 = vector.load %arg2[%c0_1, %c0_2] : memref<288x128xbf16, #tpu.memory_space<vmem>>, vector<288x128xbf16>
    %cst = arith.constant dense<0.000000e+00> : vector<32x128xf32>
    %3 = tpu.matmul %1, %2, %cst {dimension_numbers = #tpu.dot_dimension_numbers<[1], [0], [0], [1], [0, 0, 1, 1], [], []>} : vector<32x288xbf16>, vector<288x128xbf16>, vector<32x128xf32> -> vector<32x128xf32>
    %c0_3 = arith.constant 0 : index
    %c0_4 = arith.constant 0 : index
    %4 = vector.load %arg3[%c0_3, %c0_4] : memref<1x128xf32, #tpu.memory_space<vmem>>, vector<1x128xf32>
    %5 = vector.broadcast %4 : vector<1x128xf32> to vector<32x128xf32>
    %6 = arith.addf %3, %5 : vector<32x128xf32>
    %cst_5 = arith.constant 0.000000e+00 : f32
    %7 = vector.broadcast %cst_5 : f32 to vector<32x128xf32>
    %8 = arith.maximumf %6, %7 : vector<32x128xf32>
    %c0_6 = arith.constant 0 : index
    %c0_7 = arith.constant 0 : index
    %9 = vector.load %arg4[%c0_6, %c0_7] : memref<32x128xf32, #tpu.memory_space<vmem>>, vector<32x128xf32>
    tpu.vector_store %arg4[%c0_6, %c0_7], %8 {strides = array<i32>} : memref<32x128xf32, #tpu.memory_space<vmem>>, vector<32x128xf32>,
    return
  }
  func.func @transform_0(%arg0: i32) -> (i32, i32) {
    %c0_i32 = arith.constant 0 : i32
    %c0_i32_0 = arith.constant 0 : i32
    return %arg0, %c0_i32 : i32, i32
  }
  func.func @transform_1(%arg0: i32) -> (i32, i32) {
    %c0_i32 = arith.constant 0 : i32
    %c0_i32_0 = arith.constant 0 : i32
    %c0_i32_1 = arith.constant 0 : i32
    return %c0_i32, %c0_i32_0 : i32, i32
  }
  func.func @transform_2(%arg0: i32) -> (i32, i32) {
    %c0_i32 = arith.constant 0 : i32
    %c0_i32_0 = arith.constant 0 : i32
    %c0_i32_1 = arith.constant 0 : i32
    return %c0_i32, %c0_i32_0 : i32, i32
  }
  func.func @transform_3(%arg0: i32) -> (i32, i32) {
    %c0_i32 = arith.constant 0 : i32
    %c0_i32_0 = arith.constant 0 : i32
    return %arg0, %c0_i32 : i32, i32
  }
}

module attributes {stable_mosaic.version = 11 : i64} {
  func.func @kernel(%arg0: i32, %arg1: memref<8x576xf32, #tpu.memory_space<vmem>>, %arg2: memref<576x128xbf16, #tpu.memory_space<vmem>>, %arg3: memref<1x128xf32, #tpu.memory_space<vmem>>, %arg4: memref<8x128xf32, #tpu.memory_space<vmem>>) attributes {dimension_semantics = [#tpu.dimension_semantics<parallel>], iteration_bounds = array<i64: 1>, scalar_prefetch = 0 : i64, scratch_operands = 0 : i64, tpu.core_type = #tpu.core_type<tc>, window_params = [{transform_indices = @transform_0, window_bounds = array<i64: 8, 576>}, {pipeline_mode = #tpu.pipeline_mode<synchronous>, transform_indices = @transform_1, window_bounds = array<i64: 576, 128>}, {pipeline_mode = #tpu.pipeline_mode<synchronous>, transform_indices = @transform_2, window_bounds = array<i64: 1, 128>}, {transform_indices = @transform_3, window_bounds = array<i64: 8, 128>}]} {
    %c0 = arith.constant 0 : index
    %c0_0 = arith.constant 0 : index
    %0 = vector.load %arg1[%c0, %c0_0] : memref<8x576xf32, #tpu.memory_space<vmem>>, vector<8x576xf32>
    %1 = arith.truncf %0 : vector<8x576xf32> to vector<8x576xbf16>
    %c0_1 = arith.constant 0 : index
    %c0_2 = arith.constant 0 : index
    %2 = vector.load %arg2[%c0_1, %c0_2] : memref<576x128xbf16, #tpu.memory_space<vmem>>, vector<576x128xbf16>
    %cst = arith.constant dense<0.000000e+00> : vector<8x128xf32>
    %3 = tpu.matmul %1, %2, %cst {dimension_numbers = #tpu.dot_dimension_numbers<[1], [0], [0], [1], [0, 0, 1, 1], [], []>} : vector<8x576xbf16>, vector<576x128xbf16>, vector<8x128xf32> -> vector<8x128xf32>
    %c0_3 = arith.constant 0 : index
    %c0_4 = arith.constant 0 : index
    %4 = vector.load %arg3[%c0_3, %c0_4] : memref<1x128xf32, #tpu.memory_space<vmem>>, vector<1x128xf32>
    %5 = vector.broadcast %4 : vector<1x128xf32> to vector<8x128xf32>
    %6 = arith.addf %3, %5 : vector<8x128xf32>
    %cst_5 = arith.constant 0.000000e+00 : f32
    %7 = vector.broadcast %cst_5 : f32 to vector<8x128xf32>
    %8 = arith.maximumf %6, %7 : vector<8x128xf32>
    %c0_6 = arith.constant 0 : index
    %c0_7 = arith.constant 0 : index
    %9 = vector.load %arg4[%c0_6, %c0_7] : memref<8x128xf32, #tpu.memory_space<vmem>>, vector<8x128xf32>
    tpu.vector_store %arg4[%c0_6, %c0_7], %8 {strides = array<i32>} : memref<8x128xf32, #tpu.memory_space<vmem>>, vector<8x128xf32>,
    return
  }
  func.func @transform_0(%arg0: i32) -> (i32, i32) {
    %c0_i32 = arith.constant 0 : i32
    %c0_i32_0 = arith.constant 0 : i32
    return %arg0, %c0_i32 : i32, i32
  }
  func.func @transform_1(%arg0: i32) -> (i32, i32) {
    %c0_i32 = arith.constant 0 : i32
    %c0_i32_0 = arith.constant 0 : i32
    %c0_i32_1 = arith.constant 0 : i32
    return %c0_i32, %c0_i32_0 : i32, i32
  }
  func.func @transform_2(%arg0: i32) -> (i32, i32) {
    %c0_i32 = arith.constant 0 : i32
    %c0_i32_0 = arith.constant 0 : i32
    %c0_i32_1 = arith.constant 0 : i32
    return %c0_i32, %c0_i32_0 : i32, i32
  }
  func.func @transform_3(%arg0: i32) -> (i32, i32) {
    %c0_i32 = arith.constant 0 : i32
    %c0_i32_0 = arith.constant 0 : i32
    return %arg0, %c0_i32 : i32, i32
  }
}

module attributes {stable_mosaic.version = 11 : i64} {
  func.func @_mlp_core_kernel(%arg0: i32, %arg1: memref<8x512xf32, #tpu.memory_space<vmem>>, %arg2: memref<512x1024xbf16, #tpu.memory_space<vmem>>, %arg3: memref<1x1024xf32, #tpu.memory_space<vmem>>, %arg4: memref<1024x128xbf16, #tpu.memory_space<vmem>>, %arg5: memref<1x128xf32, #tpu.memory_space<vmem>>, %arg6: memref<128x1024xbf16, #tpu.memory_space<vmem>>, %arg7: memref<1x1024xf32, #tpu.memory_space<vmem>>, %arg8: memref<1024x512xbf16, #tpu.memory_space<vmem>>, %arg9: memref<1x512xf32, #tpu.memory_space<vmem>>, %arg10: memref<8x128xf32, #tpu.memory_space<vmem>>, %arg11: memref<8x512xf32, #tpu.memory_space<vmem>>) attributes {dimension_semantics = [#tpu.dimension_semantics<parallel>], iteration_bounds = array<i64: 1>, scalar_prefetch = 0 : i64, scratch_operands = 0 : i64, tpu.core_type = #tpu.core_type<tc>, window_params = [{transform_indices = @transform_0, window_bounds = array<i64: 8, 512>}, {pipeline_mode = #tpu.pipeline_mode<synchronous>, transform_indices = @transform_1, window_bounds = array<i64: 512, 1024>}, {pipeline_mode = #tpu.pipeline_mode<synchronous>, transform_indices = @transform_2, window_bounds = array<i64: 1, 1024>}, {pipeline_mode = #tpu.pipeline_mode<synchronous>, transform_indices = @transform_3, window_bounds = array<i64: 1024, 128>}, {pipeline_mode = #tpu.pipeline_mode<synchronous>, transform_indices = @transform_4, window_bounds = array<i64: 1, 128>}, {pipeline_mode = #tpu.pipeline_mode<synchronous>, transform_indices = @transform_5, window_bounds = array<i64: 128, 1024>}, {pipeline_mode = #tpu.pipeline_mode<synchronous>, transform_indices = @transform_6, window_bounds = array<i64: 1, 1024>}, {pipeline_mode = #tpu.pipeline_mode<synchronous>, transform_indices = @transform_7, window_bounds = array<i64: 1024, 512>}, {pipeline_mode = #tpu.pipeline_mode<synchronous>, transform_indices = @transform_8, window_bounds = array<i64: 1, 512>}, {transform_indices = @transform_9, window_bounds = array<i64: 8, 128>}, {transform_indices = @transform_10, window_bounds = array<i64: 8, 512>}]} {
    %c0 = arith.constant 0 : index
    %c0_0 = arith.constant 0 : index
    %0 = vector.load %arg1[%c0, %c0_0] : memref<8x512xf32, #tpu.memory_space<vmem>>, vector<8x512xf32>
    %1 = arith.truncf %0 : vector<8x512xf32> to vector<8x512xbf16>
    %c0_1 = arith.constant 0 : index
    %c0_2 = arith.constant 0 : index
    %2 = vector.load %arg2[%c0_1, %c0_2] : memref<512x1024xbf16, #tpu.memory_space<vmem>>, vector<512x1024xbf16>
    %cst = arith.constant dense<0.000000e+00> : vector<8x1024xf32>
    %3 = tpu.matmul %1, %2, %cst {dimension_numbers = #tpu.dot_dimension_numbers<[1], [0], [0], [1], [0, 0, 1, 1], [], []>} : vector<8x512xbf16>, vector<512x1024xbf16>, vector<8x1024xf32> -> vector<8x1024xf32>
    %c0_3 = arith.constant 0 : index
    %c0_4 = arith.constant 0 : index
    %4 = vector.load %arg3[%c0_3, %c0_4] : memref<1x1024xf32, #tpu.memory_space<vmem>>, vector<1x1024xf32>
    %5 = vector.broadcast %4 : vector<1x1024xf32> to vector<8x1024xf32>
    %6 = arith.addf %3, %5 : vector<8x1024xf32>
    %cst_5 = arith.constant 0.000000e+00 : f32
    %7 = vector.broadcast %cst_5 : f32 to vector<8x1024xf32>
    %8 = arith.maximumf %6, %7 : vector<8x1024xf32>
    %9 = arith.truncf %8 : vector<8x1024xf32> to vector<8x1024xbf16>
    %c0_6 = arith.constant 0 : index
    %c0_7 = arith.constant 0 : index
    %10 = vector.load %arg4[%c0_6, %c0_7] : memref<1024x128xbf16, #tpu.memory_space<vmem>>, vector<1024x128xbf16>
    %cst_8 = arith.constant dense<0.000000e+00> : vector<8x128xf32>
    %11 = tpu.matmul %9, %10, %cst_8 {dimension_numbers = #tpu.dot_dimension_numbers<[1], [0], [0], [1], [0, 0, 1, 1], [], []>} : vector<8x1024xbf16>, vector<1024x128xbf16>, vector<8x128xf32> -> vector<8x128xf32>
    %c0_9 = arith.constant 0 : index
    %c0_10 = arith.constant 0 : index
    %12 = vector.load %arg5[%c0_9, %c0_10] : memref<1x128xf32, #tpu.memory_space<vmem>>, vector<1x128xf32>
    %13 = vector.broadcast %12 : vector<1x128xf32> to vector<8x128xf32>
    %14 = arith.addf %11, %13 : vector<8x128xf32>
    %c0_11 = arith.constant 0 : index
    %c0_12 = arith.constant 0 : index
    %15 = vector.load %arg10[%c0_11, %c0_12] : memref<8x128xf32, #tpu.memory_space<vmem>>, vector<8x128xf32>
    tpu.vector_store %arg10[%c0_11, %c0_12], %14 {strides = array<i32>} : memref<8x128xf32, #tpu.memory_space<vmem>>, vector<8x128xf32>,
    %16 = arith.truncf %14 : vector<8x128xf32> to vector<8x128xbf16>
    %c0_13 = arith.constant 0 : index
    %c0_14 = arith.constant 0 : index
    %17 = vector.load %arg6[%c0_13, %c0_14] : memref<128x1024xbf16, #tpu.memory_space<vmem>>, vector<128x1024xbf16>
    %cst_15 = arith.constant dense<0.000000e+00> : vector<8x1024xf32>
    %18 = tpu.matmul %16, %17, %cst_15 {dimension_numbers = #tpu.dot_dimension_numbers<[1], [0], [0], [1], [0, 0, 1, 1], [], []>} : vector<8x128xbf16>, vector<128x1024xbf16>, vector<8x1024xf32> -> vector<8x1024xf32>
    %c0_16 = arith.constant 0 : index
    %c0_17 = arith.constant 0 : index
    %19 = vector.load %arg7[%c0_16, %c0_17] : memref<1x1024xf32, #tpu.memory_space<vmem>>, vector<1x1024xf32>
    %20 = vector.broadcast %19 : vector<1x1024xf32> to vector<8x1024xf32>
    %21 = arith.addf %18, %20 : vector<8x1024xf32>
    %cst_18 = arith.constant 0.000000e+00 : f32
    %22 = vector.broadcast %cst_18 : f32 to vector<8x1024xf32>
    %23 = arith.maximumf %21, %22 : vector<8x1024xf32>
    %24 = arith.truncf %23 : vector<8x1024xf32> to vector<8x1024xbf16>
    %c0_19 = arith.constant 0 : index
    %c0_20 = arith.constant 0 : index
    %25 = vector.load %arg8[%c0_19, %c0_20] : memref<1024x512xbf16, #tpu.memory_space<vmem>>, vector<1024x512xbf16>
    %cst_21 = arith.constant dense<0.000000e+00> : vector<8x512xf32>
    %26 = tpu.matmul %24, %25, %cst_21 {dimension_numbers = #tpu.dot_dimension_numbers<[1], [0], [0], [1], [0, 0, 1, 1], [], []>} : vector<8x1024xbf16>, vector<1024x512xbf16>, vector<8x512xf32> -> vector<8x512xf32>
    %c0_22 = arith.constant 0 : index
    %c0_23 = arith.constant 0 : index
    %27 = vector.load %arg9[%c0_22, %c0_23] : memref<1x512xf32, #tpu.memory_space<vmem>>, vector<1x512xf32>
    %28 = vector.broadcast %27 : vector<1x512xf32> to vector<8x512xf32>
    %29 = arith.addf %26, %28 : vector<8x512xf32>
    %cst_24 = arith.constant 0.000000e+00 : f32
    %30 = vector.broadcast %cst_24 : f32 to vector<8x512xf32>
    %31 = arith.maximumf %29, %30 : vector<8x512xf32>
    %c0_25 = arith.constant 0 : index
    %c0_26 = arith.constant 0 : index
    %32 = vector.load %arg11[%c0_25, %c0_26] : memref<8x512xf32, #tpu.memory_space<vmem>>, vector<8x512xf32>
    tpu.vector_store %arg11[%c0_25, %c0_26], %31 {strides = array<i32>} : memref<8x512xf32, #tpu.memory_space<vmem>>, vector<8x512xf32>,
    return
  }
  func.func @transform_0(%arg0: i32) -> (i32, i32) {
    %c0_i32 = arith.constant 0 : i32
    %c0_i32_0 = arith.constant 0 : i32
    return %arg0, %c0_i32 : i32, i32
  }
  func.func @transform_1(%arg0: i32) -> (i32, i32) {
    %c0_i32 = arith.constant 0 : i32
    %c0_i32_0 = arith.constant 0 : i32
    %c0_i32_1 = arith.constant 0 : i32
    return %c0_i32, %c0_i32_0 : i32, i32
  }
  func.func @transform_2(%arg0: i32) -> (i32, i32) {
    %c0_i32 = arith.constant 0 : i32
    %c0_i32_0 = arith.constant 0 : i32
    %c0_i32_1 = arith.constant 0 : i32
    return %c0_i32, %c0_i32_0 : i32, i32
  }
  func.func @transform_3(%arg0: i32) -> (i32, i32) {
    %c0_i32 = arith.constant 0 : i32
    %c0_i32_0 = arith.constant 0 : i32
    %c0_i32_1 = arith.constant 0 : i32
    return %c0_i32, %c0_i32_0 : i32, i32
  }
  func.func @transform_4(%arg0: i32) -> (i32, i32) {
    %c0_i32 = arith.constant 0 : i32
    %c0_i32_0 = arith.constant 0 : i32
    %c0_i32_1 = arith.constant 0 : i32
    return %c0_i32, %c0_i32_0 : i32, i32
  }
  func.func @transform_5(%arg0: i32) -> (i32, i32) {
    %c0_i32 = arith.constant 0 : i32
    %c0_i32_0 = arith.constant 0 : i32
    %c0_i32_1 = arith.constant 0 : i32
    return %c0_i32, %c0_i32_0 : i32, i32
  }
  func.func @transform_6(%arg0: i32) -> (i32, i32) {
    %c0_i32 = arith.constant 0 : i32
    %c0_i32_0 = arith.constant 0 : i32
    %c0_i32_1 = arith.constant 0 : i32
    return %c0_i32, %c0_i32_0 : i32, i32
  }
  func.func @transform_7(%arg0: i32) -> (i32, i32) {
    %c0_i32 = arith.constant 0 : i32
    %c0_i32_0 = arith.constant 0 : i32
    %c0_i32_1 = arith.constant 0 : i32
    return %c0_i32, %c0_i32_0 : i32, i32
  }
  func.func @transform_8(%arg0: i32) -> (i32, i32) {
    %c0_i32 = arith.constant 0 : i32
    %c0_i32_0 = arith.constant 0 : i32
    %c0_i32_1 = arith.constant 0 : i32
    return %c0_i32, %c0_i32_0 : i32, i32
  }
  func.func @transform_9(%arg0: i32) -> (i32, i32) {
    %c0_i32 = arith.constant 0 : i32
    %c0_i32_0 = arith.constant 0 : i32
    return %arg0, %c0_i32 : i32, i32
  }
  func.func @transform_10(%arg0: i32) -> (i32, i32) {
    %c0_i32 = arith.constant 0 : i32
    %c0_i32_0 = arith.constant 0 : i32
    return %arg0, %c0_i32 : i32, i32
  }
}

module attributes {stable_mosaic.version = 11 : i64} {
  func.func @kernel(%arg0: i32, %arg1: memref<8x512xf32, #tpu.memory_space<vmem>>, %arg2: memref<512x256xbf16, #tpu.memory_space<vmem>>, %arg3: memref<1x256xf32, #tpu.memory_space<vmem>>, %arg4: memref<8x256xf32, #tpu.memory_space<vmem>>) attributes {dimension_semantics = [#tpu.dimension_semantics<parallel>], iteration_bounds = array<i64: 1>, scalar_prefetch = 0 : i64, scratch_operands = 0 : i64, tpu.core_type = #tpu.core_type<tc>, window_params = [{transform_indices = @transform_0, window_bounds = array<i64: 8, 512>}, {pipeline_mode = #tpu.pipeline_mode<synchronous>, transform_indices = @transform_1, window_bounds = array<i64: 512, 256>}, {pipeline_mode = #tpu.pipeline_mode<synchronous>, transform_indices = @transform_2, window_bounds = array<i64: 1, 256>}, {transform_indices = @transform_3, window_bounds = array<i64: 8, 256>}]} {
    %c0 = arith.constant 0 : index
    %c0_0 = arith.constant 0 : index
    %0 = vector.load %arg1[%c0, %c0_0] : memref<8x512xf32, #tpu.memory_space<vmem>>, vector<8x512xf32>
    %1 = arith.truncf %0 : vector<8x512xf32> to vector<8x512xbf16>
    %c0_1 = arith.constant 0 : index
    %c0_2 = arith.constant 0 : index
    %2 = vector.load %arg2[%c0_1, %c0_2] : memref<512x256xbf16, #tpu.memory_space<vmem>>, vector<512x256xbf16>
    %cst = arith.constant dense<0.000000e+00> : vector<8x256xf32>
    %3 = tpu.matmul %1, %2, %cst {dimension_numbers = #tpu.dot_dimension_numbers<[1], [0], [0], [1], [0, 0, 1, 1], [], []>} : vector<8x512xbf16>, vector<512x256xbf16>, vector<8x256xf32> -> vector<8x256xf32>
    %c0_3 = arith.constant 0 : index
    %c0_4 = arith.constant 0 : index
    %4 = vector.load %arg3[%c0_3, %c0_4] : memref<1x256xf32, #tpu.memory_space<vmem>>, vector<1x256xf32>
    %5 = vector.broadcast %4 : vector<1x256xf32> to vector<8x256xf32>
    %6 = arith.addf %3, %5 : vector<8x256xf32>
    %cst_5 = arith.constant 0.000000e+00 : f32
    %7 = vector.broadcast %cst_5 : f32 to vector<8x256xf32>
    %8 = arith.maximumf %6, %7 : vector<8x256xf32>
    %c0_6 = arith.constant 0 : index
    %c0_7 = arith.constant 0 : index
    %9 = vector.load %arg4[%c0_6, %c0_7] : memref<8x256xf32, #tpu.memory_space<vmem>>, vector<8x256xf32>
    tpu.vector_store %arg4[%c0_6, %c0_7], %8 {strides = array<i32>} : memref<8x256xf32, #tpu.memory_space<vmem>>, vector<8x256xf32>,
    return
  }
  func.func @transform_0(%arg0: i32) -> (i32, i32) {
    %c0_i32 = arith.constant 0 : i32
    %c0_i32_0 = arith.constant 0 : i32
    return %arg0, %c0_i32 : i32, i32
  }
  func.func @transform_1(%arg0: i32) -> (i32, i32) {
    %c0_i32 = arith.constant 0 : i32
    %c0_i32_0 = arith.constant 0 : i32
    %c0_i32_1 = arith.constant 0 : i32
    return %c0_i32, %c0_i32_0 : i32, i32
  }
  func.func @transform_2(%arg0: i32) -> (i32, i32) {
    %c0_i32 = arith.constant 0 : i32
    %c0_i32_0 = arith.constant 0 : i32
    %c0_i32_1 = arith.constant 0 : i32
    return %c0_i32, %c0_i32_0 : i32, i32
  }
  func.func @transform_3(%arg0: i32) -> (i32, i32) {
    %c0_i32 = arith.constant 0 : i32
    %c0_i32_0 = arith.constant 0 : i32
    return %arg0, %c0_i32 : i32, i32
  }
}

module attributes {stable_mosaic.version = 11 : i64} {
  func.func @kernel(%arg0: i32, %arg1: memref<32x256xf32, #tpu.memory_space<vmem>>, %arg2: memref<256x128xbf16, #tpu.memory_space<vmem>>, %arg3: memref<1x128xf32, #tpu.memory_space<vmem>>, %arg4: memref<32x128xf32, #tpu.memory_space<vmem>>) attributes {dimension_semantics = [#tpu.dimension_semantics<parallel>], iteration_bounds = array<i64: 1>, scalar_prefetch = 0 : i64, scratch_operands = 0 : i64, tpu.core_type = #tpu.core_type<tc>, window_params = [{transform_indices = @transform_0, window_bounds = array<i64: 32, 256>}, {pipeline_mode = #tpu.pipeline_mode<synchronous>, transform_indices = @transform_1, window_bounds = array<i64: 256, 128>}, {pipeline_mode = #tpu.pipeline_mode<synchronous>, transform_indices = @transform_2, window_bounds = array<i64: 1, 128>}, {transform_indices = @transform_3, window_bounds = array<i64: 32, 128>}]} {
    %c0 = arith.constant 0 : index
    %c0_0 = arith.constant 0 : index
    %0 = vector.load %arg1[%c0, %c0_0] : memref<32x256xf32, #tpu.memory_space<vmem>>, vector<32x256xf32>
    %1 = arith.truncf %0 : vector<32x256xf32> to vector<32x256xbf16>
    %c0_1 = arith.constant 0 : index
    %c0_2 = arith.constant 0 : index
    %2 = vector.load %arg2[%c0_1, %c0_2] : memref<256x128xbf16, #tpu.memory_space<vmem>>, vector<256x128xbf16>
    %cst = arith.constant dense<0.000000e+00> : vector<32x128xf32>
    %3 = tpu.matmul %1, %2, %cst {dimension_numbers = #tpu.dot_dimension_numbers<[1], [0], [0], [1], [0, 0, 1, 1], [], []>} : vector<32x256xbf16>, vector<256x128xbf16>, vector<32x128xf32> -> vector<32x128xf32>
    %c0_3 = arith.constant 0 : index
    %c0_4 = arith.constant 0 : index
    %4 = vector.load %arg3[%c0_3, %c0_4] : memref<1x128xf32, #tpu.memory_space<vmem>>, vector<1x128xf32>
    %5 = vector.broadcast %4 : vector<1x128xf32> to vector<32x128xf32>
    %6 = arith.addf %3, %5 : vector<32x128xf32>
    %cst_5 = arith.constant 0.000000e+00 : f32
    %7 = vector.broadcast %cst_5 : f32 to vector<32x128xf32>
    %8 = arith.maximumf %6, %7 : vector<32x128xf32>
    %c0_6 = arith.constant 0 : index
    %c0_7 = arith.constant 0 : index
    %9 = vector.load %arg4[%c0_6, %c0_7] : memref<32x128xf32, #tpu.memory_space<vmem>>, vector<32x128xf32>
    tpu.vector_store %arg4[%c0_6, %c0_7], %8 {strides = array<i32>} : memref<32x128xf32, #tpu.memory_space<vmem>>, vector<32x128xf32>,
    return
  }
  func.func @transform_0(%arg0: i32) -> (i32, i32) {
    %c0_i32 = arith.constant 0 : i32
    %c0_i32_0 = arith.constant 0 : i32
    return %arg0, %c0_i32 : i32, i32
  }
  func.func @transform_1(%arg0: i32) -> (i32, i32) {
    %c0_i32 = arith.constant 0 : i32
    %c0_i32_0 = arith.constant 0 : i32
    %c0_i32_1 = arith.constant 0 : i32
    return %c0_i32, %c0_i32_0 : i32, i32
  }
  func.func @transform_2(%arg0: i32) -> (i32, i32) {
    %c0_i32 = arith.constant 0 : i32
    %c0_i32_0 = arith.constant 0 : i32
    %c0_i32_1 = arith.constant 0 : i32
    return %c0_i32, %c0_i32_0 : i32, i32
  }
  func.func @transform_3(%arg0: i32) -> (i32, i32) {
    %c0_i32 = arith.constant 0 : i32
    %c0_i32_0 = arith.constant 0 : i32
    return %arg0, %c0_i32 : i32, i32
  }
}

module attributes {stable_mosaic.version = 11 : i64} {
  func.func @kernel(%arg0: i32, %arg1: memref<128x128xf32, #tpu.memory_space<vmem>>, %arg2: memref<128x128xbf16, #tpu.memory_space<vmem>>, %arg3: memref<1x128xf32, #tpu.memory_space<vmem>>, %arg4: memref<128x128xf32, #tpu.memory_space<vmem>>) attributes {dimension_semantics = [#tpu.dimension_semantics<parallel>], iteration_bounds = array<i64: 1>, scalar_prefetch = 0 : i64, scratch_operands = 0 : i64, tpu.core_type = #tpu.core_type<tc>, window_params = [{transform_indices = @transform_0, window_bounds = array<i64: 128, 128>}, {pipeline_mode = #tpu.pipeline_mode<synchronous>, transform_indices = @transform_1, window_bounds = array<i64: 128, 128>}, {pipeline_mode = #tpu.pipeline_mode<synchronous>, transform_indices = @transform_2, window_bounds = array<i64: 1, 128>}, {transform_indices = @transform_3, window_bounds = array<i64: 128, 128>}]} {
    %c0 = arith.constant 0 : index
    %c0_0 = arith.constant 0 : index
    %0 = vector.load %arg1[%c0, %c0_0] : memref<128x128xf32, #tpu.memory_space<vmem>>, vector<128x128xf32>
    %1 = arith.truncf %0 : vector<128x128xf32> to vector<128x128xbf16>
    %c0_1 = arith.constant 0 : index
    %c0_2 = arith.constant 0 : index
    %2 = vector.load %arg2[%c0_1, %c0_2] : memref<128x128xbf16, #tpu.memory_space<vmem>>, vector<128x128xbf16>
    %cst = arith.constant dense<0.000000e+00> : vector<128x128xf32>
    %3 = tpu.matmul %1, %2, %cst {dimension_numbers = #tpu.dot_dimension_numbers<[1], [0], [0], [1], [0, 0, 1, 1], [], []>} : vector<128x128xbf16>, vector<128x128xbf16>, vector<128x128xf32> -> vector<128x128xf32>
    %c0_3 = arith.constant 0 : index
    %c0_4 = arith.constant 0 : index
    %4 = vector.load %arg3[%c0_3, %c0_4] : memref<1x128xf32, #tpu.memory_space<vmem>>, vector<1x128xf32>
    %5 = vector.broadcast %4 : vector<1x128xf32> to vector<128x128xf32>
    %6 = arith.addf %3, %5 : vector<128x128xf32>
    %c0_5 = arith.constant 0 : index
    %c0_6 = arith.constant 0 : index
    %7 = vector.load %arg4[%c0_5, %c0_6] : memref<128x128xf32, #tpu.memory_space<vmem>>, vector<128x128xf32>
    tpu.vector_store %arg4[%c0_5, %c0_6], %6 {strides = array<i32>} : memref<128x128xf32, #tpu.memory_space<vmem>>, vector<128x128xf32>,
    return
  }
  func.func @transform_0(%arg0: i32) -> (i32, i32) {
    %c0_i32 = arith.constant 0 : i32
    %c0_i32_0 = arith.constant 0 : i32
    return %arg0, %c0_i32 : i32, i32
  }
  func.func @transform_1(%arg0: i32) -> (i32, i32) {
    %c0_i32 = arith.constant 0 : i32
    %c0_i32_0 = arith.constant 0 : i32
    %c0_i32_1 = arith.constant 0 : i32
    return %c0_i32, %c0_i32_0 : i32, i32
  }
  func.func @transform_2(%arg0: i32) -> (i32, i32) {
    %c0_i32 = arith.constant 0 : i32
    %c0_i32_0 = arith.constant 0 : i32
    %c0_i32_1 = arith.constant 0 : i32
    return %c0_i32, %c0_i32_0 : i32, i32
  }
  func.func @transform_3(%arg0: i32) -> (i32, i32) {
    %c0_i32 = arith.constant 0 : i32
    %c0_i32_0 = arith.constant 0 : i32
    return %arg0, %c0_i32 : i32, i32
  }
}

</mosaic_0001>

<bundles_post_ra>
// kernel: ae_cnn_forward.7
= control target key start
LH: loop header
LB: loop body
LE: loop exit
PB: predicated region body
PF: predicated region fallthrough
CT: control target
= control target key end

     0   :  { %vm66_vm0 = vcmask 293888   ;;  %vm91_vm1 = vcmask 1041408   ;;  %s420_s1 = inlined_call_operand.vmem [shape: bf16[36,128], index: 1, kind: input, shape index: {}]   ;;  %s421_s0 = inlined_call_operand.vmem [shape: f32[128,36], index: 0, kind: input, shape index: {}]   ;;  %s422_s2 = inlined_call_operand.vmem [shape: f32[1,128], index: 2, kind: input, shape index: {}]   ;;  %s423_s3 = inlined_call_operand.vmem [shape: f32[128,128], index: 3, kind: output, shape index: {}]  }
   0x1   :  { %v281_v0 = vld [vmem:[%s420_s1] sm:$0xff]   ;;  %v282_v1 = vld [vmem:[%s420_s1 + $0x8] sm:$0xff]   ;;  %v283_v6 = vld [vmem:[%s420_s1 + $0x10] ss:$0 sps:$4 sm:$0x33]  }
   0x2   :  { %251 = vmatprep.subr.bf16.mxu0 %v281_v0  ;;  %273 = vmatprep.subr.bf16.mxu1 %v281_v0  ;;  %v15_v2 = vld [vmem:[%s421_s0] sm:$0xff]  ;;  %v16_v3 = vld [vmem:[%s421_s0 + $0x8] sm:$0xff]  ;;  %v17_v9 = vld [vmem:[%s421_s0 + $0x10] sm:$0xff]  ;;  %v93_v14 = vsel %vm91_vm1, %v283_v6, 0 }
   0x3   :  { %252 = vmatpush3.bf16.msra.mxu0 %v281_v0  ;;  %276 = vmatpush3.bf16.msra.mxu1 %v281_v0  ;;  %v23_v4 = vld [vmem:[%s421_s0 + $0x40] sm:$0xff]  ;;  %v24_v5 = vld [vmem:[%s421_s0 + $0x48] sm:$0xff]  ;;  %v31_v7 = vpack.c.bf16 %v16_v3, %v15_v2  ;;  %v18_v10 = vld [vmem:[%s421_s0 + $0x18] sm:$0xff] }
   0x4   :  { %253 = vmatprep.subr.bf16.mxu0 %v282_v1  ;;  %274 = vmatprep.subr.bf16.mxu1 %v282_v1  ;;  %v35_v8 = vpack.c.bf16 %v24_v5, %v23_v4  ;;  %v25_v11 = vld [vmem:[%s421_s0 + $0x50] sm:$0xff]  ;;  %v26_v12 = vld [vmem:[%s421_s0 + $0x58] sm:$0xff]  ;;  %v19_v13 = vld [vmem:[%s421_s0 + $0x20] sm:$0xff]  ;;  %v32_v18 = vpack.c.bf16 %v18_v10, %v17_v9 }
   0x5   :  { %257 = vmatprep.mubr.msk.bf16.mxu0 %vm66_vm0, %v31_v7  ;;  %v20_v15 = vld [vmem:[%s421_s0 + $0x28] sm:$0xff]  ;;  %v27_v16 = vld [vmem:[%s421_s0 + $0x60] sm:$0xff]  ;;  %v36_v19 = vpack.c.bf16 %v26_v12, %v25_v11  ;;  %v21_v22 = vld [vmem:[%s421_s0 + $0x30] sm:$0xff] }
   0x6   :  { %265 = vmatprep.mubr.msk.bf16.mxu1 %vm66_vm0, %v35_v8  ;;  %v28_v17 = vld [vmem:[%s421_s0 + $0x68] sm:$0xff]  ;;  %v33_v20 = vpack.c.bf16 %v20_v15, %v19_v13  ;;  %v22_v23 = vld [vmem:[%s421_s0 + $0x38] sm:$0xff]  ;;  %v29_v24 = vld [vmem:[%s421_s0 + $0x70] sm:$0xff] }
   0x7   :  { %254 = vmatpush3.bf16.msra.mxu0 %v282_v1  ;;  %277 = vmatpush3.bf16.msra.mxu1 %v282_v1  ;;  %v37_v21 = vpack.c.bf16 %v28_v17, %v27_v16  ;;  %v30_v25 = vld [vmem:[%s421_s0 + $0x78] sm:$0xff]  ;;  %v34_v26 = vpack.c.bf16 %v22_v23, %v21_v22  ;;  %v228_v28 = vld [vmem:[%s422_s2] ss:$0 sm:$0xff] }
   0x8   :  { %279 = vmatprep.subr.msk.bf16.mxu0 %vm91_vm1, %v283_v6  ;;  %280 = vmatprep.subr.msk.bf16.mxu1 %vm91_vm1, %v283_v6  ;;  %v38_v27 = vpack.c.bf16 %v30_v25, %v29_v24 }
   0xb   :  { %256 = vmatpush3.bf16.msra.mxu0 %v93_v14  ;;  %278 = vmatpush3.bf16.msra.mxu1 %v93_v14 }
   0xe   :  { %258 = vmatmul.mubr.msk.bf16.vlgmr.msra.gmra.mrb[0].mxu0 %vm66_vm0, %v32_v18  ;;  %266 = vmatmul.mubr.msk.bf16.vlgmr.msra.gmra.mrb[0].mxu1 %vm66_vm0, %v36_v19 }
   0xf   :  { %261 = vmatprep.mubr.msk.bf16.mxu0 %vm66_vm0, %v33_v20  ;;  %269 = vmatprep.mubr.msk.bf16.mxu1 %vm66_vm0, %v37_v21 }
  0x16   :  { %262 = vmatmul.mubr.msk.bf16.gmra.mrb[4].mxu0 %vm66_vm0, %v34_v26  ;;  %270 = vmatmul.mubr.msk.bf16.gmra.mrb[4].mxu1 %vm66_vm0, %v38_v27 }
  0xe1   :  { %v259_v29 = vpop.f32.mrb[0].mxu0  ;;  %v267_v30 = vpop.f32.mrb[0].mxu1 }
  0xe2   :  { %v138_v31 = vadd.f32 %v259_v29, %v228_v28  ;;  %v170_v32 = vadd.f32 %v267_v30, %v228_v28  ;;  %v129_v33 = vpop.f32.mrb[1].mxu0  ;;  %v161_v34 = vpop.f32.mrb[1].mxu1 }
  0xe3   :  { %v130_v35 = vadd.f32 %v228_v28, %v129_v33  ;;  %v162_v36 = vadd.f32 %v228_v28, %v161_v34  ;;  %v260_v37 = vpop.f32.mrb[2].mxu0  ;;  %v268_v38 = vpop.f32.mrb[2].mxu1 }
  0xe4   :  { %v194_v39 = vmax.f32 %v138_v31, 0.0  ;;  %v202_v40 = vmax.f32 %v170_v32, 0.0  ;;  %v141_v41 = vadd.f32 %v260_v37, %v228_v28  ;;  %v173_v42 = vadd.f32 %v268_v38, %v228_v28  ;;  %v132_v43 = vpop.f32.mrb[3].mxu0  ;;  %v164_v44 = vpop.f32.mrb[3].mxu1 }
  0xe5   :  { %v192_v45 = vmax.f32 %v130_v35, 0.0  ;;  %v200_v46 = vmax.f32 %v162_v36, 0.0  ;;  %v133_v47 = vadd.f32 %v228_v28, %v132_v43  ;;  %v165_v48 = vadd.f32 %v228_v28, %v164_v44 }
  0xe6   :  { %210 = vst [vmem:[%s423_s3 + $0x10] sm:$0xff] %v194_v39  ;;  %218 = vst [vmem:[%s423_s3 + $0x50] sm:$0xff] %v202_v40  ;;  %v195_v49 = vmax.f32 %v141_v41, 0.0  ;;  %v203_v50 = vmax.f32 %v173_v42, 0.0 }
  0xe7   :  { %208 = vst [vmem:[%s423_s3] sm:$0xff] %v192_v45  ;;  %216 = vst [vmem:[%s423_s3 + $0x40] sm:$0xff] %v200_v46  ;;  %v193_v51 = vmax.f32 %v133_v47, 0.0  ;;  %v201_v52 = vmax.f32 %v165_v48, 0.0 }
  0xe8   :  { %211 = vst [vmem:[%s423_s3 + $0x18] sm:$0xff] %v195_v49  ;;  %219 = vst [vmem:[%s423_s3 + $0x58] sm:$0xff] %v203_v50 }
  0xe9   :  { %209 = vst [vmem:[%s423_s3 + $0x8] sm:$0xff] %v193_v51  ;;  %217 = vst [vmem:[%s423_s3 + $0x48] sm:$0xff] %v201_v52  ;;  %v263_v53 = vpop.f32.mrb[4].mxu0  ;;  %v271_v54 = vpop.f32.mrb[4].mxu1 }
  0xea   :  { %v154_v55 = vadd.f32 %v263_v53, %v228_v28  ;;  %v186_v56 = vadd.f32 %v271_v54, %v228_v28  ;;  %v145_v57 = vpop.f32.mrb[5].mxu0  ;;  %v177_v58 = vpop.f32.mrb[5].mxu1 }
  0xeb   :  { %v146_v59 = vadd.f32 %v228_v28, %v145_v57  ;;  %v178_v60 = vadd.f32 %v228_v28, %v177_v58  ;;  %v264_v61 = vpop.f32.mrb[6].mxu0  ;;  %v272_v62 = vpop.f32.mrb[6].mxu1 }
  0xec   :  { %v198_v63 = vmax.f32 %v154_v55, 0.0  ;;  %v206_v0 = vmax.f32 %v186_v56, 0.0  ;;  %v157_v1 = vadd.f32 %v264_v61, %v228_v28  ;;  %v189_v2 = vadd.f32 %v272_v62, %v228_v28  ;;  %v148_v3 = vpop.f32.mrb[7].mxu0  ;;  %v180_v4 = vpop.f32.mrb[7].mxu1 }
  0xed   :  { %v196_v5 = vmax.f32 %v146_v59, 0.0  ;;  %v204_v6 = vmax.f32 %v178_v60, 0.0  ;;  %v149_v7 = vadd.f32 %v228_v28, %v148_v3  ;;  %v181_v8 = vadd.f32 %v228_v28, %v180_v4 }
  0xee   :  { %214 = vst [vmem:[%s423_s3 + $0x30] sm:$0xff] %v198_v63  ;;  %222 = vst [vmem:[%s423_s3 + $0x70] sm:$0xff] %v206_v0  ;;  %v199_v9 = vmax.f32 %v157_v1, 0.0  ;;  %v207_v10 = vmax.f32 %v189_v2, 0.0 }
  0xef   :  { %212 = vst [vmem:[%s423_s3 + $0x20] sm:$0xff] %v196_v5  ;;  %220 = vst [vmem:[%s423_s3 + $0x60] sm:$0xff] %v204_v6  ;;  %v197_v11 = vmax.f32 %v149_v7, 0.0  ;;  %v205_v12 = vmax.f32 %v181_v8, 0.0 }
  0xf0   :  { %215 = vst [vmem:[%s423_s3 + $0x38] sm:$0xff] %v199_v9  ;;  %223 = vst [vmem:[%s423_s3 + $0x78] sm:$0xff] %v207_v10 }
  0xf1   :  { %213 = vst [vmem:[%s423_s3 + $0x28] sm:$0xff] %v197_v11  ;;  %221 = vst [vmem:[%s423_s3 + $0x68] sm:$0xff] %v205_v12 }

// kernel: ae_cnn_forward.8
= control target key start
LH: loop header
LB: loop body
LE: loop exit
PB: predicated region body
PF: predicated region fallthrough
CT: control target
= control target key end

     0   :  { %vm184_vm0 = vcmask 261120   ;;  %s505_s1 = inlined_call_operand.vmem [shape: bf16[288,128], index: 1, kind: input, shape index: {}]   ;;  %s506_s0 = inlined_call_operand.vmem [shape: f32[32,288], index: 0, kind: input, shape index: {}]   ;;  %s507_s2 = inlined_call_operand.vmem [shape: f32[1,128], index: 2, kind: input, shape index: {}]   ;;  %s508_s3 = inlined_call_operand.vmem [shape: f32[32,128], index: 3, kind: output, shape index: {}]  }
   0x1   :  { %v362_v0 = vld [vmem:[%s505_s1 + $0x40] sm:$0xff]   ;;  %v364_v2 = vld [vmem:[%s505_s1 + $0x48] sm:$0xff]   ;;  %v366_v4 = vld [vmem:[%s505_s1 + $0x50] sm:$0xff]  }
   0x2   :  { %v363_v1 = vld [vmem:[%s505_s1] sm:$0xff]   ;;  %322 = vmatprep.subr.bf16.mxu0 %v362_v0  ;;  %v365_v3 = vld [vmem:[%s505_s1 + $0x8] sm:$0xff]   ;;  %v367_v5 = vld [vmem:[%s505_s1 + $0x10] sm:$0xff]  }
   0x3   :  { %323 = vmatpush3.bf16.msra.mxu0 %v363_v1  ;;  %v368_v6 = vld [vmem:[%s505_s1 + $0x58] sm:$0xff]   ;;  %v370_v8 = vld [vmem:[%s505_s1 + $0x60] sm:$0xff]   ;;  %v372_v11 = vld [vmem:[%s505_s1 + $0x68] sm:$0xff]  }
   0x4   :  { %324 = vmatprep.subr.bf16.mxu0 %v364_v2  ;;  %v369_v7 = vld [vmem:[%s505_s1 + $0x18] sm:$0xff]   ;;  %v371_v9 = vld [vmem:[%s505_s1 + $0x20] sm:$0xff]   ;;  %v16_v12 = vld [vmem:[%s506_s0 + $0x8] sm:$0xff] }
   0x5   :  { %v377_v10 = vld [vmem:[%s505_s1 + $0x80] sm:$0xff]   ;;  %v373_v14 = vld [vmem:[%s505_s1 + $0x28] sm:$0xff]   ;;  %v17_v17 = vld [vmem:[%s506_s0 + $0x10] sm:$0xff] }
   0x6   :  { %354 = vmatprep.subr.bf16.mxu1 %v377_v10  ;;  %v19_v13 = vld [vmem:[%s506_s0 + $0x20] sm:$0xff]  ;;  %v379_v16 = vld [vmem:[%s505_s1 + $0x88] sm:$0xff]   ;;  %v374_v19 = vld [vmem:[%s505_s1 + $0x70] sm:$0xff]  }
   0x7   :  { %325 = vmatpush3.bf16.msra.mxu0 %v365_v3  ;;  %355 = vmatpush3.bf16.msra.mxu1 %v377_v10  ;;  %v28_v15 = vpack.c.bf16 %v19_v13, %v16_v12  ;;  %v20_v18 = vld [vmem:[%s506_s0 + $0x28] sm:$0xff]  ;;  %v23_v21 = vld [vmem:[%s506_s0 + $0x40] sm:$0xff]  ;;  %v26_v22 = vld [vmem:[%s506_s0 + $0x58] sm:$0xff] }
   0x8   :  { %326 = vmatprep.subr.bf16.mxu0 %v366_v4  ;;  %v29_v20 = vpack.c.bf16 %v20_v18, %v17_v17  ;;  %356 = vmatprep.subr.bf16.mxu1 %v379_v16  ;;  %v32_v23 = vpack.c.bf16 %v26_v22, %v23_v21  ;;  %v375_v24 = vld [vmem:[%s505_s1 + $0x30] sm:$0xff]   ;;  %v376_v25 = vld [vmem:[%s505_s1 + $0x78] sm:$0xff]   ;;  %v15_v27 = vld [vmem:[%s506_s0] sm:$0xff] }
   0x9   :  { %223 = vmatprep.mubr.bf16.mxu0 %v28_v15  ;;  %v378_v26 = vld [vmem:[%s505_s1 + $0x38] sm:$0xff]   ;;  %v25_v30 = vld [vmem:[%s506_s0 + $0x50] sm:$0xff]  ;;  %v24_v34 = vld [vmem:[%s506_s0 + $0x48] sm:$0xff] }
   0xa   :  { %358 = vmatprep.mubr.msk.bf16.mxu1 %vm184_vm0, %v29_v20  ;;  %v18_v28 = vld [vmem:[%s506_s0 + $0x18] sm:$0xff]  ;;  %v21_v33 = vld [vmem:[%s506_s0 + $0x30] sm:$0xff]  ;;  %v301_v42 = vld [vmem:[%s507_s2] ss:$0 sm:$0xff] }
   0xb   :  { %327 = vmatpush3.bf16.msra.mxu0 %v367_v5  ;;  %357 = vmatpush3.bf16.msra.mxu1 %v379_v16  ;;  %v22_v29 = vld [vmem:[%s506_s0 + $0x38] sm:$0xff]  ;;  %v27_v31 = vpack.c.bf16 %v18_v28, %v15_v27  ;;  %v30_v35 = vpack.c.bf16 %v24_v34, %v21_v33 }
   0xc   :  { %328 = vmatprep.subr.bf16.mxu0 %v368_v6  ;;  %v31_v32 = vpack.c.bf16 %v25_v30, %v22_v29 }
   0xe   :  { %359 = vmatmul.mubr.msk.bf16.vlgmr.msra.gmra.mrb[0].mxu1 %vm184_vm0, %v32_v23 }
   0xf   :  { %329 = vmatpush3.bf16.msra.mxu0 %v369_v7 }
  0x10   :  { %330 = vmatprep.subr.bf16.mxu0 %v370_v8 }
  0x13   :  { %331 = vmatpush3.bf16.msra.mxu0 %v371_v9 }
  0x14   :  { %332 = vmatprep.subr.bf16.mxu0 %v372_v11 }
  0x17   :  { %333 = vmatpush3.bf16.msra.mxu0 %v373_v14 }
  0x18   :  { %334 = vmatprep.subr.bf16.mxu0 %v374_v19 }
  0x1b   :  { %335 = vmatpush3.bf16.msra.mxu0 %v375_v24 }
  0x1c   :  { %336 = vmatprep.subr.bf16.mxu0 %v376_v25 }
  0x1f   :  { %337 = vmatpush3.bf16.msra.mxu0 %v378_v26 }
  0x22   :  { %224 = vmatmul.mubr.bf16.vlgmr.msra.gmra.mrb[0].mxu0 %v27_v31 }
  0x23   :  { %231 = vmatprep.mubr.bf16.mxu0 %v31_v32 }
  0x2a   :  { %232 = vmatmul.mubr.bf16.gmra.mrb[4].mxu0 %v30_v35 }
  0xe1   :  { %v360_v36 = vpop.f32.mrb[0].mxu1 }
  0xe2   :  { %v274_v37 = vpop.f32.mrb[1].mxu1 }
  0xe3   :  { %v361_v38 = vpop.f32.mrb[2].mxu1 }
  0xe4   :  { %v277_v39 = vpop.f32.mrb[3].mxu1 }
  0xf5   :  { %v338_v40 = vpop.f32.mrb[0].mxu0 }
  0xf6   :  { %v339_v41 = vpop.f32.mrb[1].mxu0 }
  0xf7   :  { %v340_v43 = vadd.f32 %v339_v41, %v338_v40  ;;  %v341_v44 = vpop.f32.mrb[2].mxu0 }
  0xf8   :  { %v342_v45 = vpop.f32.mrb[3].mxu0 }
  0xf9   :  { %v343_v46 = vadd.f32 %v342_v45, %v341_v44  ;;  %v226_v47 = vadd.f32 %v340_v43, %v301_v42 }
  0xfb   :  { %v275_v48 = vadd.f32 %v274_v37, %v226_v47  ;;  %v229_v49 = vadd.f32 %v343_v46, %v301_v42 }
  0xfd   :  { %v289_v50 = vmax.f32 %v275_v48, 0.0  ;;  %v278_v51 = vadd.f32 %v277_v39, %v229_v49  ;;  %v344_v52 = vpop.f32.mrb[4].mxu0 }
  0xfe   :  { %v345_v53 = vpop.f32.mrb[5].mxu0 }
  0xff   :  { %293 = vst [vmem:[%s508_s3] sm:$0xff] %v289_v50  ;;  %v290_v54 = vmax.f32 %v278_v51, 0.0  ;;  %v346_v55 = vadd.f32 %v345_v53, %v344_v52  ;;  %v347_v56 = vpop.f32.mrb[6].mxu0 }
 0x100   :  { %v348_v57 = vpop.f32.mrb[7].mxu0 }
 0x101   :  { %294 = vst [vmem:[%s508_s3 + $0x8] sm:$0xff] %v290_v54  ;;  %v234_v58 = vadd.f32 %v346_v55, %v301_v42  ;;  %v349_v59 = vadd.f32 %v348_v57, %v347_v56 }
 0x103   :  { %v283_v60 = vadd.f32 %v360_v36, %v234_v58  ;;  %v237_v61 = vadd.f32 %v349_v59, %v301_v42 }
 0x105   :  { %v291_v62 = vmax.f32 %v283_v60, 0.0  ;;  %v286_v63 = vadd.f32 %v361_v38, %v237_v61 }
 0x107   :  { %295 = vst [vmem:[%s508_s3 + $0x10] sm:$0xff] %v291_v62  ;;  %v292_v0 = vmax.f32 %v286_v63, 0.0 }
 0x109   :  { %296 = vst [vmem:[%s508_s3 + $0x18] sm:$0xff] %v292_v0 }

// kernel: ae_cnn_forward.9
= control target key start
LH: loop header
LB: loop body
LE: loop exit
PB: predicated region body
PF: predicated region fallthrough
CT: control target
= control target key end

     0   :  { %v587_v35 = vmov 0.0   ;;  %vm588_vm0 = vmmov 0   ;;  %vm320_vm1 = vcmask 523264   ;;  %s738_s1 = inlined_call_operand.vmem [shape: bf16[576,128], index: 1, kind: input, shape index: {}]   ;;  %s739_s0 = inlined_call_operand.vmem [shape: f32[8,576], index: 0, kind: input, shape index: {}]   ;;  %s740_s2 = inlined_call_operand.vmem [shape: f32[1,128], index: 2, kind: input, shape index: {}]   ;;  %s741_s3 = inlined_call_operand.vmem [shape: f32[8,128], index: 3, kind: output, shape index: {}]  }
   0x1   :  { %v551_v0 = vld [vmem:[%s738_s1 + $0x40] sm:$0xff]   ;;  %v555_v4 = vld [vmem:[%s738_s1 + $0x48] sm:$0xff]   ;;  %v559_v8 = vld [vmem:[%s738_s1 + $0x50] sm:$0xff]  }
   0x2   :  { %v552_v1 = vld [vmem:[%s738_s1] sm:$0xff]   ;;  %488 = vmatprep.subr.bf16.mxu0 %v551_v0  ;;  %v556_v5 = vld [vmem:[%s738_s1 + $0x8] sm:$0xff]   ;;  %v560_v9 = vld [vmem:[%s738_s1 + $0x10] sm:$0xff]  }
   0x3   :  { %v553_v2 = vld [vmem:[%s738_s1 + $0xc0] sm:$0xff]   ;;  %489 = vmatpush3.bf16.msra.mxu0 %v552_v1  ;;  %v557_v6 = vld [vmem:[%s738_s1 + $0xc8] sm:$0xff]   ;;  %v561_v10 = vld [vmem:[%s738_s1 + $0xd0] sm:$0xff]  }
   0x4   :  { %v554_v3 = vld [vmem:[%s738_s1 + $0x80] sm:$0xff]   ;;  %510 = vmatprep.subr.bf16.mxu1 %v553_v2  ;;  %490 = vmatprep.subr.bf16.mxu0 %v555_v4  ;;  %v558_v7 = vld [vmem:[%s738_s1 + $0x88] sm:$0xff]   ;;  %v562_v11 = vld [vmem:[%s738_s1 + $0x90] sm:$0xff]  }
   0x5   :  { %511 = vmatpush3.bf16.msra.mxu1 %v554_v3  ;;  %v563_v12 = vld [vmem:[%s738_s1 + $0x58] sm:$0xff]   ;;  %v567_v16 = vld [vmem:[%s738_s1 + $0x60] sm:$0xff]   ;;  %v571_v20 = vld [vmem:[%s738_s1 + $0x68] sm:$0xff]  }
   0x6   :  { %512 = vmatprep.subr.bf16.mxu1 %v557_v6  ;;  %v564_v13 = vld [vmem:[%s738_s1 + $0x18] sm:$0xff]   ;;  %v568_v17 = vld [vmem:[%s738_s1 + $0x20] sm:$0xff]   ;;  %v572_v21 = vld [vmem:[%s738_s1 + $0x28] sm:$0xff]  }
   0x7   :  { %491 = vmatpush3.bf16.msra.mxu0 %v556_v5  ;;  %v565_v14 = vld [vmem:[%s738_s1 + $0xd8] sm:$0xff]   ;;  %v569_v18 = vld [vmem:[%s738_s1 + $0xe0] sm:$0xff]   ;;  %v573_v22 = vld [vmem:[%s738_s1 + $0xe8] sm:$0xff]  }
   0x8   :  { %492 = vmatprep.subr.bf16.mxu0 %v559_v8  ;;  %v566_v15 = vld [vmem:[%s738_s1 + $0x98] sm:$0xff]   ;;  %v570_v19 = vld [vmem:[%s738_s1 + $0xa0] sm:$0xff]   ;;  %v574_v23 = vld [vmem:[%s738_s1 + $0xa8] sm:$0xff]  }
   0x9   :  { %513 = vmatpush3.bf16.msra.mxu1 %v558_v7  ;;  %v575_v24 = vld [vmem:[%s738_s1 + $0x70] sm:$0xff]   ;;  %v579_v28 = vld [vmem:[%s738_s1 + $0x78] sm:$0xff]   ;;  %v16_v31 = vld [vmem:[%s739_s0 + $0x8] sm:$0xff] }
   0xa   :  { %514 = vmatprep.subr.bf16.mxu1 %v561_v10  ;;  %v576_v25 = vld [vmem:[%s738_s1 + $0x30] sm:$0xff]   ;;  %v580_v29 = vld [vmem:[%s738_s1 + $0x38] sm:$0xff]   ;;  %v21_v32 = vpack.c.bf16 %v16_v31, %v16_v31  ;;  %v15_v34 = vld [vmem:[%s739_s0] sm:$0xff] }
   0xb   :  { %493 = vmatpush3.bf16.msra.mxu0 %v560_v9  ;;  %v577_v26 = vld [vmem:[%s738_s1 + $0xf0] sm:$0xff]   ;;  %v581_v30 = vld [vmem:[%s738_s1 + $0xf8] sm:$0xff]   ;;  %v20_v37 = vpack.c.bf16 %v15_v34, %v15_v34  ;;  %v583_v39 = vld [vmem:[%s738_s1 + $0x100] sm:$0xff]  }
   0xc   :  { %494 = vmatprep.subr.bf16.mxu0 %v563_v12  ;;  %v578_v27 = vld [vmem:[%s738_s1 + $0xb0] sm:$0xff]   ;;  %v582_v33 = vld [vmem:[%s738_s1 + $0xb8] sm:$0xff]   ;;  %356 = vmatprep.mubr.bf16.mxu0 %v21_v32  ;;  %v584_v42 = vld [vmem:[%s738_s1 + $0x108] sm:$0xff]  }
   0xd   :  { %515 = vmatpush3.bf16.msra.mxu1 %v562_v11  ;;  %v18_v36 = vld [vmem:[%s739_s0 + $0x18] sm:$0xff]  ;;  %v17_v40 = vld [vmem:[%s739_s0 + $0x10] sm:$0xff]  ;;  %v19_v45 = vld [vmem:[%s739_s0 + $0x20] sm:$0xff] }
   0xe   :  { %516 = vmatprep.subr.bf16.mxu1 %v565_v14  ;;  %v23_v38 = vpack.c.bf16 %v18_v36, %v18_v36  ;;  %v22_v41 = vpack.c.bf16 %v17_v40, %v17_v40  ;;  %v585_v43 = vld [vmem:[%s738_s1 + $0x110] sm:$0xff]   ;;  %v586_v44 = vld [vmem:[%s738_s1 + $0x118] sm:$0xff]   ;;  %v24_v46 = vpack.c.bf16 %v19_v45, %v19_v45  ;;  %v450_v48 = vld [vmem:[%s740_s2] ss:$0 sm:$0xff] }
   0xf   :  { %495 = vmatpush3.bf16.msra.mxu0 %v564_v13 }
  0x10   :  { %496 = vmatprep.subr.bf16.mxu0 %v567_v16  ;;  %396 = vmatprep.mubr.bf16.mxu1 %v23_v38 }
  0x11   :  { %517 = vmatpush3.bf16.msra.mxu1 %v566_v15 }
  0x12   :  { %518 = vmatprep.subr.bf16.mxu1 %v569_v18 }
  0x13   :  { %497 = vmatpush3.bf16.msra.mxu0 %v568_v17 }
  0x14   :  { %498 = vmatprep.subr.bf16.mxu0 %v571_v20 }
  0x15   :  { %519 = vmatpush3.bf16.msra.mxu1 %v570_v19 }
  0x16   :  { %520 = vmatprep.subr.bf16.mxu1 %v573_v22 }
  0x17   :  { %499 = vmatpush3.bf16.msra.mxu0 %v572_v21 }
  0x18   :  { %500 = vmatprep.subr.bf16.mxu0 %v575_v24 }
  0x19   :  { %521 = vmatpush3.bf16.msra.mxu1 %v574_v23 }
  0x1a   :  { %522 = vmatprep.subr.bf16.mxu1 %v577_v26 }
  0x1b   :  { %501 = vmatpush3.bf16.msra.mxu0 %v576_v25 }
  0x1c   :  { %502 = vmatprep.subr.bf16.mxu0 %v579_v28 }
  0x1d   :  { %523 = vmatpush3.bf16.msra.mxu1 %v578_v27 }
  0x1e   :  { %524 = vmatprep.subr.bf16.mxu1 %v581_v30 }
  0x1f   :  { %503 = vmatpush3.bf16.msra.mxu0 %v580_v29 }
  0x20   :  { %537 = vmatprep.subr.bf16.mxu0 %v587_v35 }
  0x21   :  { %525 = vmatpush3.bf16.msra.mxu1 %v582_v33 }
  0x22   :  { %357 = vmatmul.mubr.bf16.vlgmr.msra.gmra.mrb[0].mxu0 %v20_v37 }
  0x23   :  { %538 = vmatpush3.bf16.msra.mxu0 %v583_v39  ;;  %545 = vmatprep.mubr.msk.bf16.mxu0 %vm588_vm0, %v587_v35 }
  0x24   :  { %397 = vmatmul.mubr.bf16.vlgmr.msra.gmra.mrb[0].mxu1 %v22_v41  ;;  %539 = vmatprep.subr.bf16.mxu0 %v587_v35 }
  0x27   :  { %540 = vmatpush3.bf16.msra.mxu0 %v584_v42 }
  0x28   :  { %541 = vmatprep.subr.bf16.mxu0 %v587_v35 }
  0x2b   :  { %542 = vmatpush3.bf16.msra.mxu0 %v585_v43 }
  0x2c   :  { %543 = vmatprep.subr.bf16.mxu0 %v587_v35 }
  0x2f   :  { %544 = vmatpush3.bf16.msra.mxu0 %v586_v44 }
  0x32   :  { %546 = vmatmul.mubr.msk.bf16.vlgmr.msra.gmra.mrb[4].mxu0 %vm320_vm1, %v24_v46 }
  0xf5   :  { %v504_v47 = vpop.f32.mrb[0].mxu0 }
  0xf6   :  { %v505_v49 = vpop.f32.mrb[1].mxu0 }
  0xf7   :  { %v506_v50 = vadd.f32 %v505_v49, %v504_v47  ;;  %v507_v51 = vpop.f32.mrb[2].mxu0  ;;  %v526_v52 = vpop.f32.mrb[0].mxu1 }
  0xf8   :  { %v508_v53 = vpop.f32.mrb[3].mxu0  ;;  %v527_v54 = vpop.f32.mrb[1].mxu1 }
  0xf9   :  { %v359_v55 = vadd.f32 %v506_v50, %v450_v48  ;;  %v528_v56 = vadd.f32 %v527_v54, %v526_v52  ;;  %v529_v57 = vpop.f32.mrb[2].mxu1 }
  0xfa   :  { %v530_v58 = vpop.f32.mrb[3].mxu1 }
  0xfb   :  { %v399_v59 = vadd.f32 %v528_v56, %v359_v55 }
 0x105   :  { %v438_v60 = vpop.f32.mrb[4].mxu0 }
 0x106   :  { %v439_v61 = vadd.f32 %v438_v60, %v399_v59  ;;  %v547_v62 = vpop.f32.mrb[5].mxu0 }
 0x107   :  { %v441_v63 = vpop.f32.mrb[6].mxu0 }
 0x108   :  { %v444_v0 = vmax.f32 %v439_v61, 0.0  ;;  %v548_v1 = vpop.f32.mrb[7].mxu0 }
 0x10a   :  { %445 = vst [vmem:[%s741_s3] sm:$0xff] %v444_v0 }

// kernel: tile.18
= control target key start
LH: loop header
LB: loop body
LE: loop exit
PB: predicated region body
PF: predicated region fallthrough
CT: control target
= control target key end

     0   :  { %s22_s0 = inlined_call_operand.vmem [shape: f32[64], index: 0, kind: input, shape index: {}]   ;;  %s23_s1 = inlined_call_operand.vmem [shape: f32[4,64], index: 1, kind: output, shape index: {}]  }
   0x1   :  { %v4_v0 = vld [vmem:[%s22_s0] ss:$0 sm:$0xff] }
   0x2   :  { %5 = vst [vmem:[%s23_s1] sm:$0xf] %v4_v0 }

// kernel: tile.19
= control target key start
LH: loop header
LB: loop body
LE: loop exit
PB: predicated region body
PF: predicated region fallthrough
CT: control target
= control target key end

     0   :  { %s6_s8 = smov 3  ;;  %vm8_vm0 = vcmask 523264   ;;  %s30_s9 = smov 64   ;;  %vm15_vm1 = vcmask 1048064   ;;  %s50_s0 = inlined_call_operand.vmem [shape: f32[4,64], index: 0, kind: input, shape index: {}]   ;;  %s51_s1 = inlined_call_operand.vmem [shape: f32[1,256], index: 1, kind: output, shape index: {}]  }
   0x1   :  { %v4_v0 = vld [vmem:[%s50_s0] sm:$0xf]  ;;  %s11_s0 = smov 3 }
   0x2   :  { %5 = vst [vmem:[#allocation1] sm:$0xf] %v4_v0 }
   0x9   :  { %v12_v1 = vld [vmem:[#allocation1 + $0x1] ss:$2 sm:%s11_s0]   ;;  %v7_v2 = vld [vmem:[#allocation1] ss:$2 sm:%s6_s8]  }
   0xa   :  { %13 = vrot.lane.b32.xlu0 %v12_v1, %s30_s9  ;;  %9 = vst.msk [vmem:[#allocation0] ss:$8 sm:$0x3] %vm8_vm0, %v7_v2  }
  0x7c   :  { %v14_v3 = vpop.permute.xlu0 %13  }
  0x7d   :  { %16 = vst.msk [vmem:[#allocation0] ss:$8 sm:$0x3] %vm15_vm1, %v14_v3  }
  0x84   :  { %v20_v4 = vld [vmem:[#allocation0] sm:$0x1]  ;;  %v24_v5 = vld [vmem:[#allocation0 + $0x8] sm:$0x1] }
  0x85   :  { %22 = vst [vmem:[%s51_s1] sm:$0x1] %v20_v4  ;;  %28 = vst [vmem:[%s51_s1 + $0x1] sm:$0x1] %v24_v5 }

// kernel: ae_cnn_forward.10
= control target key start
LH: loop header
LB: loop body
LE: loop exit
PB: predicated region body
PF: predicated region fallthrough
CT: control target
= control target key end

     0   :  { %s8510_s1 = inlined_call_operand.vmem [shape: bf16[512,1024], index: 1, kind: input, shape index: {}]   ;;  %s8511_s0 = inlined_call_operand.vmem [shape: f32[8,512], index: 0, kind: input, shape index: {}]   ;;  %s8512_s3 = inlined_call_operand.vmem [shape: bf16[1024,128], index: 3, kind: input, shape index: {}]   ;;  %s8513_s2 = inlined_call_operand.vmem [shape: f32[1,1024], index: 2, kind: input, shape index: {}]   ;;  %s8514_s5 = inlined_call_operand.vmem [shape: bf16[128,1024], index: 5, kind: input, shape index: {}]   ;;  %s8515_s4 = inlined_call_operand.vmem [shape: f32[1,128], index: 4, kind: input, shape index: {}]   ;;  %s8516_s7 = inlined_call_operand.vmem [shape: bf16[1024,512], index: 7, kind: input, shape index: {}]   ;;  %s8517_s9 = inlined_call_operand.vmem [shape: f32[8,128], index: 9, kind: output, shape index: {0}]   ;;  %s8518_s6 = inlined_call_operand.vmem [shape: f32[1,1024], index: 6, kind: input, shape index: {}]   ;;  %s8519_s8 = inlined_call_operand.vmem [shape: f32[1,512], index: 8, kind: input, shape index: {}]   ;;  %s8520_s10 = inlined_call_operand.vmem [shape: f32[8,512], index: 10, kind: output, shape index: {1}]  }
   0x1   :  { %v43_v0 = vld [vmem:[%s8510_s1] sm:$0xff]  ;;  %v44_v2 = vld [vmem:[%s8510_s1 + $0x8] sm:$0xff] }
   0x2   :  { %v47_v1 = vld [vmem:[%s8510_s1 + $0x20] sm:$0xff]  ;;  %v48_v4 = vld [vmem:[%s8510_s1 + $0x28] sm:$0xff] }
   0x3   :  { %v5155_v3 = vcombine.high %v43_v0, %v47_v1  ;;  %v5154_v5 = vcombine.low %v43_v0, %v47_v1  ;;  %v51_v6 = vld [vmem:[%s8510_s1 + $0x40] sm:$0xff]  ;;  %v5157_v8 = vcombine.high %v44_v2, %v48_v4  ;;  %v5156_v9 = vcombine.low %v44_v2, %v48_v4  ;;  %v52_v11 = vld [vmem:[%s8510_s1 + $0x48] sm:$0xff] }
   0x4   :  { %v55_v7 = vld [vmem:[%s8510_s1 + $0x60] sm:$0xff]  ;;  %v56_v12 = vld [vmem:[%s8510_s1 + $0x68] sm:$0xff] }
   0x5   :  { %v5163_v10 = vcombine.high %v51_v6, %v55_v7  ;;  %v59_v13 = vld [vmem:[%s8510_s1 + $0x80] sm:$0xff]  ;;  %1621 = vmatprep.subr.bf16.mxu0 %v5155_v3  ;;  %v5165_v14 = vcombine.high %v52_v11, %v56_v12  ;;  %v60_v16 = vld [vmem:[%s8510_s1 + $0x88] sm:$0xff]  ;;  %1703 = vmatprep.subr.bf16.mxu1 %v5157_v8  ;;  %v5162_v18 = vcombine.low %v51_v6, %v55_v7 }
   0x6   :  { %v63_v15 = vld [vmem:[%s8510_s1 + $0xa0] sm:$0xff]  ;;  %v64_v17 = vld [vmem:[%s8510_s1 + $0xa8] sm:$0xff]  ;;  %1622 = vmatpush1.bf16.msra.mxu0 %v5154_v5  ;;  %1704 = vmatpush1.bf16.msra.mxu1 %v5156_v9  ;;  %v5164_v19 = vcombine.low %v52_v11, %v56_v12 }
   0x7   :  { %1623 = vmatprep.subr.bf16.mxu0 %v5163_v10  ;;  %v5171_v20 = vcombine.high %v59_v13, %v63_v15  ;;  %1705 = vmatprep.subr.bf16.mxu1 %v5165_v14  ;;  %v5173_v21 = vcombine.high %v60_v16, %v64_v17  ;;  %v67_v22 = vld [vmem:[%s8510_s1 + $0xc0] sm:$0xff]  ;;  %v68_v24 = vld [vmem:[%s8510_s1 + $0xc8] sm:$0xff]  ;;  %v5170_v26 = vcombine.low %v59_v13, %v63_v15 }
   0x8   :  { %v71_v23 = vld [vmem:[%s8510_s1 + $0xe0] sm:$0xff]  ;;  %v72_v25 = vld [vmem:[%s8510_s1 + $0xe8] sm:$0xff]  ;;  %v5172_v27 = vcombine.low %v60_v16, %v64_v17 }
   0x9   :  { %v5179_v28 = vcombine.high %v67_v22, %v71_v23  ;;  %v5181_v29 = vcombine.high %v68_v24, %v72_v25  ;;  %v75_v30 = vld [vmem:[%s8510_s1 + $0x100] sm:$0xff]  ;;  %v76_v32 = vld [vmem:[%s8510_s1 + $0x108] sm:$0xff]  ;;  %v5178_v34 = vcombine.low %v67_v22, %v71_v23  ;;  %v5180_v35 = vcombine.low %v68_v24, %v72_v25 }
   0xa   :  { %1624 = vmatpush1.bf16.msra.mxu0 %v5162_v18  ;;  %1706 = vmatpush1.bf16.msra.mxu1 %v5164_v19  ;;  %v79_v31 = vld [vmem:[%s8510_s1 + $0x120] sm:$0xff]  ;;  %v80_v33 = vld [vmem:[%s8510_s1 + $0x128] sm:$0xff] }
   0xb   :  { %1625 = vmatprep.subr.bf16.mxu0 %v5171_v20  ;;  %1707 = vmatprep.subr.bf16.mxu1 %v5173_v21  ;;  %v5187_v36 = vcombine.high %v75_v30, %v79_v31  ;;  %v5189_v37 = vcombine.high %v76_v32, %v80_v33  ;;  %v83_v38 = vld [vmem:[%s8510_s1 + $0x140] sm:$0xff]  ;;  %v84_v40 = vld [vmem:[%s8510_s1 + $0x148] sm:$0xff]  ;;  %v5186_v42 = vcombine.low %v75_v30, %v79_v31 }
   0xc   :  { %v87_v39 = vld [vmem:[%s8510_s1 + $0x160] sm:$0xff]  ;;  %v88_v41 = vld [vmem:[%s8510_s1 + $0x168] sm:$0xff]  ;;  %v5188_v43 = vcombine.low %v76_v32, %v80_v33 }
   0xd   :  { %v5195_v44 = vcombine.high %v83_v38, %v87_v39  ;;  %v5197_v45 = vcombine.high %v84_v40, %v88_v41  ;;  %v91_v46 = vld [vmem:[%s8510_s1 + $0x180] sm:$0xff]  ;;  %v92_v48 = vld [vmem:[%s8510_s1 + $0x188] sm:$0xff]  ;;  %v5194_v50 = vcombine.low %v83_v38, %v87_v39  ;;  %v5196_v51 = vcombine.low %v84_v40, %v88_v41 }
   0xe   :  { %1626 = vmatpush1.bf16.msra.mxu0 %v5170_v26  ;;  %1708 = vmatpush1.bf16.msra.mxu1 %v5172_v27  ;;  %v95_v47 = vld [vmem:[%s8510_s1 + $0x1a0] sm:$0xff]  ;;  %v96_v49 = vld [vmem:[%s8510_s1 + $0x1a8] sm:$0xff] }
   0xf   :  { %1627 = vmatprep.subr.bf16.mxu0 %v5179_v28  ;;  %1709 = vmatprep.subr.bf16.mxu1 %v5181_v29  ;;  %v5203_v52 = vcombine.high %v91_v46, %v95_v47  ;;  %v36_v53 = vld [vmem:[%s8511_s0 + $0x8] sm:$0xff]  ;;  %v5205_v54 = vcombine.high %v92_v48, %v96_v49  ;;  %v99_v55 = vld [vmem:[%s8510_s1 + $0x1c0] sm:$0xff]  ;;  %v5202_v60 = vcombine.low %v91_v46, %v95_v47 }
  0x10   :  { %v103_v56 = vld [vmem:[%s8510_s1 + $0x1e0] sm:$0xff]  ;;  %v6533_v57 = vpack.c.bf16 %v36_v53, %v36_v53  ;;  %v100_v58 = vld [vmem:[%s8510_s1 + $0x1c8] sm:$0xff]  ;;  %v5204_v61 = vcombine.low %v92_v48, %v96_v49 }
  0x11   :  { %v104_v59 = vld [vmem:[%s8510_s1 + $0x1e8] sm:$0xff]  ;;  %v5211_v62 = vcombine.high %v99_v55, %v103_v56  ;;  %v107_v0 = vld [vmem:[%s8510_s1 + $0x200] sm:$0xff]  ;;  %v5210_v4 = vcombine.low %v99_v55, %v103_v56 }
  0x12   :  { %1628 = vmatpush1.bf16.msra.mxu0 %v5178_v34  ;;  %1710 = vmatpush1.bf16.msra.mxu1 %v5180_v35  ;;  %v5213_v63 = vcombine.high %v100_v58, %v104_v59  ;;  %v111_v1 = vld [vmem:[%s8510_s1 + $0x220] sm:$0xff]  ;;  %v108_v2 = vld [vmem:[%s8510_s1 + $0x208] sm:$0xff]  ;;  %v5212_v5 = vcombine.low %v100_v58, %v104_v59 }
  0x13   :  { %1629 = vmatprep.subr.bf16.mxu0 %v5187_v36  ;;  %1711 = vmatprep.subr.bf16.mxu1 %v5189_v37  ;;  %v112_v3 = vld [vmem:[%s8510_s1 + $0x228] sm:$0xff]  ;;  %v5219_v6 = vcombine.high %v107_v0, %v111_v1  ;;  %v115_v8 = vld [vmem:[%s8510_s1 + $0x240] sm:$0xff]  ;;  %v5218_v12 = vcombine.low %v107_v0, %v111_v1 }
  0x14   :  { %1653 = vmatprep.mubr.bf16.mxu0 %v6533_v57  ;;  %1735 = vmatprep.mubr.bf16.mxu1 %v6533_v57  ;;  %v5221_v7 = vcombine.high %v108_v2, %v112_v3  ;;  %v119_v9 = vld [vmem:[%s8510_s1 + $0x260] sm:$0xff]  ;;  %v116_v10 = vld [vmem:[%s8510_s1 + $0x248] sm:$0xff]  ;;  %v5220_v13 = vcombine.low %v108_v2, %v112_v3 }
  0x15   :  { %v120_v11 = vld [vmem:[%s8510_s1 + $0x268] sm:$0xff]  ;;  %v5227_v14 = vcombine.high %v115_v8, %v119_v9  ;;  %v123_v16 = vld [vmem:[%s8510_s1 + $0x280] sm:$0xff]  ;;  %v5226_v20 = vcombine.low %v115_v8, %v119_v9 }
  0x16   :  { %1630 = vmatpush1.bf16.msra.mxu0 %v5186_v42  ;;  %1712 = vmatpush1.bf16.msra.mxu1 %v5188_v43  ;;  %v5229_v15 = vcombine.high %v116_v10, %v120_v11  ;;  %v127_v17 = vld [vmem:[%s8510_s1 + $0x2a0] sm:$0xff]  ;;  %v124_v18 = vld [vmem:[%s8510_s1 + $0x288] sm:$0xff]  ;;  %v5228_v21 = vcombine.low %v116_v10, %v120_v11 }
  0x17   :  { %1631 = vmatprep.subr.bf16.mxu0 %v5195_v44  ;;  %1713 = vmatprep.subr.bf16.mxu1 %v5197_v45  ;;  %v128_v19 = vld [vmem:[%s8510_s1 + $0x2a8] sm:$0xff]  ;;  %v5235_v22 = vcombine.high %v123_v16, %v127_v17  ;;  %v131_v24 = vld [vmem:[%s8510_s1 + $0x2c0] sm:$0xff]  ;;  %v5234_v28 = vcombine.low %v123_v16, %v127_v17 }
  0x18   :  { %v5237_v23 = vcombine.high %v124_v18, %v128_v19  ;;  %v135_v25 = vld [vmem:[%s8510_s1 + $0x2e0] sm:$0xff]  ;;  %v132_v26 = vld [vmem:[%s8510_s1 + $0x2c8] sm:$0xff]  ;;  %v5236_v29 = vcombine.low %v124_v18, %v128_v19 }
  0x19   :  { %v136_v27 = vld [vmem:[%s8510_s1 + $0x2e8] sm:$0xff]  ;;  %v5243_v30 = vcombine.high %v131_v24, %v135_v25  ;;  %v139_v32 = vld [vmem:[%s8510_s1 + $0x300] sm:$0xff]  ;;  %v5242_v36 = vcombine.low %v131_v24, %v135_v25 }
  0x1a   :  { %1632 = vmatpush1.bf16.msra.mxu0 %v5194_v50  ;;  %1714 = vmatpush1.bf16.msra.mxu1 %v5196_v51  ;;  %v5245_v31 = vcombine.high %v132_v26, %v136_v27  ;;  %v143_v33 = vld [vmem:[%s8510_s1 + $0x320] sm:$0xff]  ;;  %v140_v34 = vld [vmem:[%s8510_s1 + $0x308] sm:$0xff]  ;;  %v5244_v37 = vcombine.low %v132_v26, %v136_v27 }
  0x1b   :  { %1633 = vmatprep.subr.bf16.mxu0 %v5203_v52  ;;  %1715 = vmatprep.subr.bf16.mxu1 %v5205_v54  ;;  %v144_v35 = vld [vmem:[%s8510_s1 + $0x328] sm:$0xff]  ;;  %v5251_v38 = vcombine.high %v139_v32, %v143_v33  ;;  %v147_v40 = vld [vmem:[%s8510_s1 + $0x340] sm:$0xff]  ;;  %v5250_v44 = vcombine.low %v139_v32, %v143_v33 }
  0x1c   :  { %v5253_v39 = vcombine.high %v140_v34, %v144_v35  ;;  %v151_v41 = vld [vmem:[%s8510_s1 + $0x360] sm:$0xff]  ;;  %v148_v42 = vld [vmem:[%s8510_s1 + $0x348] sm:$0xff]  ;;  %v5252_v45 = vcombine.low %v140_v34, %v144_v35 }
  0x1d   :  { %v152_v43 = vld [vmem:[%s8510_s1 + $0x368] sm:$0xff]  ;;  %v5259_v46 = vcombine.high %v147_v40, %v151_v41  ;;  %v155_v48 = vld [vmem:[%s8510_s1 + $0x380] sm:$0xff]  ;;  %v5258_v52 = vcombine.low %v147_v40, %v151_v41 }
  0x1e   :  { %1634 = vmatpush1.bf16.msra.mxu0 %v5202_v60  ;;  %1716 = vmatpush1.bf16.msra.mxu1 %v5204_v61  ;;  %v5261_v47 = vcombine.high %v148_v42, %v152_v43  ;;  %v159_v49 = vld [vmem:[%s8510_s1 + $0x3a0] sm:$0xff]  ;;  %v156_v50 = vld [vmem:[%s8510_s1 + $0x388] sm:$0xff]  ;;  %v5260_v53 = vcombine.low %v148_v42, %v152_v43 }
  0x1f   :  { %1635 = vmatprep.subr.bf16.mxu0 %v5211_v62  ;;  %1717 = vmatprep.subr.bf16.mxu1 %v5213_v63  ;;  %v160_v51 = vld [vmem:[%s8510_s1 + $0x3a8] sm:$0xff]  ;;  %v5267_v54 = vcombine.high %v155_v48, %v159_v49  ;;  %v163_v56 = vld [vmem:[%s8510_s1 + $0x3c0] sm:$0xff]  ;;  %v5266_v61 = vcombine.low %v155_v48, %v159_v49 }
  0x20   :  { %v5269_v55 = vcombine.high %v156_v50, %v160_v51  ;;  %v167_v58 = vld [vmem:[%s8510_s1 + $0x3e0] sm:$0xff]  ;;  %v164_v59 = vld [vmem:[%s8510_s1 + $0x3c8] sm:$0xff]  ;;  %v5268_v62 = vcombine.low %v156_v50, %v160_v51 }
  0x21   :  { %v168_v60 = vld [vmem:[%s8510_s1 + $0x3e8] sm:$0xff]  ;;  %v5275_v63 = vcombine.high %v163_v56, %v167_v58  ;;  %v171_v1 = vld [vmem:[%s8510_s1 + $0x400] sm:$0xff] }
  0x22   :  { %1636 = vmatpush1.bf16.msra.mxu0 %v5210_v4  ;;  %1718 = vmatpush1.bf16.msra.mxu1 %v5212_v5  ;;  %v5277_v0 = vcombine.high %v164_v59, %v168_v60  ;;  %v175_v2 = vld [vmem:[%s8510_s1 + $0x420] sm:$0xff]  ;;  %v172_v3 = vld [vmem:[%s8510_s1 + $0x408] sm:$0xff]  ;;  %v5274_v5 = vcombine.low %v163_v56, %v167_v58 }
  0x23   :  { %1637 = vmatprep.subr.bf16.mxu0 %v5219_v6  ;;  %1719 = vmatprep.subr.bf16.mxu1 %v5221_v7  ;;  %v176_v4 = vld [vmem:[%s8510_s1 + $0x428] sm:$0xff]  ;;  %v35_v6 = vld [vmem:[%s8511_s0] sm:$0xff]  ;;  %v5276_v7 = vcombine.low %v164_v59, %v168_v60  ;;  %v5283_v8 = vcombine.high %v171_v1, %v175_v2  ;;  %v5282_v16 = vcombine.low %v171_v1, %v175_v2 }
  0x24   :  { %v5285_v9 = vcombine.high %v172_v3, %v176_v4  ;;  %v179_v10 = vld [vmem:[%s8510_s1 + $0x440] sm:$0xff]  ;;  %v5284_v17 = vcombine.low %v172_v3, %v176_v4  ;;  %v192_v24 = vld [vmem:[%s8510_s1 + $0x4a8] sm:$0xff] }
  0x25   :  { %v183_v11 = vld [vmem:[%s8510_s1 + $0x460] sm:$0xff]  ;;  %v200_v32 = vld [vmem:[%s8510_s1 + $0x4e8] sm:$0xff] }
  0x26   :  { %1638 = vmatpush1.bf16.msra.mxu0 %v5218_v12  ;;  %1720 = vmatpush1.bf16.msra.mxu1 %v5220_v13  ;;  %v6660_v12 = vpack.c.bf16 %v35_v6, %v35_v6  ;;  %v180_v13 = vld [vmem:[%s8510_s1 + $0x448] sm:$0xff]  ;;  %v5291_v18 = vcombine.high %v179_v10, %v183_v11  ;;  %v5290_v25 = vcombine.low %v179_v10, %v183_v11  ;;  %v235_v6 = vld [vmem:[%s8510_s1 + $0x600] sm:$0xff] }
  0x27   :  { %1639 = vmatprep.subr.bf16.mxu0 %v5227_v14  ;;  %1721 = vmatprep.subr.bf16.mxu1 %v5229_v15  ;;  %v184_v14 = vld [vmem:[%s8510_s1 + $0x468] sm:$0xff]  ;;  %v38_v15 = vld [vmem:[%s8511_s0 + $0x18] sm:$0xff] }
  0x28   :  { %v5293_v19 = vcombine.high %v180_v13, %v184_v14  ;;  %v5292_v26 = vcombine.low %v180_v13, %v184_v14  ;;  %v208_v40 = vld [vmem:[%s8510_s1 + $0x528] sm:$0xff] }
  0x29   :  { %v216_v48 = vld [vmem:[%s8510_s1 + $0x568] sm:$0xff] }
  0x2a   :  { %1640 = vmatpush1.bf16.msra.mxu0 %v5226_v20  ;;  %1722 = vmatpush1.bf16.msra.mxu1 %v5228_v21  ;;  %v187_v20 = vld [vmem:[%s8510_s1 + $0x480] sm:$0xff]  ;;  %v224_v56 = vld [vmem:[%s8510_s1 + $0x5a8] sm:$0xff] }
  0x2b   :  { %1641 = vmatprep.subr.bf16.mxu0 %v5235_v22  ;;  %1723 = vmatprep.subr.bf16.mxu1 %v5237_v23  ;;  %v191_v21 = vld [vmem:[%s8510_s1 + $0x4a0] sm:$0xff]  ;;  %v6677_v22 = vpack.c.bf16 %v38_v15, %v38_v15  ;;  %v188_v23 = vld [vmem:[%s8510_s1 + $0x488] sm:$0xff] }
  0x2c   :  { %v5299_v27 = vcombine.high %v187_v20, %v191_v21  ;;  %v5298_v33 = vcombine.low %v187_v20, %v191_v21  ;;  %v5300_v34 = vcombine.low %v188_v23, %v192_v24  ;;  %v232_v1 = vld [vmem:[%s8510_s1 + $0x5e8] sm:$0xff]  ;;  %v243_v15 = vld [vmem:[%s8510_s1 + $0x640] sm:$0xff] }
  0x2e   :  { %1642 = vmatpush1.bf16.msra.mxu0 %v5234_v28  ;;  %1724 = vmatpush1.bf16.msra.mxu1 %v5236_v29  ;;  %v5301_v28 = vcombine.high %v188_v23, %v192_v24  ;;  %v195_v29 = vld [vmem:[%s8510_s1 + $0x4c0] sm:$0xff] }
  0x2f   :  { %1643 = vmatprep.subr.bf16.mxu0 %v5243_v30  ;;  %1725 = vmatprep.subr.bf16.mxu1 %v5245_v31  ;;  %v199_v30 = vld [vmem:[%s8510_s1 + $0x4e0] sm:$0xff]  ;;  %v196_v31 = vld [vmem:[%s8510_s1 + $0x4c8] sm:$0xff] }
  0x30   :  { %v5307_v35 = vcombine.high %v195_v29, %v199_v30  ;;  %v5306_v41 = vcombine.low %v195_v29, %v199_v30  ;;  %v5308_v42 = vcombine.low %v196_v31, %v200_v32  ;;  %v251_v24 = vld [vmem:[%s8510_s1 + $0x680] sm:$0xff] }
  0x32   :  { %1644 = vmatpush1.bf16.msra.mxu0 %v5242_v36  ;;  %1726 = vmatpush1.bf16.msra.mxu1 %v5244_v37  ;;  %v5309_v36 = vcombine.high %v196_v31, %v200_v32  ;;  %v203_v37 = vld [vmem:[%s8510_s1 + $0x500] sm:$0xff] }
  0x33   :  { %1645 = vmatprep.subr.bf16.mxu0 %v5251_v38  ;;  %1727 = vmatprep.subr.bf16.mxu1 %v5253_v39  ;;  %v207_v38 = vld [vmem:[%s8510_s1 + $0x520] sm:$0xff]  ;;  %v204_v39 = vld [vmem:[%s8510_s1 + $0x508] sm:$0xff] }
  0x34   :  { %v5315_v43 = vcombine.high %v203_v37, %v207_v38  ;;  %v5314_v49 = vcombine.low %v203_v37, %v207_v38  ;;  %v5316_v50 = vcombine.low %v204_v39, %v208_v40  ;;  %v259_v32 = vld [vmem:[%s8510_s1 + $0x6c0] sm:$0xff] }
  0x36   :  { %1646 = vmatpush1.bf16.msra.mxu0 %v5250_v44  ;;  %1728 = vmatpush1.bf16.msra.mxu1 %v5252_v45  ;;  %v5317_v44 = vcombine.high %v204_v39, %v208_v40  ;;  %v211_v45 = vld [vmem:[%s8510_s1 + $0x540] sm:$0xff] }
  0x37   :  { %1647 = vmatprep.subr.bf16.mxu0 %v5259_v46  ;;  %1729 = vmatprep.subr.bf16.mxu1 %v5261_v47  ;;  %v215_v46 = vld [vmem:[%s8510_s1 + $0x560] sm:$0xff]  ;;  %v212_v47 = vld [vmem:[%s8510_s1 + $0x548] sm:$0xff] }
  0x38   :  { %v5323_v51 = vcombine.high %v211_v45, %v215_v46  ;;  %v5322_v58 = vcombine.low %v211_v45, %v215_v46  ;;  %v5324_v59 = vcombine.low %v212_v47, %v216_v48  ;;  %v267_v40 = vld [vmem:[%s8510_s1 + $0x700] sm:$0xff] }
  0x3a   :  { %1648 = vmatpush1.bf16.msra.mxu0 %v5258_v52  ;;  %1730 = vmatpush1.bf16.msra.mxu1 %v5260_v53  ;;  %v5325_v52 = vcombine.high %v212_v47, %v216_v48  ;;  %v219_v53 = vld [vmem:[%s8510_s1 + $0x580] sm:$0xff] }
  0x3b   :  { %1649 = vmatprep.subr.bf16.mxu0 %v5267_v54  ;;  %1731 = vmatprep.subr.bf16.mxu1 %v5269_v55  ;;  %v223_v54 = vld [vmem:[%s8510_s1 + $0x5a0] sm:$0xff]  ;;  %v220_v55 = vld [vmem:[%s8510_s1 + $0x588] sm:$0xff] }
  0x3c   :  { %v5331_v60 = vcombine.high %v219_v53, %v223_v54  ;;  %v5330_v2 = vcombine.low %v219_v53, %v223_v54  ;;  %v5332_v3 = vcombine.low %v220_v55, %v224_v56  ;;  %v275_v48 = vld [vmem:[%s8510_s1 + $0x740] sm:$0xff] }
  0x3e   :  { %1650 = vmatpush1.bf16.msra.mxu0 %v5266_v61  ;;  %1732 = vmatpush1.bf16.msra.mxu1 %v5268_v62  ;;  %v5333_v61 = vcombine.high %v220_v55, %v224_v56  ;;  %v227_v62 = vld [vmem:[%s8510_s1 + $0x5c0] sm:$0xff] }
  0x3f   :  { %1651 = vmatprep.subr.bf16.mxu0 %v5275_v63  ;;  %1733 = vmatprep.subr.bf16.mxu1 %v5277_v0  ;;  %v231_v63 = vld [vmem:[%s8510_s1 + $0x5e0] sm:$0xff]  ;;  %v228_v0 = vld [vmem:[%s8510_s1 + $0x5c8] sm:$0xff] }
  0x40   :  { %v5339_v4 = vcombine.high %v227_v62, %v231_v63  ;;  %v5338_v10 = vcombine.low %v227_v62, %v231_v63  ;;  %v5340_v11 = vcombine.low %v228_v0, %v232_v1  ;;  %v283_v56 = vld [vmem:[%s8510_s1 + $0x780] sm:$0xff] }
  0x42   :  { %1652 = vmatpush1.bf16.msra.mxu0 %v5274_v5  ;;  %1734 = vmatpush1.bf16.msra.mxu1 %v5276_v7  ;;  %v5341_v5 = vcombine.high %v228_v0, %v232_v1  ;;  %v239_v7 = vld [vmem:[%s8510_s1 + $0x620] sm:$0xff] }
  0x43   :  { %1662 = vmatprep.subr.bf16.mxu0 %v5283_v8  ;;  %1744 = vmatprep.subr.bf16.mxu1 %v5285_v9  ;;  %v236_v8 = vld [vmem:[%s8510_s1 + $0x608] sm:$0xff]  ;;  %v5347_v13 = vcombine.high %v235_v6, %v239_v7  ;;  %v291_v1 = vld [vmem:[%s8510_s1 + $0x7c0] sm:$0xff] }
  0x44   :  { %v240_v9 = vld [vmem:[%s8510_s1 + $0x628] sm:$0xff] }
  0x45   :  { %1654 = vmatmul.mubr.bf16.vlgmr.msra.gmra.mrb[0].mxu0 %v6660_v12  ;;  %1736 = vmatmul.mubr.bf16.vlgmr.msra.gmra.mrb[0].mxu1 %v6660_v12  ;;  %v5349_v14 = vcombine.high %v236_v8, %v240_v9  ;;  %v5348_v20 = vcombine.low %v236_v8, %v240_v9  ;;  %v45_v9 = vld [vmem:[%s8510_s1 + $0x10] sm:$0xff] }
  0x46   :  { %1663 = vmatpush1.bf16.msra.mxu0 %v5282_v16  ;;  %1745 = vmatpush1.bf16.msra.mxu1 %v5284_v17  ;;  %v247_v16 = vld [vmem:[%s8510_s1 + $0x660] sm:$0xff]  ;;  %v244_v17 = vld [vmem:[%s8510_s1 + $0x648] sm:$0xff] }
  0x47   :  { %1664 = vmatprep.subr.bf16.mxu0 %v5291_v18  ;;  %1746 = vmatprep.subr.bf16.mxu1 %v5293_v19  ;;  %v248_v18 = vld [vmem:[%s8510_s1 + $0x668] sm:$0xff]  ;;  %v5346_v19 = vcombine.low %v235_v6, %v239_v7  ;;  %v5355_v21 = vcombine.high %v243_v15, %v247_v16 }
  0x48   :  { %1694 = vmatprep.mubr.bf16.mxu0 %v6677_v22  ;;  %1776 = vmatprep.mubr.bf16.mxu1 %v6677_v22  ;;  %v5357_v23 = vcombine.high %v244_v17, %v248_v18  ;;  %v5356_v29 = vcombine.low %v244_v17, %v248_v18 }
  0x4a   :  { %1665 = vmatpush1.bf16.msra.mxu0 %v5290_v25  ;;  %1747 = vmatpush1.bf16.msra.mxu1 %v5292_v26  ;;  %v255_v25 = vld [vmem:[%s8510_s1 + $0x6a0] sm:$0xff]  ;;  %v252_v26 = vld [vmem:[%s8510_s1 + $0x688] sm:$0xff] }
  0x4b   :  { %1666 = vmatprep.subr.bf16.mxu0 %v5299_v27  ;;  %1748 = vmatprep.subr.bf16.mxu1 %v5301_v28  ;;  %v256_v27 = vld [vmem:[%s8510_s1 + $0x6a8] sm:$0xff]  ;;  %v5354_v28 = vcombine.low %v243_v15, %v247_v16  ;;  %v5363_v30 = vcombine.high %v251_v24, %v255_v25  ;;  %v37_v15 = vld [vmem:[%s8511_s0 + $0x10] sm:$0xff] }
  0x4c   :  { %v5365_v31 = vcombine.high %v252_v26, %v256_v27  ;;  %v5364_v37 = vcombine.low %v252_v26, %v256_v27 }
  0x4e   :  { %1667 = vmatpush1.bf16.msra.mxu0 %v5298_v33  ;;  %1749 = vmatpush1.bf16.msra.mxu1 %v5300_v34  ;;  %v263_v33 = vld [vmem:[%s8510_s1 + $0x6e0] sm:$0xff]  ;;  %v260_v34 = vld [vmem:[%s8510_s1 + $0x6c8] sm:$0xff] }
  0x4f   :  { %1668 = vmatprep.subr.bf16.mxu0 %v5307_v35  ;;  %1750 = vmatprep.subr.bf16.mxu1 %v5309_v36  ;;  %v264_v35 = vld [vmem:[%s8510_s1 + $0x6e8] sm:$0xff]  ;;  %v5362_v36 = vcombine.low %v251_v24, %v255_v25  ;;  %v5371_v38 = vcombine.high %v259_v32, %v263_v33  ;;  %v58_v24 = vld [vmem:[%s8510_s1 + $0x78] sm:$0xff] }
  0x50   :  { %v5373_v39 = vcombine.high %v260_v34, %v264_v35  ;;  %v5372_v45 = vcombine.low %v260_v34, %v264_v35  ;;  %v69_v34 = vld [vmem:[%s8510_s1 + $0xd0] sm:$0xff] }
  0x52   :  { %1669 = vmatpush1.bf16.msra.mxu0 %v5306_v41  ;;  %1751 = vmatpush1.bf16.msra.mxu1 %v5308_v42  ;;  %v271_v41 = vld [vmem:[%s8510_s1 + $0x720] sm:$0xff]  ;;  %v268_v42 = vld [vmem:[%s8510_s1 + $0x708] sm:$0xff] }
  0x53   :  { %1670 = vmatprep.subr.bf16.mxu0 %v5315_v43  ;;  %1752 = vmatprep.subr.bf16.mxu1 %v5317_v44  ;;  %v272_v43 = vld [vmem:[%s8510_s1 + $0x728] sm:$0xff]  ;;  %v5370_v44 = vcombine.low %v259_v32, %v263_v33  ;;  %v5379_v46 = vcombine.high %v267_v40, %v271_v41  ;;  %v66_v32 = vld [vmem:[%s8510_s1 + $0xb8] sm:$0xff] }
  0x54   :  { %v5381_v47 = vcombine.high %v268_v42, %v272_v43  ;;  %v5380_v53 = vcombine.low %v268_v42, %v272_v43  ;;  %v77_v42 = vld [vmem:[%s8510_s1 + $0x110] sm:$0xff] }
  0x56   :  { %1671 = vmatpush1.bf16.msra.mxu0 %v5314_v49  ;;  %1753 = vmatpush1.bf16.msra.mxu1 %v5316_v50  ;;  %v279_v49 = vld [vmem:[%s8510_s1 + $0x760] sm:$0xff]  ;;  %v276_v50 = vld [vmem:[%s8510_s1 + $0x748] sm:$0xff] }
  0x57   :  { %1672 = vmatprep.subr.bf16.mxu0 %v5323_v51  ;;  %1754 = vmatprep.subr.bf16.mxu1 %v5325_v52  ;;  %v280_v51 = vld [vmem:[%s8510_s1 + $0x768] sm:$0xff]  ;;  %v5378_v52 = vcombine.low %v267_v40, %v271_v41  ;;  %v5387_v54 = vcombine.high %v275_v48, %v279_v49  ;;  %v74_v40 = vld [vmem:[%s8510_s1 + $0xf8] sm:$0xff] }
  0x58   :  { %v5389_v55 = vcombine.high %v276_v50, %v280_v51  ;;  %v5388_v62 = vcombine.low %v276_v50, %v280_v51 }
  0x5a   :  { %1673 = vmatpush1.bf16.msra.mxu0 %v5322_v58  ;;  %1755 = vmatpush1.bf16.msra.mxu1 %v5324_v59  ;;  %v287_v58 = vld [vmem:[%s8510_s1 + $0x7a0] sm:$0xff]  ;;  %v284_v59 = vld [vmem:[%s8510_s1 + $0x788] sm:$0xff] }
  0x5b   :  { %1674 = vmatprep.subr.bf16.mxu0 %v5331_v60  ;;  %1756 = vmatprep.subr.bf16.mxu1 %v5333_v61  ;;  %v288_v60 = vld [vmem:[%s8510_s1 + $0x7a8] sm:$0xff]  ;;  %v5386_v61 = vcombine.low %v275_v48, %v279_v49  ;;  %v5395_v63 = vcombine.high %v283_v56, %v287_v58  ;;  %v85_v49 = vld [vmem:[%s8510_s1 + $0x150] sm:$0xff] }
  0x5c   :  { %v5397_v0 = vcombine.high %v284_v59, %v288_v60  ;;  %v5396_v6 = vcombine.low %v284_v59, %v288_v60 }
  0x5e   :  { %1675 = vmatpush1.bf16.msra.mxu0 %v5330_v2  ;;  %1757 = vmatpush1.bf16.msra.mxu1 %v5332_v3  ;;  %v295_v2 = vld [vmem:[%s8510_s1 + $0x7e0] sm:$0xff]  ;;  %v292_v3 = vld [vmem:[%s8510_s1 + $0x7c8] sm:$0xff] }
  0x5f   :  { %1676 = vmatprep.subr.bf16.mxu0 %v5339_v4  ;;  %1758 = vmatprep.subr.bf16.mxu1 %v5341_v5  ;;  %v296_v4 = vld [vmem:[%s8510_s1 + $0x7e8] sm:$0xff]  ;;  %v5394_v5 = vcombine.low %v283_v56, %v287_v58  ;;  %v5403_v7 = vcombine.high %v291_v1, %v295_v2  ;;  %v93_v58 = vld [vmem:[%s8510_s1 + $0x190] sm:$0xff] }
  0x60   :  { %v5405_v8 = vcombine.high %v292_v3, %v296_v4  ;;  %v5404_v16 = vcombine.low %v292_v3, %v296_v4 }
  0x62   :  { %1677 = vmatpush1.bf16.msra.mxu0 %v5338_v10  ;;  %1759 = vmatpush1.bf16.msra.mxu1 %v5340_v11  ;;  %v49_v10 = vld [vmem:[%s8510_s1 + $0x30] sm:$0xff]  ;;  %v46_v11 = vld [vmem:[%s8510_s1 + $0x18] sm:$0xff] }
  0x63   :  { %1678 = vmatprep.subr.bf16.mxu0 %v5347_v13  ;;  %1760 = vmatprep.subr.bf16.mxu1 %v5349_v14  ;;  %v50_v13 = vld [vmem:[%s8510_s1 + $0x38] sm:$0xff]  ;;  %v5402_v14 = vcombine.low %v291_v1, %v295_v2  ;;  %v5159_v17 = vcombine.high %v45_v9, %v49_v10  ;;  %v5158_v25 = vcombine.low %v45_v9, %v49_v10  ;;  %v101_v2 = vld [vmem:[%s8510_s1 + $0x1d0] sm:$0xff] }
  0x64   :  { %v5161_v18 = vcombine.high %v46_v11, %v50_v13  ;;  %v5160_v26 = vcombine.low %v46_v11, %v50_v13  ;;  %v109_v10 = vld [vmem:[%s8510_s1 + $0x210] sm:$0xff] }
  0x66   :  { %1679 = vmatpush1.bf16.msra.mxu0 %v5346_v19  ;;  %1761 = vmatpush1.bf16.msra.mxu1 %v5348_v20  ;;  %v53_v19 = vld [vmem:[%s8510_s1 + $0x50] sm:$0xff] }
  0x67   :  { %1680 = vmatprep.subr.bf16.mxu0 %v5355_v21  ;;  %1762 = vmatprep.subr.bf16.mxu1 %v5357_v23  ;;  %v57_v20 = vld [vmem:[%s8510_s1 + $0x70] sm:$0xff]  ;;  %v6866_v21 = vpack.c.bf16 %v37_v15, %v37_v15  ;;  %v54_v23 = vld [vmem:[%s8510_s1 + $0x58] sm:$0xff] }
  0x68   :  { %v5167_v27 = vcombine.high %v53_v19, %v57_v20  ;;  %v5166_v33 = vcombine.low %v53_v19, %v57_v20  ;;  %v5168_v35 = vcombine.low %v54_v23, %v58_v24  ;;  %v117_v19 = vld [vmem:[%s8510_s1 + $0x250] sm:$0xff] }
  0x69   :  { %v121_v20 = vld [vmem:[%s8510_s1 + $0x270] sm:$0xff] }
  0x6a   :  { %1681 = vmatpush1.bf16.msra.mxu0 %v5354_v28  ;;  %1763 = vmatpush1.bf16.msra.mxu1 %v5356_v29  ;;  %v5169_v28 = vcombine.high %v54_v23, %v58_v24  ;;  %v61_v29 = vld [vmem:[%s8510_s1 + $0x90] sm:$0xff] }
  0x6b   :  { %1682 = vmatprep.subr.bf16.mxu0 %v5363_v30  ;;  %1764 = vmatprep.subr.bf16.mxu1 %v5365_v31  ;;  %v65_v30 = vld [vmem:[%s8510_s1 + $0xb0] sm:$0xff]  ;;  %v62_v31 = vld [vmem:[%s8510_s1 + $0x98] sm:$0xff] }
  0x6c   :  { %v5174_v41 = vcombine.low %v61_v29, %v65_v30  ;;  %v5176_v43 = vcombine.low %v62_v31, %v66_v32 }
  0x6e   :  { %1683 = vmatpush1.bf16.msra.mxu0 %v5362_v36  ;;  %1765 = vmatpush1.bf16.msra.mxu1 %v5364_v37  ;;  %v5175_v36 = vcombine.high %v61_v29, %v65_v30  ;;  %v73_v37 = vld [vmem:[%s8510_s1 + $0xf0] sm:$0xff] }
  0x6f   :  { %1684 = vmatprep.subr.bf16.mxu0 %v5371_v38  ;;  %1766 = vmatprep.subr.bf16.mxu1 %v5373_v39  ;;  %v5177_v38 = vcombine.high %v62_v31, %v66_v32  ;;  %v70_v39 = vld [vmem:[%s8510_s1 + $0xd8] sm:$0xff]  ;;  %v5182_v48 = vcombine.low %v69_v34, %v73_v37  ;;  %v125_v29 = vld [vmem:[%s8510_s1 + $0x290] sm:$0xff]  ;;  %v5231_v32 = vcombine.high %v117_v19, %v121_v20 }
  0x70   :  { %v5184_v50 = vcombine.low %v70_v39, %v74_v40  ;;  %v129_v30 = vld [vmem:[%s8510_s1 + $0x2b0] sm:$0xff] }
  0x72   :  { %1685 = vmatpush1.bf16.msra.mxu0 %v5370_v44  ;;  %1767 = vmatpush1.bf16.msra.mxu1 %v5372_v45  ;;  %v5183_v44 = vcombine.high %v69_v34, %v73_v37  ;;  %v81_v45 = vld [vmem:[%s8510_s1 + $0x130] sm:$0xff]  ;;  %v130_v34 = vld [vmem:[%s8510_s1 + $0x2b8] sm:$0xff] }
  0x73   :  { %1686 = vmatprep.subr.bf16.mxu0 %v5379_v46  ;;  %1768 = vmatprep.subr.bf16.mxu1 %v5381_v47  ;;  %v5185_v46 = vcombine.high %v70_v39, %v74_v40  ;;  %v82_v47 = vld [vmem:[%s8510_s1 + $0x138] sm:$0xff]  ;;  %v5191_v51 = vcombine.high %v77_v42, %v81_v45  ;;  %v5190_v56 = vcombine.low %v77_v42, %v81_v45  ;;  %v133_v37 = vld [vmem:[%s8510_s1 + $0x2d0] sm:$0xff] }
  0x74   :  { %v5239_v40 = vcombine.high %v125_v29, %v129_v30  ;;  %v138_v42 = vld [vmem:[%s8510_s1 + $0x2f8] sm:$0xff]  ;;  %v141_v45 = vld [vmem:[%s8510_s1 + $0x310] sm:$0xff] }
  0x76   :  { %1687 = vmatpush1.bf16.msra.mxu0 %v5378_v52  ;;  %1769 = vmatpush1.bf16.msra.mxu1 %v5380_v53  ;;  %v89_v52 = vld [vmem:[%s8510_s1 + $0x170] sm:$0xff] }
  0x77   :  { %1688 = vmatprep.subr.bf16.mxu0 %v5387_v54  ;;  %1770 = vmatprep.subr.bf16.mxu1 %v5389_v55  ;;  %v86_v54 = vld [vmem:[%s8510_s1 + $0x158] sm:$0xff]  ;;  %v5199_v60 = vcombine.high %v85_v49, %v89_v52  ;;  %v5198_v1 = vcombine.low %v85_v49, %v89_v52  ;;  %v149_v52 = vld [vmem:[%s8510_s1 + $0x350] sm:$0xff] }
  0x78   :  { %v90_v55 = vld [vmem:[%s8510_s1 + $0x178] sm:$0xff] }
  0x79   :  { %v5200_v3 = vcombine.low %v86_v54, %v90_v55  ;;  %v146_v49 = vld [vmem:[%s8510_s1 + $0x338] sm:$0xff] }
  0x7a   :  { %1689 = vmatpush1.bf16.msra.mxu0 %v5386_v61  ;;  %1771 = vmatpush1.bf16.msra.mxu1 %v5388_v62  ;;  %v97_v61 = vld [vmem:[%s8510_s1 + $0x1b0] sm:$0xff]  ;;  %v5201_v62 = vcombine.high %v86_v54, %v90_v55 }
  0x7b   :  { %1690 = vmatprep.subr.bf16.mxu0 %v5395_v63  ;;  %1772 = vmatprep.subr.bf16.mxu1 %v5397_v0  ;;  %v94_v63 = vld [vmem:[%s8510_s1 + $0x198] sm:$0xff]  ;;  %v5207_v4 = vcombine.high %v93_v58, %v97_v61  ;;  %v5206_v9 = vcombine.low %v93_v58, %v97_v61  ;;  %v157_v61 = vld [vmem:[%s8510_s1 + $0x390] sm:$0xff] }
  0x7c   :  { %v98_v0 = vld [vmem:[%s8510_s1 + $0x1b8] sm:$0xff] }
  0x7d   :  { %v5208_v11 = vcombine.low %v94_v63, %v98_v0  ;;  %v154_v58 = vld [vmem:[%s8510_s1 + $0x378] sm:$0xff] }
  0x7e   :  { %1691 = vmatpush1.bf16.msra.mxu0 %v5394_v5  ;;  %1773 = vmatpush1.bf16.msra.mxu1 %v5396_v6  ;;  %v105_v5 = vld [vmem:[%s8510_s1 + $0x1f0] sm:$0xff]  ;;  %v5209_v6 = vcombine.high %v94_v63, %v98_v0 }
  0x7f   :  { %1692 = vmatprep.subr.bf16.mxu0 %v5403_v7  ;;  %1774 = vmatprep.subr.bf16.mxu1 %v5405_v8  ;;  %v102_v7 = vld [vmem:[%s8510_s1 + $0x1d8] sm:$0xff]  ;;  %v5215_v13 = vcombine.high %v101_v2, %v105_v5 }
  0x80   :  { %v106_v8 = vld [vmem:[%s8510_s1 + $0x1f8] sm:$0xff] }
  0x81   :  { %v5217_v15 = vcombine.high %v102_v7, %v106_v8  ;;  %v5216_v23 = vcombine.low %v102_v7, %v106_v8 }
  0x82   :  { %1693 = vmatpush1.bf16.msra.mxu0 %v5402_v14  ;;  %1775 = vmatpush1.bf16.msra.mxu1 %v5404_v16  ;;  %v113_v14 = vld [vmem:[%s8510_s1 + $0x230] sm:$0xff]  ;;  %v110_v16 = vld [vmem:[%s8510_s1 + $0x218] sm:$0xff] }
  0x83   :  { %1785 = vmatprep.subr.bf16.mxu0 %v5159_v17  ;;  %1867 = vmatprep.subr.bf16.mxu1 %v5161_v18  ;;  %v114_v17 = vld [vmem:[%s8510_s1 + $0x238] sm:$0xff]  ;;  %v5214_v18 = vcombine.low %v101_v2, %v105_v5  ;;  %v5223_v24 = vcombine.high %v109_v10, %v113_v14  ;;  %v165_v5 = vld [vmem:[%s8510_s1 + $0x3d0] sm:$0xff] }
  0x84   :  { %v5224_v31 = vcombine.low %v110_v16, %v114_v17  ;;  %v162_v2 = vld [vmem:[%s8510_s1 + $0x3b8] sm:$0xff] }
  0x85   :  { %1695 = vmatmul.mubr.bf16.vlgmr.msra.gmra.mrb[0].mxu0 %v6866_v21  ;;  %1777 = vmatmul.mubr.bf16.vlgmr.msra.gmra.mrb[0].mxu1 %v6866_v21 }
  0x86   :  { %1786 = vmatpush1.bf16.msra.mxu0 %v5158_v25  ;;  %1868 = vmatpush1.bf16.msra.mxu1 %v5160_v26  ;;  %v118_v25 = vld [vmem:[%s8510_s1 + $0x258] sm:$0xff] }
  0x87   :  { %1787 = vmatprep.subr.bf16.mxu0 %v5167_v27  ;;  %1869 = vmatprep.subr.bf16.mxu1 %v5169_v28  ;;  %v122_v26 = vld [vmem:[%s8510_s1 + $0x278] sm:$0xff]  ;;  %v5225_v27 = vcombine.high %v110_v16, %v114_v17  ;;  %v5222_v28 = vcombine.low %v109_v10, %v113_v14  ;;  %v173_v17 = vld [vmem:[%s8510_s1 + $0x410] sm:$0xff] }
  0x88   :  { %1817 = vmatprep.mubr.bf16.mxu0 %v6533_v57  ;;  %1899 = vmatprep.mubr.bf16.mxu1 %v6533_v57  ;;  %v78_v57 = vld [vmem:[%s8510_s1 + $0x118] sm:$0xff]  ;;  %v5232_v39 = vcombine.low %v118_v25, %v122_v26 }
  0x89   :  { %v5193_v53 = vcombine.high %v78_v57, %v82_v47  ;;  %v5192_v59 = vcombine.low %v78_v57, %v82_v47  ;;  %v170_v10 = vld [vmem:[%s8510_s1 + $0x3f8] sm:$0xff] }
  0x8a   :  { %1788 = vmatpush1.bf16.msra.mxu0 %v5166_v33  ;;  %1870 = vmatpush1.bf16.msra.mxu1 %v5168_v35  ;;  %v126_v33 = vld [vmem:[%s8510_s1 + $0x298] sm:$0xff]  ;;  %v5233_v35 = vcombine.high %v118_v25, %v122_v26 }
  0x8b   :  { %1789 = vmatprep.subr.bf16.mxu0 %v5175_v36  ;;  %1871 = vmatprep.subr.bf16.mxu1 %v5177_v38  ;;  %v5230_v36 = vcombine.low %v117_v19, %v121_v20  ;;  %v137_v38 = vld [vmem:[%s8510_s1 + $0x2f0] sm:$0xff]  ;;  %v5240_v57 = vcombine.low %v126_v33, %v130_v34  ;;  %v174_v19 = vld [vmem:[%s8510_s1 + $0x418] sm:$0xff] }
  0x8c   :  { %v5247_v47 = vcombine.high %v133_v37, %v137_v38  ;;  %v178_v20 = vld [vmem:[%s8510_s1 + $0x438] sm:$0xff] }
  0x8d   :  { %v5289_v26 = vcombine.high %v174_v19, %v178_v20 }
  0x8e   :  { %1790 = vmatpush1.bf16.msra.mxu0 %v5174_v41  ;;  %1872 = vmatpush1.bf16.msra.mxu1 %v5176_v43  ;;  %v134_v41 = vld [vmem:[%s8510_s1 + $0x2d8] sm:$0xff]  ;;  %v5241_v43 = vcombine.high %v126_v33, %v130_v34 }
  0x8f   :  { %1791 = vmatprep.subr.bf16.mxu0 %v5183_v44  ;;  %1873 = vmatprep.subr.bf16.mxu1 %v5185_v46  ;;  %v5238_v44 = vcombine.low %v125_v29, %v129_v30  ;;  %v145_v46 = vld [vmem:[%s8510_s1 + $0x330] sm:$0xff]  ;;  %v5248_v54 = vcombine.low %v134_v41, %v138_v42  ;;  %v182_v29 = vld [vmem:[%s8510_s1 + $0x458] sm:$0xff] }
  0x90   :  { %v5255_v55 = vcombine.high %v141_v45, %v145_v46  ;;  %v186_v30 = vld [vmem:[%s8510_s1 + $0x478] sm:$0xff] }
  0x91   :  { %v5297_v34 = vcombine.high %v182_v29, %v186_v30 }
  0x92   :  { %1792 = vmatpush1.bf16.msra.mxu0 %v5182_v48  ;;  %1874 = vmatpush1.bf16.msra.mxu1 %v5184_v50  ;;  %v142_v48 = vld [vmem:[%s8510_s1 + $0x318] sm:$0xff]  ;;  %v5249_v50 = vcombine.high %v134_v41, %v138_v42 }
  0x93   :  { %1793 = vmatprep.subr.bf16.mxu0 %v5191_v51  ;;  %1875 = vmatprep.subr.bf16.mxu1 %v5193_v53  ;;  %v5246_v51 = vcombine.low %v133_v37, %v137_v38  ;;  %v153_v53 = vld [vmem:[%s8510_s1 + $0x370] sm:$0xff]  ;;  %v5256_v63 = vcombine.low %v142_v48, %v146_v49  ;;  %v190_v37 = vld [vmem:[%s8510_s1 + $0x498] sm:$0xff] }
  0x94   :  { %v5263_v0 = vcombine.high %v149_v52, %v153_v53  ;;  %v194_v38 = vld [vmem:[%s8510_s1 + $0x4b8] sm:$0xff] }
  0x95   :  { %v5305_v42 = vcombine.high %v190_v37, %v194_v38 }
  0x96   :  { %1794 = vmatpush1.bf16.msra.mxu0 %v5190_v56  ;;  %1876 = vmatpush1.bf16.msra.mxu1 %v5192_v59  ;;  %v150_v56 = vld [vmem:[%s8510_s1 + $0x358] sm:$0xff]  ;;  %v5257_v59 = vcombine.high %v142_v48, %v146_v49  ;;  %v205_v49 = vld [vmem:[%s8510_s1 + $0x510] sm:$0xff] }
  0x97   :  { %1795 = vmatprep.subr.bf16.mxu0 %v5199_v60  ;;  %1877 = vmatprep.subr.bf16.mxu1 %v5201_v62  ;;  %v5254_v60 = vcombine.low %v141_v45, %v145_v46  ;;  %v161_v62 = vld [vmem:[%s8510_s1 + $0x3b0] sm:$0xff]  ;;  %v5264_v7 = vcombine.low %v150_v56, %v154_v58  ;;  %v202_v45 = vld [vmem:[%s8510_s1 + $0x4f8] sm:$0xff] }
  0x98   :  { %v5271_v8 = vcombine.high %v157_v61, %v161_v62 }
  0x9a   :  { %1796 = vmatpush1.bf16.msra.mxu0 %v5198_v1  ;;  %1878 = vmatpush1.bf16.msra.mxu1 %v5200_v3  ;;  %v158_v1 = vld [vmem:[%s8510_s1 + $0x398] sm:$0xff]  ;;  %v5265_v3 = vcombine.high %v150_v56, %v154_v58  ;;  %v213_v56 = vld [vmem:[%s8510_s1 + $0x550] sm:$0xff] }
  0x9b   :  { %1797 = vmatprep.subr.bf16.mxu0 %v5207_v4  ;;  %1879 = vmatprep.subr.bf16.mxu1 %v5209_v6  ;;  %v5262_v4 = vcombine.low %v149_v52, %v153_v53  ;;  %v169_v6 = vld [vmem:[%s8510_s1 + $0x3f0] sm:$0xff]  ;;  %v5272_v14 = vcombine.low %v158_v1, %v162_v2 }
  0x9c   :  { %v217_v58 = vld [vmem:[%s8510_s1 + $0x570] sm:$0xff] }
  0x9e   :  { %1798 = vmatpush1.bf16.msra.mxu0 %v5206_v9  ;;  %1880 = vmatpush1.bf16.msra.mxu1 %v5208_v11  ;;  %v166_v9 = vld [vmem:[%s8510_s1 + $0x3d8] sm:$0xff]  ;;  %v5273_v11 = vcombine.high %v158_v1, %v162_v2  ;;  %v221_v1 = vld [vmem:[%s8510_s1 + $0x590] sm:$0xff] }
  0x9f   :  { %1799 = vmatprep.subr.bf16.mxu0 %v5215_v13  ;;  %1881 = vmatprep.subr.bf16.mxu1 %v5217_v15  ;;  %v5270_v13 = vcombine.low %v157_v61, %v161_v62  ;;  %v5279_v15 = vcombine.high %v165_v5, %v169_v6  ;;  %v5281_v16 = vcombine.high %v166_v9, %v170_v10  ;;  %v225_v2 = vld [vmem:[%s8510_s1 + $0x5b0] sm:$0xff] }
  0xa2   :  { %1800 = vmatpush1.bf16.msra.mxu0 %v5214_v18  ;;  %1882 = vmatpush1.bf16.msra.mxu1 %v5216_v23  ;;  %v177_v18 = vld [vmem:[%s8510_s1 + $0x430] sm:$0xff]  ;;  %v5278_v23 = vcombine.low %v165_v5, %v169_v6  ;;  %v5326_v5 = vcombine.low %v213_v56, %v217_v58 }
  0xa3   :  { %1801 = vmatprep.subr.bf16.mxu0 %v5223_v24  ;;  %1883 = vmatprep.subr.bf16.mxu1 %v5225_v27  ;;  %v5280_v24 = vcombine.low %v166_v9, %v170_v10  ;;  %v5287_v25 = vcombine.high %v173_v17, %v177_v18  ;;  %v181_v27 = vld [vmem:[%s8510_s1 + $0x450] sm:$0xff] }
  0xa4   :  { %v229_v9 = vld [vmem:[%s8510_s1 + $0x5d0] sm:$0xff] }
  0xa5   :  { %v233_v10 = vld [vmem:[%s8510_s1 + $0x5f0] sm:$0xff] }
  0xa6   :  { %1802 = vmatpush1.bf16.msra.mxu0 %v5222_v28  ;;  %1884 = vmatpush1.bf16.msra.mxu1 %v5224_v31  ;;  %v185_v28 = vld [vmem:[%s8510_s1 + $0x470] sm:$0xff]  ;;  %v5286_v31 = vcombine.low %v173_v17, %v177_v18 }
  0xa7   :  { %1803 = vmatprep.subr.bf16.mxu0 %v5231_v32  ;;  %1885 = vmatprep.subr.bf16.mxu1 %v5233_v35  ;;  %v5288_v32 = vcombine.low %v174_v19, %v178_v20  ;;  %v5295_v33 = vcombine.high %v181_v27, %v185_v28  ;;  %v189_v35 = vld [vmem:[%s8510_s1 + $0x490] sm:$0xff]  ;;  %v238_v20 = vld [vmem:[%s8510_s1 + $0x618] sm:$0xff] }
  0xa8   :  { %v237_v18 = vld [vmem:[%s8510_s1 + $0x610] sm:$0xff] }
  0xa9   :  { %v241_v19 = vld [vmem:[%s8510_s1 + $0x630] sm:$0xff] }
  0xaa   :  { %1804 = vmatpush1.bf16.msra.mxu0 %v5230_v36  ;;  %1886 = vmatpush1.bf16.msra.mxu1 %v5232_v39  ;;  %v193_v36 = vld [vmem:[%s8510_s1 + $0x4b0] sm:$0xff]  ;;  %v5294_v39 = vcombine.low %v181_v27, %v185_v28 }
  0xab   :  { %1805 = vmatprep.subr.bf16.mxu0 %v5239_v40  ;;  %1887 = vmatprep.subr.bf16.mxu1 %v5241_v43  ;;  %v5296_v40 = vcombine.low %v182_v29, %v186_v30  ;;  %v5303_v41 = vcombine.high %v189_v35, %v193_v36  ;;  %v197_v43 = vld [vmem:[%s8510_s1 + $0x4d0] sm:$0xff]  ;;  %v5302_v46 = vcombine.low %v189_v35, %v193_v36  ;;  %v246_v30 = vld [vmem:[%s8510_s1 + $0x658] sm:$0xff] }
  0xac   :  { %v245_v28 = vld [vmem:[%s8510_s1 + $0x650] sm:$0xff] }
  0xad   :  { %v249_v29 = vld [vmem:[%s8510_s1 + $0x670] sm:$0xff] }
  0xae   :  { %1806 = vmatpush1.bf16.msra.mxu0 %v5238_v44  ;;  %1888 = vmatpush1.bf16.msra.mxu1 %v5240_v57  ;;  %v201_v44 = vld [vmem:[%s8510_s1 + $0x4f0] sm:$0xff]  ;;  %v5304_v57 = vcombine.low %v190_v37, %v194_v38  ;;  %v254_v38 = vld [vmem:[%s8510_s1 + $0x698] sm:$0xff] }
  0xaf   :  { %1807 = vmatprep.subr.bf16.mxu0 %v5247_v47  ;;  %1889 = vmatprep.subr.bf16.mxu1 %v5249_v50  ;;  %v5311_v47 = vcombine.high %v197_v43, %v201_v44  ;;  %v209_v50 = vld [vmem:[%s8510_s1 + $0x530] sm:$0xff]  ;;  %v5310_v52 = vcombine.low %v197_v43, %v201_v44 }
  0xb0   :  { %v5318_v61 = vcombine.low %v205_v49, %v209_v50  ;;  %v253_v36 = vld [vmem:[%s8510_s1 + $0x690] sm:$0xff] }
  0xb1   :  { %v257_v37 = vld [vmem:[%s8510_s1 + $0x6b0] sm:$0xff] }
  0xb2   :  { %1808 = vmatpush1.bf16.msra.mxu0 %v5246_v51  ;;  %1890 = vmatpush1.bf16.msra.mxu1 %v5248_v54  ;;  %v210_v51 = vld [vmem:[%s8510_s1 + $0x538] sm:$0xff]  ;;  %v5319_v54 = vcombine.high %v205_v49, %v209_v50  ;;  %v261_v44 = vld [vmem:[%s8510_s1 + $0x6d0] sm:$0xff] }
  0xb3   :  { %1809 = vmatprep.subr.bf16.mxu0 %v5255_v55  ;;  %1891 = vmatprep.subr.bf16.mxu1 %v5257_v59  ;;  %v214_v59 = vld [vmem:[%s8510_s1 + $0x558] sm:$0xff]  ;;  %v269_v50 = vld [vmem:[%s8510_s1 + $0x710] sm:$0xff] }
  0xb6   :  { %1810 = vmatpush1.bf16.msra.mxu0 %v5254_v60  ;;  %1892 = vmatpush1.bf16.msra.mxu1 %v5256_v63  ;;  %v218_v60 = vld [vmem:[%s8510_s1 + $0x578] sm:$0xff]  ;;  %v5327_v63 = vcombine.high %v213_v56, %v217_v58  ;;  %v277_v58 = vld [vmem:[%s8510_s1 + $0x750] sm:$0xff] }
  0xb7   :  { %1811 = vmatprep.subr.bf16.mxu0 %v5263_v0  ;;  %1893 = vmatprep.subr.bf16.mxu1 %v5265_v3  ;;  %v5329_v0 = vcombine.high %v214_v59, %v218_v60  ;;  %v222_v3 = vld [vmem:[%s8510_s1 + $0x598] sm:$0xff]  ;;  %v5328_v6 = vcombine.low %v214_v59, %v218_v60  ;;  %v281_v59 = vld [vmem:[%s8510_s1 + $0x770] sm:$0xff] }
  0xb8   :  { %v278_v60 = vld [vmem:[%s8510_s1 + $0x758] sm:$0xff] }
  0xba   :  { %1812 = vmatpush1.bf16.msra.mxu0 %v5262_v4  ;;  %1894 = vmatpush1.bf16.msra.mxu1 %v5264_v7  ;;  %v226_v4 = vld [vmem:[%s8510_s1 + $0x5b8] sm:$0xff]  ;;  %v5335_v7 = vcombine.high %v221_v1, %v225_v2 }
  0xbb   :  { %1813 = vmatprep.subr.bf16.mxu0 %v5271_v8  ;;  %1895 = vmatprep.subr.bf16.mxu1 %v5273_v11  ;;  %v5337_v8 = vcombine.high %v222_v3, %v226_v4  ;;  %v230_v11 = vld [vmem:[%s8510_s1 + $0x5d8] sm:$0xff] }
  0xbe   :  { %1814 = vmatpush1.bf16.msra.mxu0 %v5270_v13  ;;  %1896 = vmatpush1.bf16.msra.mxu1 %v5272_v14  ;;  %v234_v13 = vld [vmem:[%s8510_s1 + $0x5f8] sm:$0xff]  ;;  %v5334_v14 = vcombine.low %v221_v1, %v225_v2  ;;  %v285_v2 = vld [vmem:[%s8510_s1 + $0x790] sm:$0xff] }
  0xbf   :  { %1815 = vmatprep.subr.bf16.mxu0 %v5279_v15  ;;  %1897 = vmatprep.subr.bf16.mxu1 %v5281_v16  ;;  %v5336_v15 = vcombine.low %v222_v3, %v226_v4  ;;  %v5343_v16 = vcombine.high %v229_v9, %v233_v10  ;;  %v5345_v17 = vcombine.high %v230_v11, %v234_v13  ;;  %v289_v3 = vld [vmem:[%s8510_s1 + $0x7b0] sm:$0xff]  ;;  %v286_v4 = vld [vmem:[%s8510_s1 + $0x798] sm:$0xff] }
  0xc2   :  { %1816 = vmatpush1.bf16.msra.mxu0 %v5278_v23  ;;  %1898 = vmatpush1.bf16.msra.mxu1 %v5280_v24  ;;  %v242_v23 = vld [vmem:[%s8510_s1 + $0x638] sm:$0xff]  ;;  %v5342_v24 = vcombine.low %v229_v9, %v233_v10  ;;  %v293_v10 = vld [vmem:[%s8510_s1 + $0x7d0] sm:$0xff] }
  0xc3   :  { %1826 = vmatprep.subr.bf16.mxu0 %v5287_v25  ;;  %1908 = vmatprep.subr.bf16.mxu1 %v5289_v26  ;;  %v5344_v25 = vcombine.low %v230_v11, %v234_v13  ;;  %v5351_v26 = vcombine.high %v237_v18, %v241_v19  ;;  %v5353_v27 = vcombine.high %v238_v20, %v242_v23  ;;  %v297_v11 = vld [vmem:[%s8510_s1 + $0x7f0] sm:$0xff]  ;;  %v294_v13 = vld [vmem:[%s8510_s1 + $0x7d8] sm:$0xff] }
  0xc5   :  { %1818 = vmatmul.mubr.bf16.vlgmr.msra.gmra.mrb[4].mxu0 %v6660_v12  ;;  %1900 = vmatmul.mubr.bf16.vlgmr.msra.gmra.mrb[4].mxu1 %v6660_v12  ;;  %v198_v12 = vld [vmem:[%s8510_s1 + $0x4d8] sm:$0xff] }
  0xc6   :  { %1827 = vmatpush1.bf16.msra.mxu0 %v5286_v31  ;;  %1909 = vmatpush1.bf16.msra.mxu1 %v5288_v32  ;;  %v5313_v48 = vcombine.high %v198_v12, %v202_v45  ;;  %v5312_v53 = vcombine.low %v198_v12, %v202_v45  ;;  %v250_v31 = vld [vmem:[%s8510_s1 + $0x678] sm:$0xff]  ;;  %v5350_v32 = vcombine.low %v237_v18, %v241_v19  ;;  %v265_v12 = vld [vmem:[%s8510_s1 + $0x6f0] sm:$0xff] }
  0xc7   :  { %1828 = vmatprep.subr.bf16.mxu0 %v5295_v33  ;;  %1910 = vmatprep.subr.bf16.mxu1 %v5297_v34  ;;  %v5352_v33 = vcombine.low %v238_v20, %v242_v23  ;;  %v5359_v34 = vcombine.high %v245_v28, %v249_v29  ;;  %v5361_v35 = vcombine.high %v246_v30, %v250_v31  ;;  %v262_v45 = vld [vmem:[%s8510_s1 + $0x6d8] sm:$0xff]  ;;  %v5936_v23 = vld [vmem:[%s8512_s3 + $0x40] sm:$0xff]  }
  0xc8   :  { %1858 = vmatprep.mubr.bf16.mxu0 %v6677_v22  ;;  %1940 = vmatprep.mubr.bf16.mxu1 %v6677_v22  ;;  %v206_v22 = vld [vmem:[%s8510_s1 + $0x518] sm:$0xff]  ;;  %v5406_v19 = vcombine.low %v293_v10, %v297_v11 }
  0xc9   :  { %v5321_v55 = vcombine.high %v206_v22, %v210_v51  ;;  %v5320_v62 = vcombine.low %v206_v22, %v210_v51  ;;  %v273_v22 = vld [vmem:[%s8510_s1 + $0x730] sm:$0xff]  ;;  %v270_v51 = vld [vmem:[%s8510_s1 + $0x718] sm:$0xff] }
  0xca   :  { %1829 = vmatpush1.bf16.msra.mxu0 %v5294_v39  ;;  %1911 = vmatpush1.bf16.msra.mxu1 %v5296_v40  ;;  %v258_v39 = vld [vmem:[%s8510_s1 + $0x6b8] sm:$0xff]  ;;  %v5358_v40 = vcombine.low %v245_v28, %v249_v29  ;;  %v5941_v28 = vld [vmem:[%s8512_s3 + $0xc8] sm:$0xff]  }
  0xcb   :  { %1830 = vmatprep.subr.bf16.mxu0 %v5303_v41  ;;  %1912 = vmatprep.subr.bf16.mxu1 %v5305_v42  ;;  %v5360_v41 = vcombine.low %v246_v30, %v250_v31  ;;  %v5367_v42 = vcombine.high %v253_v36, %v257_v37  ;;  %v5369_v43 = vcombine.high %v254_v38, %v258_v39  ;;  %v5942_v29 = vld [vmem:[%s8512_s3 + $0x8] sm:$0xff]   ;;  %v5944_v31 = vld [vmem:[%s8512_s3 + $0x50] sm:$0xff]  }
  0xcc   :  { %v5943_v30 = vld [vmem:[%s8512_s3 + $0x88] sm:$0xff]  }
  0xce   :  { %1831 = vmatpush1.bf16.msra.mxu0 %v5302_v46  ;;  %1913 = vmatpush1.bf16.msra.mxu1 %v5304_v57  ;;  %v266_v46 = vld [vmem:[%s8510_s1 + $0x6f8] sm:$0xff]  ;;  %v5366_v57 = vcombine.low %v253_v36, %v257_v37 }
  0xcf   :  { %1832 = vmatprep.subr.bf16.mxu0 %v5311_v47  ;;  %1914 = vmatprep.subr.bf16.mxu1 %v5313_v48  ;;  %v5368_v47 = vcombine.low %v254_v38, %v258_v39  ;;  %v5375_v48 = vcombine.high %v261_v44, %v265_v12  ;;  %v5377_v49 = vcombine.high %v262_v45, %v266_v46  ;;  %v5950_v36 = vld [vmem:[%s8512_s3 + $0x18] sm:$0xff]   ;;  %v5952_v38 = vld [vmem:[%s8512_s3 + $0x60] sm:$0xff]  }
  0xd0   :  { %v5951_v37 = vld [vmem:[%s8512_s3 + $0x98] sm:$0xff]   ;;  %v5953_v39 = vld [vmem:[%s8512_s3 + $0xe0] sm:$0xff]  }
  0xd2   :  { %1833 = vmatpush1.bf16.msra.mxu0 %v5310_v52  ;;  %1915 = vmatpush1.bf16.msra.mxu1 %v5312_v53  ;;  %v274_v52 = vld [vmem:[%s8510_s1 + $0x738] sm:$0xff]  ;;  %v5374_v53 = vcombine.low %v261_v44, %v265_v12  ;;  %v5958_v44 = vld [vmem:[%s8512_s3 + $0x28] sm:$0xff]  }
  0xd3   :  { %1834 = vmatprep.subr.bf16.mxu0 %v5319_v54  ;;  %1916 = vmatprep.subr.bf16.mxu1 %v5321_v55  ;;  %v5376_v54 = vcombine.low %v262_v45, %v266_v46  ;;  %v5383_v55 = vcombine.high %v269_v50, %v273_v22  ;;  %v5385_v56 = vcombine.high %v270_v51, %v274_v52  ;;  %v5959_v12 = vld [vmem:[%s8512_s3 + $0xa8] sm:$0xff]   ;;  %v5960_v45 = vld [vmem:[%s8512_s3 + $0x70] sm:$0xff]  }
  0xd4   :  { %v5961_v46 = vld [vmem:[%s8512_s3 + $0xf0] sm:$0xff]  }
  0xd6   :  { %1835 = vmatpush1.bf16.msra.mxu0 %v5318_v61  ;;  %1917 = vmatpush1.bf16.msra.mxu1 %v5320_v62  ;;  %v282_v61 = vld [vmem:[%s8510_s1 + $0x778] sm:$0xff]  ;;  %v5382_v62 = vcombine.low %v269_v50, %v273_v22 }
  0xd7   :  { %1836 = vmatprep.subr.bf16.mxu0 %v5327_v63  ;;  %1918 = vmatprep.subr.bf16.mxu1 %v5329_v0  ;;  %v5384_v63 = vcombine.low %v270_v51, %v274_v52  ;;  %v5391_v0 = vcombine.high %v277_v58, %v281_v59  ;;  %v5393_v1 = vcombine.high %v278_v60, %v282_v61  ;;  %v5966_v50 = vld [vmem:[%s8512_s3 + $0x38] sm:$0xff]   ;;  %v5968_v51 = vld [vmem:[%s8512_s3 + $0x140] sm:$0xff]  }
  0xd8   :  { %v5967_v22 = vld [vmem:[%s8512_s3 + $0xb8] sm:$0xff]   ;;  %v5969_v52 = vld [vmem:[%s8512_s3 + $0x1c0] sm:$0xff]  }
  0xda   :  { %1837 = vmatpush1.bf16.msra.mxu0 %v5326_v5  ;;  %1919 = vmatpush1.bf16.msra.mxu1 %v5328_v6  ;;  %v290_v5 = vld [vmem:[%s8510_s1 + $0x7b8] sm:$0xff]  ;;  %v5390_v6 = vcombine.low %v277_v58, %v281_v59 }
  0xdb   :  { %1838 = vmatprep.subr.bf16.mxu0 %v5335_v7  ;;  %1920 = vmatprep.subr.bf16.mxu1 %v5337_v8  ;;  %v5392_v7 = vcombine.low %v278_v60, %v282_v61  ;;  %v5399_v8 = vcombine.high %v285_v2, %v289_v3  ;;  %v5401_v9 = vcombine.high %v286_v4, %v290_v5 }
  0xde   :  { %1839 = vmatpush1.bf16.msra.mxu0 %v5334_v14  ;;  %1921 = vmatpush1.bf16.msra.mxu1 %v5336_v15  ;;  %v298_v14 = vld [vmem:[%s8510_s1 + $0x7f8] sm:$0xff]  ;;  %v5398_v15 = vcombine.low %v285_v2, %v289_v3 }
  0xdf   :  { %1840 = vmatprep.subr.bf16.mxu0 %v5343_v16  ;;  %1922 = vmatprep.subr.bf16.mxu1 %v5345_v17  ;;  %v5400_v16 = vcombine.low %v286_v4, %v290_v5  ;;  %v5407_v17 = vcombine.high %v293_v10, %v297_v11  ;;  %v5409_v18 = vcombine.high %v294_v13, %v298_v14 }
  0xe0   :  { %v5408_v20 = vcombine.low %v294_v13, %v298_v14 }
  0xe2   :  { %1841 = vmatpush1.bf16.msra.mxu0 %v5342_v24  ;;  %1923 = vmatpush1.bf16.msra.mxu1 %v5344_v25  ;;  %v5937_v24 = vld [vmem:[%s8512_s3 + $0xc0] sm:$0xff]  }
  0xe3   :  { %1842 = vmatprep.subr.bf16.mxu0 %v5351_v26  ;;  %1924 = vmatprep.subr.bf16.mxu1 %v5353_v27  ;;  %v5938_v25 = vld [vmem:[%s8512_s3] sm:$0xff]   ;;  %v5940_v27 = vld [vmem:[%s8512_s3 + $0x48] sm:$0xff]  }
  0xe4   :  { %v5939_v26 = vld [vmem:[%s8512_s3 + $0x80] sm:$0xff]  }
  0xe6   :  { %1843 = vmatpush1.bf16.msra.mxu0 %v5350_v32  ;;  %1925 = vmatpush1.bf16.msra.mxu1 %v5352_v33  ;;  %v5946_v32 = vld [vmem:[%s8512_s3 + $0x10] sm:$0xff]  }
  0xe7   :  { %1844 = vmatprep.subr.bf16.mxu0 %v5359_v34  ;;  %1926 = vmatprep.subr.bf16.mxu1 %v5361_v35  ;;  %v5947_v33 = vld [vmem:[%s8512_s3 + $0x90] sm:$0xff]   ;;  %v5948_v34 = vld [vmem:[%s8512_s3 + $0x58] sm:$0xff]  }
  0xe8   :  { %v5949_v35 = vld [vmem:[%s8512_s3 + $0xd8] sm:$0xff]  }
  0xea   :  { %1845 = vmatpush1.bf16.msra.mxu0 %v5358_v40  ;;  %1927 = vmatpush1.bf16.msra.mxu1 %v5360_v41  ;;  %v5954_v40 = vld [vmem:[%s8512_s3 + $0x20] sm:$0xff]  }
  0xeb   :  { %1846 = vmatprep.subr.bf16.mxu0 %v5367_v42  ;;  %1928 = vmatprep.subr.bf16.mxu1 %v5369_v43  ;;  %v5955_v41 = vld [vmem:[%s8512_s3 + $0xa0] sm:$0xff]   ;;  %v5956_v42 = vld [vmem:[%s8512_s3 + $0x68] sm:$0xff]  }
  0xec   :  { %v5957_v43 = vld [vmem:[%s8512_s3 + $0xe8] sm:$0xff]  }
  0xee   :  { %1847 = vmatpush1.bf16.msra.mxu0 %v5366_v57  ;;  %1929 = vmatpush1.bf16.msra.mxu1 %v5368_v47  ;;  %v5962_v57 = vld [vmem:[%s8512_s3 + $0x30] sm:$0xff]  }
  0xef   :  { %1848 = vmatprep.subr.bf16.mxu0 %v5375_v48  ;;  %1930 = vmatprep.subr.bf16.mxu1 %v5377_v49  ;;  %v5963_v47 = vld [vmem:[%s8512_s3 + $0xb0] sm:$0xff]   ;;  %v5964_v48 = vld [vmem:[%s8512_s3 + $0x78] sm:$0xff]  }
  0xf0   :  { %v5965_v49 = vld [vmem:[%s8512_s3 + $0xf8] sm:$0xff]  }
  0xf2   :  { %1849 = vmatpush1.bf16.msra.mxu0 %v5374_v53  ;;  %1931 = vmatpush1.bf16.msra.mxu1 %v5376_v54  ;;  %v301_v53 = vlaneseq }
  0xf3   :  { %1850 = vmatprep.subr.bf16.mxu0 %v5383_v55  ;;  %1932 = vmatprep.subr.bf16.mxu1 %v5385_v56  ;;  %v7354_v56 = vld [vmem:[%s8513_s2] sm:$0xff] }
  0xf4   :  { %v7346_v54 = vshrl.u32 %v301_v53, 7 }
  0xf6   :  { %1851 = vmatpush1.bf16.msra.mxu0 %v5382_v62  ;;  %1933 = vmatpush1.bf16.msra.mxu1 %v5384_v63  ;;  %v7349_v55 = vsub.s32 0, %v7346_v54  ;;  %v7357_v58 = vsub.s32 2, %v7346_v54  ;;  %v7360_v59 = vsub.s32 1, %v7346_v54  ;;  %v7363_v60 = vsub.s32 3, %v7346_v54 }
  0xf7   :  { %1852 = vmatprep.subr.bf16.mxu0 %v5391_v0  ;;  %1934 = vmatprep.subr.bf16.mxu1 %v5393_v1 }
  0xf8   :  { %v304_v61 = vrot.slane %v7354_v56, %v7349_v55  ;;  %v312_v62 = vrot.slane %v7354_v56, %v7357_v58  ;;  %v308_v63 = vrot.slane %v7354_v56, %v7360_v59  ;;  %v316_v0 = vrot.slane %v7354_v56, %v7363_v60 }
  0xfa   :  { %1853 = vmatpush1.bf16.msra.mxu0 %v5390_v6  ;;  %1935 = vmatpush1.bf16.msra.mxu1 %v5392_v7 }
  0xfb   :  { %1854 = vmatprep.subr.bf16.mxu0 %v5399_v8  ;;  %1936 = vmatprep.subr.bf16.mxu1 %v5401_v9 }
  0xfe   :  { %1855 = vmatpush1.bf16.msra.mxu0 %v5398_v15  ;;  %1937 = vmatpush1.bf16.msra.mxu1 %v5400_v16 }
  0xff   :  { %1856 = vmatprep.subr.bf16.mxu0 %v5407_v17  ;;  %1938 = vmatprep.subr.bf16.mxu1 %v5409_v18 }
 0x102   :  { %1857 = vmatpush1.bf16.msra.mxu0 %v5406_v19  ;;  %1939 = vmatpush1.bf16.msra.mxu1 %v5408_v20  ;;  %v5970_v19 = vld [vmem:[%s8512_s3 + $0x100] sm:$0xff]  }
 0x103   :  { %5795 = vmatprep.subr.bf16.mxu0 %v5936_v23  ;;  %5817 = vmatprep.subr.bf16.mxu1 %v5937_v24  ;;  %v5971_v24 = vld [vmem:[%s8512_s3 + $0x180] sm:$0xff]  }
 0x105   :  { %1859 = vmatmul.mubr.bf16.vlgmr.msra.gmra.mrb[4].mxu0 %v6866_v21  ;;  %1941 = vmatmul.mubr.bf16.vlgmr.msra.gmra.mrb[4].mxu1 %v6866_v21  ;;  %v5945_v21 = vld [vmem:[%s8512_s3 + $0xd0] sm:$0xff]  }
 0x106   :  { %5796 = vmatpush3.bf16.msra.mxu0 %v5938_v25  ;;  %5818 = vmatpush3.bf16.msra.mxu1 %v5939_v26  ;;  %v5972_v25 = vld [vmem:[%s8512_s3 + $0x148] sm:$0xff]  }
 0x107   :  { %5797 = vmatprep.subr.bf16.mxu0 %v5940_v27  ;;  %5819 = vmatprep.subr.bf16.mxu1 %v5941_v28  ;;  %v5973_v27 = vld [vmem:[%s8512_s3 + $0x1c8] sm:$0xff]  }
 0x108   :  { %v5974_v28 = vld [vmem:[%s8512_s3 + $0x108] sm:$0xff]  }
 0x10a   :  { %5798 = vmatpush3.bf16.msra.mxu0 %v5942_v29  ;;  %5820 = vmatpush3.bf16.msra.mxu1 %v5943_v30  ;;  %v5975_v29 = vld [vmem:[%s8512_s3 + $0x188] sm:$0xff]   ;;  %v5976_v30 = vld [vmem:[%s8512_s3 + $0x150] sm:$0xff]  }
 0x10b   :  { %5799 = vmatprep.subr.bf16.mxu0 %v5944_v31  ;;  %5821 = vmatprep.subr.bf16.mxu1 %v5945_v21  ;;  %v5977_v31 = vld [vmem:[%s8512_s3 + $0x1d0] sm:$0xff]  }
 0x10c   :  { %v5978_v21 = vld [vmem:[%s8512_s3 + $0x110] sm:$0xff]  }
 0x10e   :  { %5800 = vmatpush3.bf16.msra.mxu0 %v5946_v32  ;;  %5822 = vmatpush3.bf16.msra.mxu1 %v5947_v33  ;;  %v5979_v32 = vld [vmem:[%s8512_s3 + $0x190] sm:$0xff]   ;;  %v5980_v33 = vld [vmem:[%s8512_s3 + $0x158] sm:$0xff]  }
 0x10f   :  { %5801 = vmatprep.subr.bf16.mxu0 %v5948_v34  ;;  %5823 = vmatprep.subr.bf16.mxu1 %v5949_v35  ;;  %v5981_v34 = vld [vmem:[%s8512_s3 + $0x1d8] sm:$0xff]  }
 0x110   :  { %v5982_v35 = vld [vmem:[%s8512_s3 + $0x118] sm:$0xff]  }
 0x112   :  { %5802 = vmatpush3.bf16.msra.mxu0 %v5950_v36  ;;  %5824 = vmatpush3.bf16.msra.mxu1 %v5951_v37  ;;  %v5983_v36 = vld [vmem:[%s8512_s3 + $0x198] sm:$0xff]   ;;  %v5984_v37 = vld [vmem:[%s8512_s3 + $0x160] sm:$0xff]  }
 0x113   :  { %5803 = vmatprep.subr.bf16.mxu0 %v5952_v38  ;;  %5825 = vmatprep.subr.bf16.mxu1 %v5953_v39  ;;  %v5985_v38 = vld [vmem:[%s8512_s3 + $0x1e0] sm:$0xff]  }
 0x114   :  { %v5986_v39 = vld [vmem:[%s8512_s3 + $0x120] sm:$0xff]  }
 0x116   :  { %5804 = vmatpush3.bf16.msra.mxu0 %v5954_v40  ;;  %5826 = vmatpush3.bf16.msra.mxu1 %v5955_v41  ;;  %v5987_v40 = vld [vmem:[%s8512_s3 + $0x1a0] sm:$0xff]   ;;  %v5988_v41 = vld [vmem:[%s8512_s3 + $0x168] sm:$0xff]  }
 0x117   :  { %5805 = vmatprep.subr.bf16.mxu0 %v5956_v42  ;;  %5827 = vmatprep.subr.bf16.mxu1 %v5957_v43  ;;  %v5989_v42 = vld [vmem:[%s8512_s3 + $0x1e8] sm:$0xff]  }
 0x118   :  { %v5990_v43 = vld [vmem:[%s8512_s3 + $0x128] sm:$0xff]  }
 0x11a   :  { %5806 = vmatpush3.bf16.msra.mxu0 %v5958_v44  ;;  %5828 = vmatpush3.bf16.msra.mxu1 %v5959_v12  ;;  %v5991_v44 = vld [vmem:[%s8512_s3 + $0x1a8] sm:$0xff]   ;;  %v5992_v12 = vld [vmem:[%s8512_s3 + $0x170] sm:$0xff]  }
 0x11b   :  { %5807 = vmatprep.subr.bf16.mxu0 %v5960_v45  ;;  %5829 = vmatprep.subr.bf16.mxu1 %v5961_v46  ;;  %v5993_v45 = vld [vmem:[%s8512_s3 + $0x1f0] sm:$0xff]  }
 0x11c   :  { %v5994_v46 = vld [vmem:[%s8512_s3 + $0x130] sm:$0xff]  }
 0x11e   :  { %5808 = vmatpush3.bf16.msra.mxu0 %v5962_v57  ;;  %5830 = vmatpush3.bf16.msra.mxu1 %v5963_v47  ;;  %v5995_v57 = vld [vmem:[%s8512_s3 + $0x1b0] sm:$0xff]   ;;  %v5996_v47 = vld [vmem:[%s8512_s3 + $0x178] sm:$0xff]  }
 0x11f   :  { %5809 = vmatprep.subr.bf16.mxu0 %v5964_v48  ;;  %5831 = vmatprep.subr.bf16.mxu1 %v5965_v49  ;;  %v5997_v48 = vld [vmem:[%s8512_s3 + $0x1f8] sm:$0xff]  }
 0x120   :  { %v5998_v49 = vld [vmem:[%s8512_s3 + $0x138] sm:$0xff]  }
 0x122   :  { %5810 = vmatpush3.bf16.msra.mxu0 %v5966_v50  ;;  %5832 = vmatpush3.bf16.msra.mxu1 %v5967_v22  ;;  %v5999_v50 = vld [vmem:[%s8512_s3 + $0x1b8] sm:$0xff]   ;;  %v2646_v22 = vld [vmem:[%s8514_s5] sm:$0xff] }
 0x123   :  { %5839 = vmatprep.subr.bf16.mxu0 %v5968_v51  ;;  %5861 = vmatprep.subr.bf16.mxu1 %v5969_v52  ;;  %v2650_v51 = vld [vmem:[%s8514_s5 + $0x20] sm:$0xff]  ;;  %v2647_v52 = vld [vmem:[%s8514_s5 + $0x8] sm:$0xff] }
 0x124   :  { %v5476_v53 = vcombine.high %v2646_v22, %v2650_v51 }
 0x158   :  { %v1696_v1 = vpop.f32.mrb[0].mxu0  ;;  %v1778_v3 = vpop.f32.mrb[0].mxu1 }
 0x159   :  { %v5883_v2 = vadd.f32 %v1696_v1, %v304_v61  ;;  %v1698_v4 = vpop.f32.mrb[1].mxu0  ;;  %v5885_v5 = vadd.f32 %v1778_v3, %v312_v62  ;;  %v1780_v7 = vpop.f32.mrb[1].mxu1  ;;  %v2651_v61 = vld [vmem:[%s8514_s5 + $0x28] sm:$0xff]  ;;  %v323_v1 = vsub.s32 5, %v7346_v54 }
 0x15a   :  { %v5884_v6 = vadd.f32 %v1698_v4, %v308_v63  ;;  %v1700_v8 = vpop.f32.mrb[2].mxu0  ;;  %v5886_v10 = vadd.f32 %v1780_v7, %v316_v0  ;;  %v1782_v11 = vpop.f32.mrb[2].mxu1  ;;  %v5478_v62 = vcombine.high %v2647_v52, %v2651_v61  ;;  %v319_v63 = vsub.s32 4, %v7346_v54 }
 0x15b   :  { %v1949_v9 = vmax.f32 %v5883_v2, 0.0  ;;  %v1701_v13 = vpop.f32.mrb[3].mxu0  ;;  %v1951_v14 = vmax.f32 %v5885_v5, 0.0  ;;  %v1783_v16 = vpop.f32.mrb[3].mxu1  ;;  %v327_v0 = vsub.s32 6, %v7346_v54  ;;  %v331_v2 = vsub.s32 7, %v7346_v54 }
 0x15c   :  { %v1950_v15 = vmax.f32 %v5884_v6, 0.0  ;;  %v1952_v17 = vmax.f32 %v5886_v10, 0.0  ;;  %v320_v3 = vrot.slane %v7354_v56, %v319_v63  ;;  %v324_v5 = vrot.slane %v7354_v56, %v323_v1  ;;  %v6372_v54 = vld [vmem:[%s8516_s7 + $0x7c0] ss:$16 sps:$4 sm:$0xff]  }
 0x15d   :  { %v1957_v20 = vpack.c.bf16 %v1949_v9, %v1949_v9  ;;  %v1959_v26 = vpack.c.bf16 %v1951_v14, %v1951_v14  ;;  %v328_v4 = vrot.slane %v7354_v56, %v327_v0  ;;  %v332_v6 = vrot.slane %v7354_v56, %v331_v2  ;;  %v2658_v56 = vld [vmem:[%s8514_s5 + $0x60] sm:$0xff] }
 0x15e   :  { %v1958_v18 = vpack.c.bf16 %v1950_v15, %v1950_v15  ;;  %v1960_v23 = vpack.c.bf16 %v1952_v17, %v1952_v17 }
 0x160   :  { %2516 = vmatprep.mubr.bf16.mxu0 %v1958_v18  ;;  %2556 = vmatprep.mubr.bf16.mxu1 %v1960_v23 }
 0x161   :  { %2517 = vmatmul.mubr.bf16.vlgmr.msra.gmra.mrb[8].mxu0 %v1957_v20  ;;  %2557 = vmatmul.mubr.bf16.vlgmr.msra.gmra.mrb[8].mxu1 %v1959_v26 }
 0x162   :  { %5840 = vmatpush3.bf16.msra.mxu0 %v5970_v19  ;;  %5862 = vmatpush3.bf16.msra.mxu1 %v5971_v24 }
 0x163   :  { %5841 = vmatprep.subr.bf16.mxu0 %v5972_v25  ;;  %5863 = vmatprep.subr.bf16.mxu1 %v5973_v27  ;;  %v2654_v25 = vld [vmem:[%s8514_s5 + $0x40] sm:$0xff]  ;;  %v2655_v27 = vld [vmem:[%s8514_s5 + $0x48] sm:$0xff] }
 0x166   :  { %5842 = vmatpush3.bf16.msra.mxu0 %v5974_v28  ;;  %5864 = vmatpush3.bf16.msra.mxu1 %v5975_v29  ;;  %v2659_v28 = vld [vmem:[%s8514_s5 + $0x68] sm:$0xff] }
 0x167   :  { %5843 = vmatprep.subr.bf16.mxu0 %v5976_v30  ;;  %5865 = vmatprep.subr.bf16.mxu1 %v5977_v31  ;;  %v5475_v30 = vcombine.low %v2646_v22, %v2650_v51  ;;  %v2682_v22 = vld [vmem:[%s8514_s5 + $0x120] sm:$0xff]  ;;  %v2679_v51 = vld [vmem:[%s8514_s5 + $0x108] sm:$0xff] }
 0x16a   :  { %5844 = vmatpush3.bf16.msra.mxu0 %v5978_v21  ;;  %5866 = vmatpush3.bf16.msra.mxu1 %v5979_v32  ;;  %v5477_v32 = vcombine.low %v2647_v52, %v2651_v61  ;;  %v2683_v52 = vld [vmem:[%s8514_s5 + $0x128] sm:$0xff] }
 0x16b   :  { %5845 = vmatprep.subr.bf16.mxu0 %v5980_v33  ;;  %5867 = vmatprep.subr.bf16.mxu1 %v5981_v34  ;;  %v5484_v33 = vcombine.high %v2654_v25, %v2658_v56 }
 0x16e   :  { %5846 = vmatpush3.bf16.msra.mxu0 %v5982_v35  ;;  %5868 = vmatpush3.bf16.msra.mxu1 %v5983_v36  ;;  %v5486_v35 = vcombine.high %v2655_v27, %v2659_v28  ;;  %v2662_v36 = vld [vmem:[%s8514_s5 + $0x80] sm:$0xff] }
 0x16f   :  { %5847 = vmatprep.subr.bf16.mxu0 %v5984_v37  ;;  %5869 = vmatprep.subr.bf16.mxu1 %v5985_v38  ;;  %v2666_v37 = vld [vmem:[%s8514_s5 + $0xa0] sm:$0xff]  ;;  %v2663_v38 = vld [vmem:[%s8514_s5 + $0x88] sm:$0xff] }
 0x172   :  { %5848 = vmatpush3.bf16.msra.mxu0 %v5986_v39  ;;  %5870 = vmatpush3.bf16.msra.mxu1 %v5987_v40  ;;  %v2667_v39 = vld [vmem:[%s8514_s5 + $0xa8] sm:$0xff]  ;;  %v5483_v40 = vcombine.low %v2654_v25, %v2658_v56 }
 0x173   :  { %5849 = vmatprep.subr.bf16.mxu0 %v5988_v41  ;;  %5871 = vmatprep.subr.bf16.mxu1 %v5989_v42  ;;  %v5485_v41 = vcombine.low %v2655_v27, %v2659_v28  ;;  %v5492_v42 = vcombine.high %v2662_v36, %v2666_v37 }
 0x176   :  { %5850 = vmatpush3.bf16.msra.mxu0 %v5990_v43  ;;  %5872 = vmatpush3.bf16.msra.mxu1 %v5991_v44  ;;  %v5494_v43 = vcombine.high %v2663_v38, %v2667_v39  ;;  %v2670_v44 = vld [vmem:[%s8514_s5 + $0xc0] sm:$0xff] }
 0x177   :  { %5851 = vmatprep.subr.bf16.mxu0 %v5992_v12  ;;  %5873 = vmatprep.subr.bf16.mxu1 %v5993_v45  ;;  %v2674_v12 = vld [vmem:[%s8514_s5 + $0xe0] sm:$0xff]  ;;  %v2671_v45 = vld [vmem:[%s8514_s5 + $0xc8] sm:$0xff] }
 0x17a   :  { %5852 = vmatpush3.bf16.msra.mxu0 %v5994_v46  ;;  %5874 = vmatpush3.bf16.msra.mxu1 %v5995_v57  ;;  %v2675_v46 = vld [vmem:[%s8514_s5 + $0xe8] sm:$0xff]  ;;  %v5491_v57 = vcombine.low %v2662_v36, %v2666_v37 }
 0x17b   :  { %5853 = vmatprep.subr.bf16.mxu0 %v5996_v47  ;;  %5875 = vmatprep.subr.bf16.mxu1 %v5997_v48  ;;  %v5493_v47 = vcombine.low %v2663_v38, %v2667_v39  ;;  %v5500_v48 = vcombine.high %v2670_v44, %v2674_v12  ;;  %v5501_v61 = vcombine.low %v2671_v45, %v2675_v46  ;;  %v2707_v39 = vld [vmem:[%s8514_s5 + $0x1e8] sm:$0xff] }
 0x17e   :  { %5854 = vmatpush3.bf16.msra.mxu0 %v5998_v49  ;;  %5876 = vmatpush3.bf16.msra.mxu1 %v5999_v50  ;;  %v5502_v49 = vcombine.high %v2671_v45, %v2675_v46  ;;  %v2678_v50 = vld [vmem:[%s8514_s5 + $0x100] sm:$0xff]  ;;  %v2649_v45 = vld [vmem:[%s8514_s5 + $0x18] sm:$0xff] }
 0x17f   :  { %3072 = vmatprep.subr.bf16.mxu0 %v5476_v53  ;;  %3113 = vmatprep.subr.bf16.mxu1 %v5478_v62  ;;  %v5499_v53 = vcombine.low %v2670_v44, %v2674_v12  ;;  %v5508_v62 = vcombine.high %v2678_v50, %v2682_v22  ;;  %v2648_v44 = vld [vmem:[%s8514_s5 + $0x10] sm:$0xff] }
 0x180   :  { %v2652_v12 = vld [vmem:[%s8514_s5 + $0x30] sm:$0xff] }
 0x181   :  { %v5479_v46 = vcombine.low %v2648_v44, %v2652_v12 }
 0x1d8   :  { %v1860_v7 = vpop.f32.mrb[4].mxu0  ;;  %v1942_v9 = vpop.f32.mrb[4].mxu1 }
 0x1d9   :  { %v5887_v8 = vadd.f32 %v1860_v7, %v320_v3  ;;  %v1862_v10 = vpop.f32.mrb[5].mxu0  ;;  %v5889_v11 = vadd.f32 %v1942_v9, %v328_v4  ;;  %v1944_v14 = vpop.f32.mrb[5].mxu1  ;;  %v5510_v3 = vcombine.high %v2679_v51, %v2683_v52  ;;  %v2686_v4 = vld [vmem:[%s8514_s5 + $0x140] sm:$0xff]  ;;  %v2691_v7 = vld [vmem:[%s8514_s5 + $0x168] sm:$0xff]  ;;  %v5509_v9 = vcombine.low %v2679_v51, %v2683_v52 }
 0x1da   :  { %v5888_v13 = vadd.f32 %v1862_v10, %v324_v5  ;;  %v1864_v15 = vpop.f32.mrb[6].mxu0  ;;  %v5890_v17 = vadd.f32 %v1944_v14, %v332_v6  ;;  %v1946_v18 = vpop.f32.mrb[6].mxu1  ;;  %v2690_v5 = vld [vmem:[%s8514_s5 + $0x160] sm:$0xff]  ;;  %v2687_v6 = vld [vmem:[%s8514_s5 + $0x148] sm:$0xff] }
 0x1db   :  { %v1953_v16 = vmax.f32 %v5887_v8, 0.0  ;;  %v1865_v19 = vpop.f32.mrb[7].mxu0  ;;  %v1955_v20 = vmax.f32 %v5889_v11, 0.0  ;;  %v1947_v24 = vpop.f32.mrb[7].mxu1  ;;  %v5507_v8 = vcombine.low %v2678_v50, %v2682_v22  ;;  %v5516_v10 = vcombine.high %v2686_v4, %v2690_v5  ;;  %v2694_v15 = vld [vmem:[%s8514_s5 + $0x180] sm:$0xff] }
 0x1dc   :  { %v1954_v23 = vmax.f32 %v5888_v13, 0.0  ;;  %v1956_v26 = vmax.f32 %v5890_v17, 0.0  ;;  %v5518_v11 = vcombine.high %v2687_v6, %v2691_v7  ;;  %v5515_v13 = vcombine.low %v2686_v4, %v2690_v5  ;;  %v2695_v17 = vld [vmem:[%s8514_s5 + $0x188] sm:$0xff]  ;;  %v5410_v24 = vld [vmem:[%s8515_s4] ss:$0 sm:$0xff] }
 0x1dd   :  { %v1961_v31 = vpack.c.bf16 %v1953_v16, %v1953_v16  ;;  %v1963_v34 = vpack.c.bf16 %v1955_v20, %v1955_v20  ;;  %v5517_v14 = vcombine.low %v2687_v6, %v2691_v7  ;;  %v2698_v16 = vld [vmem:[%s8514_s5 + $0x1a0] sm:$0xff]  ;;  %v2699_v20 = vld [vmem:[%s8514_s5 + $0x1a8] sm:$0xff]  ;;  %v2656_v6 = vld [vmem:[%s8514_s5 + $0x50] sm:$0xff] }
 0x1de   :  { %v1962_v29 = vpack.c.bf16 %v1954_v23, %v1954_v23  ;;  %v1964_v21 = vpack.c.bf16 %v1956_v26, %v1956_v26  ;;  %v5524_v19 = vcombine.high %v2694_v15, %v2698_v16  ;;  %v5523_v56 = vcombine.low %v2694_v15, %v2698_v16  ;;  %v2660_v7 = vld [vmem:[%s8514_s5 + $0x70] sm:$0xff]  ;;  %v2665_v16 = vld [vmem:[%s8514_s5 + $0x98] sm:$0xff] }
 0x1df   :  { %v5525_v26 = vcombine.low %v2695_v17, %v2699_v20  ;;  %v5526_v27 = vcombine.high %v2695_v17, %v2699_v20  ;;  %v2668_v15 = vld [vmem:[%s8514_s5 + $0xb0] sm:$0xff]  ;;  %v2669_v17 = vld [vmem:[%s8514_s5 + $0xb8] sm:$0xff] }
 0x1e0   :  { %2596 = vmatprep.mubr.bf16.mxu0 %v1962_v29  ;;  %2636 = vmatprep.mubr.bf16.mxu1 %v1964_v21 }
 0x1e1   :  { %2597 = vmatmul.mubr.bf16.vlgmr.msra.gmra.mrb[12].mxu0 %v1961_v31  ;;  %2637 = vmatmul.mubr.bf16.vlgmr.msra.gmra.mrb[12].mxu1 %v1963_v34  ;;  %v2706_v34 = vld [vmem:[%s8514_s5 + $0x1e0] sm:$0xff] }
 0x1e2   :  { %3073 = vmatpush1.bf16.msra.mxu0 %v5475_v30  ;;  %3114 = vmatpush1.bf16.msra.mxu1 %v5477_v32 }
 0x1e3   :  { %3074 = vmatprep.subr.bf16.mxu0 %v5484_v33  ;;  %3115 = vmatprep.subr.bf16.mxu1 %v5486_v35  ;;  %v2702_v33 = vld [vmem:[%s8514_s5 + $0x1c0] sm:$0xff]  ;;  %v2703_v35 = vld [vmem:[%s8514_s5 + $0x1c8] sm:$0xff] }
 0x1e4   :  { %v5532_v38 = vcombine.high %v2702_v33, %v2706_v34 }
 0x1e6   :  { %3075 = vmatpush1.bf16.msra.mxu0 %v5483_v40  ;;  %3116 = vmatpush1.bf16.msra.mxu1 %v5485_v41  ;;  %v5531_v40 = vcombine.low %v2702_v33, %v2706_v34  ;;  %v5533_v41 = vcombine.low %v2703_v35, %v2707_v39  ;;  %v2681_v33 = vld [vmem:[%s8514_s5 + $0x118] sm:$0xff] }
 0x1e7   :  { %3076 = vmatprep.subr.bf16.mxu0 %v5492_v42  ;;  %3117 = vmatprep.subr.bf16.mxu1 %v5494_v43  ;;  %v5534_v42 = vcombine.high %v2703_v35, %v2707_v39  ;;  %v2685_v34 = vld [vmem:[%s8514_s5 + $0x138] sm:$0xff] }
 0x1ea   :  { %3077 = vmatpush1.bf16.msra.mxu0 %v5491_v57  ;;  %3118 = vmatpush1.bf16.msra.mxu1 %v5493_v47  ;;  %v5480_v57 = vcombine.high %v2648_v44, %v2652_v12  ;;  %v2653_v47 = vld [vmem:[%s8514_s5 + $0x38] sm:$0xff] }
 0x1eb   :  { %3078 = vmatprep.subr.bf16.mxu0 %v5500_v48  ;;  %3119 = vmatprep.subr.bf16.mxu1 %v5502_v49  ;;  %v6384_v48 = vmov 0   ;;  %v5481_v49 = vcombine.low %v2649_v45, %v2653_v47  ;;  %v5482_v50 = vcombine.high %v2649_v45, %v2653_v47  ;;  %v2693_v44 = vld [vmem:[%s8514_s5 + $0x178] sm:$0xff]  ;;  %v5513_v45 = vcombine.low %v2681_v33, %v2685_v34  ;;  %v2696_v47 = vld [vmem:[%s8514_s5 + $0x190] sm:$0xff] }
 0x1ec   :  { %3104 = vmatprep.mubr.bf16.mxu0 %v6384_v48  ;;  %3145 = vmatprep.mubr.bf16.mxu1 %v6384_v48 }
 0x1ee   :  { %3079 = vmatpush1.bf16.msra.mxu0 %v5499_v53  ;;  %3120 = vmatpush1.bf16.msra.mxu1 %v5501_v61 }
 0x1ef   :  { %3080 = vmatprep.subr.bf16.mxu0 %v5508_v62  ;;  %3121 = vmatprep.subr.bf16.mxu1 %v5510_v3 }
 0x1f2   :  { %3081 = vmatpush1.bf16.msra.mxu0 %v5507_v8  ;;  %3122 = vmatpush1.bf16.msra.mxu1 %v5509_v9  ;;  %v2657_v8 = vld [vmem:[%s8514_s5 + $0x58] sm:$0xff] }
 0x1f3   :  { %3082 = vmatprep.subr.bf16.mxu0 %v5516_v10  ;;  %3123 = vmatprep.subr.bf16.mxu1 %v5518_v11  ;;  %v2661_v9 = vld [vmem:[%s8514_s5 + $0x78] sm:$0xff] }
 0x1f4   :  { %v5490_v20 = vcombine.high %v2657_v8, %v2661_v9 }
 0x1f6   :  { %3083 = vmatpush1.bf16.msra.mxu0 %v5515_v13  ;;  %3124 = vmatpush1.bf16.msra.mxu1 %v5517_v14  ;;  %v2664_v14 = vld [vmem:[%s8514_s5 + $0x90] sm:$0xff] }
 0x1f7   :  { %3084 = vmatprep.subr.bf16.mxu0 %v5524_v19  ;;  %3125 = vmatprep.subr.bf16.mxu1 %v5526_v27  ;;  %v5488_v19 = vcombine.high %v2656_v6, %v2660_v7  ;;  %v2677_v27 = vld [vmem:[%s8514_s5 + $0xf8] sm:$0xff] }
 0x1fa   :  { %3085 = vmatpush1.bf16.msra.mxu0 %v5523_v56  ;;  %3126 = vmatpush1.bf16.msra.mxu1 %v5525_v26  ;;  %v2676_v56 = vld [vmem:[%s8514_s5 + $0xf0] sm:$0xff]  ;;  %v2673_v26 = vld [vmem:[%s8514_s5 + $0xd8] sm:$0xff] }
 0x1fb   :  { %3086 = vmatprep.subr.bf16.mxu0 %v5532_v38  ;;  %3127 = vmatprep.subr.bf16.mxu1 %v5534_v42  ;;  %v5505_v38 = vcombine.low %v2673_v26, %v2677_v27  ;;  %v2692_v42 = vld [vmem:[%s8514_s5 + $0x170] sm:$0xff] }
 0x1fe   :  { %3087 = vmatpush1.bf16.msra.mxu0 %v5531_v40  ;;  %3128 = vmatpush1.bf16.msra.mxu1 %v5533_v41  ;;  %v5514_v40 = vcombine.high %v2681_v33, %v2685_v34  ;;  %v2688_v41 = vld [vmem:[%s8514_s5 + $0x150] sm:$0xff]  ;;  %v6035_v33 = vld [vmem:[%s8516_s7 + $0xac] ss:$16 sps:$4 sm:$0xff]  }
 0x1ff   :  { %3154 = vmatprep.subr.bf16.mxu0 %v5480_v57  ;;  %3195 = vmatprep.subr.bf16.mxu1 %v5482_v50  ;;  %v2701_v50 = vld [vmem:[%s8514_s5 + $0x1b8] sm:$0xff]  ;;  %v6030_v34 = vld [vmem:[%s8516_s7 + $0xa0] ss:$16 sps:$4 sm:$0xff]  }
 0x234   :  { %v5811_v18 = vpop.f32.mrb[8].mxu0  ;;  %v5833_v23 = vpop.f32.mrb[8].mxu1 }
 0x235   :  { %v5812_v25 = vpop.f32.mrb[9].mxu0  ;;  %v5834_v29 = vpop.f32.mrb[9].mxu1 }
 0x236   :  { %v5813_v28 = vadd.f32 %v5812_v25, %v5811_v18  ;;  %v5814_v30 = vpop.f32.mrb[10].mxu0  ;;  %v5835_v31 = vadd.f32 %v5834_v29, %v5833_v23  ;;  %v5836_v21 = vpop.f32.mrb[10].mxu1  ;;  %v5487_v23 = vcombine.low %v2656_v6, %v2660_v7  ;;  %v2672_v25 = vld [vmem:[%s8514_s5 + $0xd0] sm:$0xff]  ;;  %v5498_v29 = vcombine.high %v2665_v16, %v2669_v17 }
 0x237   :  { %v5815_v32 = vpop.f32.mrb[11].mxu0  ;;  %v5837_v37 = vpop.f32.mrb[11].mxu1  ;;  %v5495_v30 = vcombine.low %v2664_v14, %v2668_v15  ;;  %v2680_v21 = vld [vmem:[%s8514_s5 + $0x110] sm:$0xff]  ;;  %v5504_v35 = vcombine.high %v2672_v25, %v2676_v56 }
 0x238   :  { %v2519_v36 = vadd.f32 %v5813_v28, %v5410_v24  ;;  %v5489_v24 = vcombine.low %v2657_v8, %v2661_v9  ;;  %v5496_v28 = vcombine.high %v2664_v14, %v2668_v15  ;;  %v2684_v32 = vld [vmem:[%s8514_s5 + $0x130] sm:$0xff]  ;;  %v5503_v37 = vcombine.low %v2672_v25, %v2676_v56  ;;  %v6003_v15 = vld [vmem:[%s8516_s7 + $0x8] ss:$16 sps:$4 sm:$0xff]  }
 0x239   :  { %v5512_v39 = vcombine.high %v2680_v21, %v2684_v32  ;;  %v5511_v12 = vcombine.low %v2680_v21, %v2684_v32  ;;  %v6000_v14 = vld [vmem:[%s8516_s7] ss:$16 sps:$4 sm:$0xff]   ;;  %v6015_v25 = vld [vmem:[%s8516_s7 + $0x48] ss:$16 sps:$4 sm:$0xff]   ;;  %v6020_v56 = vld [vmem:[%s8516_s7 + $0x64] ss:$16 sps:$4 sm:$0xff]  }
 0x23a   :  { %v2559_v43 = vadd.f32 %v5835_v31, %v2519_v36  ;;  %v5497_v31 = vcombine.low %v2665_v16, %v2669_v17  ;;  %v5506_v36 = vcombine.high %v2673_v26, %v2677_v27  ;;  %v6008_v16 = vld [vmem:[%s8516_s7 + $0x24] ss:$16 sps:$4 sm:$0xff]   ;;  %v6011_v17 = vld [vmem:[%s8516_s7 + $0x2c] ss:$16 sps:$4 sm:$0xff]   ;;  %v6018_v27 = vld [vmem:[%s8516_s7 + $0x60] ss:$16 sps:$4 sm:$0xff]  }
 0x23b   :  { %v6023_v26 = vld [vmem:[%s8516_s7 + $0x6c] ss:$16 sps:$4 sm:$0xff]   ;;  %v6027_v21 = vld [vmem:[%s8516_s7 + $0x88] ss:$16 sps:$4 sm:$0xff]   ;;  %v6032_v32 = vld [vmem:[%s8516_s7 + $0xa4] ss:$16 sps:$4 sm:$0xff]  }
 0x2b4   :  { %v5855_v22 = vpop.f32.mrb[12].mxu0  ;;  %v5877_v51 = vpop.f32.mrb[12].mxu1 }
 0x2b5   :  { %v5856_v52 = vpop.f32.mrb[13].mxu0  ;;  %v5878_v61 = vpop.f32.mrb[13].mxu1 }
 0x2b6   :  { %v5857_v53 = vadd.f32 %v5856_v52, %v5855_v22  ;;  %v5858_v62 = vpop.f32.mrb[14].mxu0  ;;  %v5879_v3 = vadd.f32 %v5878_v61, %v5877_v51  ;;  %v5880_v4 = vpop.f32.mrb[14].mxu1  ;;  %v5519_v22 = vcombine.low %v2688_v41, %v2692_v42  ;;  %v2704_v61 = vld [vmem:[%s8514_s5 + $0x1d0] sm:$0xff] }
 0x2b7   :  { %v5859_v5 = vpop.f32.mrb[15].mxu0  ;;  %v5881_v11 = vpop.f32.mrb[15].mxu1  ;;  %v2708_v62 = vld [vmem:[%s8514_s5 + $0x1f0] sm:$0xff]  ;;  %v2709_v4 = vld [vmem:[%s8514_s5 + $0x1f8] sm:$0xff] }
 0x2b8   :  { %v2599_v10 = vadd.f32 %v5857_v53, %v2559_v43  ;;  %v2689_v43 = vld [vmem:[%s8514_s5 + $0x158] sm:$0xff]  ;;  %v5536_v7 = vcombine.high %v2704_v61, %v2708_v62  ;;  %v5535_v9 = vcombine.low %v2704_v61, %v2708_v62  ;;  %v6002_v11 = vld [vmem:[%s8516_s7 + $0x4] ss:$16 sps:$4 sm:$0xff]   ;;  %v6066_v62 = vld [vmem:[%s8516_s7 + $0x160] ss:$16 sps:$4 sm:$0xff]  }
 0x2b9   :  { %v5522_v57 = vcombine.high %v2689_v43, %v2693_v44  ;;  %v5521_v51 = vcombine.low %v2689_v43, %v2693_v44  ;;  %v6045_v43 = vld [vmem:[%s8516_s7 + $0xe8] ss:$16 sps:$4 sm:$0xff]   ;;  %v6050_v44 = vld [vmem:[%s8516_s7 + $0x104] ss:$16 sps:$4 sm:$0xff]   ;;  %v6071_v61 = vld [vmem:[%s8516_s7 + $0x16c] ss:$16 sps:$4 sm:$0xff]  }
 0x2ba   :  { %v2639_v13 = vadd.f32 %v5879_v3, %v2599_v10  ;;  %v2705_v3 = vld [vmem:[%s8514_s5 + $0x1d8] sm:$0xff] }
 0x2bb   :  { %v5538_v8 = vcombine.high %v2705_v3, %v2709_v4  ;;  %v5537_v10 = vcombine.low %v2705_v3, %v2709_v4  ;;  %v6069_v3 = vld [vmem:[%s8516_s7 + $0x168] ss:$16 sps:$4 sm:$0xff]   ;;  %v6074_v4 = vld [vmem:[%s8516_s7 + $0x184] ss:$16 sps:$4 sm:$0xff]  }
 0x2bc   :  { %2644 = vst [vmem:[%s8517_s9] sm:$0xff] %v2639_v13  ;;  %v7617_v18 = vpack.c.bf16 %v2639_v13, %v2639_v13  ;;  %v6005_v13 = vld [vmem:[%s8516_s7 + $0xc] ss:$16 sps:$4 sm:$0xff]  }
 0x2be   :  { %3105 = vmatmul.mubr.bf16.vlgmr.msra.gmra.mrb[16].mxu0 %v7617_v18  ;;  %3146 = vmatmul.mubr.bf16.vlgmr.msra.gmra.mrb[16].mxu1 %v7617_v18 }
 0x2bf   :  { %3155 = vmatpush1.bf16.msra.mxu0 %v5479_v46  ;;  %3196 = vmatpush1.bf16.msra.mxu1 %v5481_v49  ;;  %v5520_v46 = vcombine.high %v2688_v41, %v2692_v42  ;;  %v2697_v49 = vld [vmem:[%s8514_s5 + $0x198] sm:$0xff]  ;;  %v6042_v42 = vld [vmem:[%s8516_s7 + $0xe0] ss:$16 sps:$4 sm:$0xff]  }
 0x2c0   :  { %3156 = vmatprep.subr.bf16.mxu0 %v5488_v19  ;;  %3197 = vmatprep.subr.bf16.mxu1 %v5490_v20  ;;  %v5530_v53 = vcombine.high %v2697_v49, %v2701_v50  ;;  %v5529_v6 = vcombine.low %v2697_v49, %v2701_v50  ;;  %v6006_v19 = vld [vmem:[%s8516_s7 + $0x20] ss:$16 sps:$4 sm:$0xff]   ;;  %v6009_v20 = vld [vmem:[%s8516_s7 + $0x28] ss:$16 sps:$4 sm:$0xff]   ;;  %v6047_v41 = vld [vmem:[%s8516_s7 + $0xec] ss:$16 sps:$4 sm:$0xff]  }
 0x2c1   :  { %3186 = vmatprep.mubr.bf16.mxu0 %v6384_v48  ;;  %3227 = vmatprep.mubr.bf16.mxu1 %v6384_v48  ;;  %v2700_v48 = vld [vmem:[%s8514_s5 + $0x1b0] sm:$0xff]  ;;  %v6057_v49 = vld [vmem:[%s8516_s7 + $0x128] ss:$16 sps:$4 sm:$0xff]  }
 0x2c2   :  { %v5528_v52 = vcombine.high %v2696_v47, %v2700_v48  ;;  %v5527_v5 = vcombine.low %v2696_v47, %v2700_v48  ;;  %v6059_v47 = vld [vmem:[%s8516_s7 + $0x12c] ss:$16 sps:$4 sm:$0xff]   ;;  %v6054_v48 = vld [vmem:[%s8516_s7 + $0x120] ss:$16 sps:$4 sm:$0xff]   ;;  %v6062_v50 = vld [vmem:[%s8516_s7 + $0x144] ss:$16 sps:$4 sm:$0xff]  }
 0x2c3   :  { %3157 = vmatpush1.bf16.msra.mxu0 %v5487_v23  ;;  %3198 = vmatpush1.bf16.msra.mxu1 %v5489_v24  ;;  %v6014_v23 = vld [vmem:[%s8516_s7 + $0x44] ss:$16 sps:$4 sm:$0xff]   ;;  %v6012_v24 = vld [vmem:[%s8516_s7 + $0x40] ss:$16 sps:$4 sm:$0xff]  }
 0x2c4   :  { %3158 = vmatprep.subr.bf16.mxu0 %v5496_v28  ;;  %3199 = vmatprep.subr.bf16.mxu1 %v5498_v29  ;;  %v6021_v28 = vld [vmem:[%s8516_s7 + $0x68] ss:$16 sps:$4 sm:$0xff]   ;;  %v6026_v29 = vld [vmem:[%s8516_s7 + $0x84] ss:$16 sps:$4 sm:$0xff]  }
 0x2c7   :  { %3159 = vmatpush1.bf16.msra.mxu0 %v5495_v30  ;;  %3200 = vmatpush1.bf16.msra.mxu1 %v5497_v31  ;;  %v6029_v30 = vld [vmem:[%s8516_s7 + $0x8c] ss:$16 sps:$4 sm:$0xff]   ;;  %v6024_v31 = vld [vmem:[%s8516_s7 + $0x80] ss:$16 sps:$4 sm:$0xff]  }
 0x2c8   :  { %3160 = vmatprep.subr.bf16.mxu0 %v5504_v35  ;;  %3201 = vmatprep.subr.bf16.mxu1 %v5506_v36  ;;  %v6033_v35 = vld [vmem:[%s8516_s7 + $0xa8] ss:$16 sps:$4 sm:$0xff]   ;;  %v6038_v36 = vld [vmem:[%s8516_s7 + $0xc4] ss:$16 sps:$4 sm:$0xff]  }
 0x2cb   :  { %3161 = vmatpush1.bf16.msra.mxu0 %v5503_v37  ;;  %3202 = vmatpush1.bf16.msra.mxu1 %v5505_v38  ;;  %v6041_v37 = vld [vmem:[%s8516_s7 + $0xcc] ss:$16 sps:$4 sm:$0xff]   ;;  %v6036_v38 = vld [vmem:[%s8516_s7 + $0xc0] ss:$16 sps:$4 sm:$0xff]  }
 0x2cc   :  { %3162 = vmatprep.subr.bf16.mxu0 %v5512_v39  ;;  %3203 = vmatprep.subr.bf16.mxu1 %v5514_v40  ;;  %v6039_v39 = vld [vmem:[%s8516_s7 + $0xc8] ss:$16 sps:$4 sm:$0xff]   ;;  %v6044_v40 = vld [vmem:[%s8516_s7 + $0xe4] ss:$16 sps:$4 sm:$0xff]  }
 0x2cf   :  { %3163 = vmatpush1.bf16.msra.mxu0 %v5511_v12  ;;  %3204 = vmatpush1.bf16.msra.mxu1 %v5513_v45  ;;  %v6053_v12 = vld [vmem:[%s8516_s7 + $0x10c] ss:$16 sps:$4 sm:$0xff]   ;;  %v6048_v45 = vld [vmem:[%s8516_s7 + $0x100] ss:$16 sps:$4 sm:$0xff]  }
 0x2d0   :  { %3164 = vmatprep.subr.bf16.mxu0 %v5520_v46  ;;  %3205 = vmatprep.subr.bf16.mxu1 %v5522_v57  ;;  %v6051_v46 = vld [vmem:[%s8516_s7 + $0x108] ss:$16 sps:$4 sm:$0xff]   ;;  %v6056_v57 = vld [vmem:[%s8516_s7 + $0x124] ss:$16 sps:$4 sm:$0xff]  }
 0x2d3   :  { %3165 = vmatpush1.bf16.msra.mxu0 %v5519_v22  ;;  %3206 = vmatpush1.bf16.msra.mxu1 %v5521_v51  ;;  %v6065_v22 = vld [vmem:[%s8516_s7 + $0x14c] ss:$16 sps:$4 sm:$0xff]   ;;  %v6060_v51 = vld [vmem:[%s8516_s7 + $0x140] ss:$16 sps:$4 sm:$0xff]  }
 0x2d4   :  { %3166 = vmatprep.subr.bf16.mxu0 %v5528_v52  ;;  %3207 = vmatprep.subr.bf16.mxu1 %v5530_v53  ;;  %v6063_v52 = vld [vmem:[%s8516_s7 + $0x148] ss:$16 sps:$4 sm:$0xff]   ;;  %v6068_v53 = vld [vmem:[%s8516_s7 + $0x164] ss:$16 sps:$4 sm:$0xff]  }
 0x2d7   :  { %3167 = vmatpush1.bf16.msra.mxu0 %v5527_v5  ;;  %3208 = vmatpush1.bf16.msra.mxu1 %v5529_v6  ;;  %v6077_v5 = vld [vmem:[%s8516_s7 + $0x18c] ss:$16 sps:$4 sm:$0xff]   ;;  %v6072_v6 = vld [vmem:[%s8516_s7 + $0x180] ss:$16 sps:$4 sm:$0xff]  }
 0x2d8   :  { %3168 = vmatprep.subr.bf16.mxu0 %v5536_v7  ;;  %3209 = vmatprep.subr.bf16.mxu1 %v5538_v8  ;;  %v6075_v7 = vld [vmem:[%s8516_s7 + $0x188] ss:$16 sps:$4 sm:$0xff]   ;;  %v6080_v8 = vld [vmem:[%s8516_s7 + $0x1a4] ss:$16 sps:$4 sm:$0xff]  }
 0x2db   :  { %3169 = vmatpush1.bf16.msra.mxu0 %v5535_v9  ;;  %3210 = vmatpush1.bf16.msra.mxu1 %v5537_v10  ;;  %v6083_v9 = vld [vmem:[%s8516_s7 + $0x1ac] ss:$16 sps:$4 sm:$0xff]   ;;  %v6078_v10 = vld [vmem:[%s8516_s7 + $0x1a0] ss:$16 sps:$4 sm:$0xff]  }
 0x2dc   :  { %4810 = vmatprep.subr.bf16.mxu0 %v6002_v11  ;;  %4974 = vmatprep.subr.bf16.mxu1 %v6005_v13  ;;  %v6081_v11 = vld [vmem:[%s8516_s7 + $0x1a8] ss:$16 sps:$4 sm:$0xff]   ;;  %v6086_v13 = vld [vmem:[%s8516_s7 + $0x1c4] ss:$16 sps:$4 sm:$0xff]  }
 0x2de   :  { %3187 = vmatmul.mubr.bf16.vlgmr.msra.gmra.mrb[20].mxu0 %v7617_v18  ;;  %3228 = vmatmul.mubr.bf16.vlgmr.msra.gmra.mrb[20].mxu1 %v7617_v18  ;;  %v6017_v18 = vld [vmem:[%s8516_s7 + $0x4c] ss:$16 sps:$4 sm:$0xff]  }
 0x2df   :  { %4811 = vmatpush1.bf16.msra.mxu0 %v6000_v14  ;;  %4975 = vmatpush1.bf16.msra.mxu1 %v6003_v15  ;;  %v6089_v14 = vld [vmem:[%s8516_s7 + $0x1cc] ss:$16 sps:$4 sm:$0xff]   ;;  %v6084_v15 = vld [vmem:[%s8516_s7 + $0x1c0] ss:$16 sps:$4 sm:$0xff]  }
 0x2e0   :  { %4812 = vmatprep.subr.bf16.mxu0 %v6008_v16  ;;  %4976 = vmatprep.subr.bf16.mxu1 %v6011_v17  ;;  %v6087_v16 = vld [vmem:[%s8516_s7 + $0x1c8] ss:$16 sps:$4 sm:$0xff]   ;;  %v6092_v17 = vld [vmem:[%s8516_s7 + $0x1e4] ss:$16 sps:$4 sm:$0xff]  }
 0x2e3   :  { %4813 = vmatpush1.bf16.msra.mxu0 %v6006_v19  ;;  %4977 = vmatpush1.bf16.msra.mxu1 %v6009_v20  ;;  %v6095_v19 = vld [vmem:[%s8516_s7 + $0x1ec] ss:$16 sps:$4 sm:$0xff]   ;;  %v6090_v20 = vld [vmem:[%s8516_s7 + $0x1e0] ss:$16 sps:$4 sm:$0xff]  }
 0x2e4   :  { %4814 = vmatprep.subr.bf16.mxu0 %v6014_v23  ;;  %4978 = vmatprep.subr.bf16.mxu1 %v6017_v18  ;;  %v6093_v23 = vld [vmem:[%s8516_s7 + $0x1e8] ss:$16 sps:$4 sm:$0xff]   ;;  %v6098_v18 = vld [vmem:[%s8516_s7 + $0x204] ss:$16 sps:$4 sm:$0xff]  }
 0x2e7   :  { %4815 = vmatpush1.bf16.msra.mxu0 %v6012_v24  ;;  %4979 = vmatpush1.bf16.msra.mxu1 %v6015_v25  ;;  %v6101_v24 = vld [vmem:[%s8516_s7 + $0x20c] ss:$16 sps:$4 sm:$0xff]   ;;  %v7884_v25 = vld [vmem:[%s8518_s6] sm:$0xff] }
 0x2e8   :  { %4816 = vmatprep.subr.bf16.mxu0 %v6020_v56  ;;  %4980 = vmatprep.subr.bf16.mxu1 %v6023_v26  ;;  %v2715_v56 = vrot.slane %v7884_v25, %v7349_v55  ;;  %v2719_v26 = vrot.slane %v7884_v25, %v7360_v59 }
 0x2eb   :  { %4817 = vmatpush1.bf16.msra.mxu0 %v6018_v27  ;;  %4981 = vmatpush1.bf16.msra.mxu1 %v6021_v28  ;;  %v2727_v27 = vrot.slane %v7884_v25, %v7363_v60 }
 0x2ec   :  { %4818 = vmatprep.subr.bf16.mxu0 %v6026_v29  ;;  %4982 = vmatprep.subr.bf16.mxu1 %v6029_v30 }
 0x2ef   :  { %4819 = vmatpush1.bf16.msra.mxu0 %v6024_v31  ;;  %4983 = vmatpush1.bf16.msra.mxu1 %v6027_v21 }
 0x2f0   :  { %4820 = vmatprep.subr.bf16.mxu0 %v6032_v32  ;;  %4984 = vmatprep.subr.bf16.mxu1 %v6035_v33 }
 0x2f3   :  { %4821 = vmatpush1.bf16.msra.mxu0 %v6030_v34  ;;  %4985 = vmatpush1.bf16.msra.mxu1 %v6033_v35 }
 0x2f4   :  { %4822 = vmatprep.subr.bf16.mxu0 %v6038_v36  ;;  %4986 = vmatprep.subr.bf16.mxu1 %v6041_v37 }
 0x2f7   :  { %4823 = vmatpush1.bf16.msra.mxu0 %v6036_v38  ;;  %4987 = vmatpush1.bf16.msra.mxu1 %v6039_v39 }
 0x2f8   :  { %4824 = vmatprep.subr.bf16.mxu0 %v6044_v40  ;;  %4988 = vmatprep.subr.bf16.mxu1 %v6047_v41 }
 0x2fb   :  { %4825 = vmatpush1.bf16.msra.mxu0 %v6042_v42  ;;  %4989 = vmatpush1.bf16.msra.mxu1 %v6045_v43  ;;  %v6096_v42 = vld [vmem:[%s8516_s7 + $0x200] ss:$16 sps:$4 sm:$0xff]   ;;  %v6099_v43 = vld [vmem:[%s8516_s7 + $0x208] ss:$16 sps:$4 sm:$0xff]  }
 0x2fc   :  { %4826 = vmatprep.subr.bf16.mxu0 %v6050_v44  ;;  %4990 = vmatprep.subr.bf16.mxu1 %v6053_v12  ;;  %v6104_v12 = vld [vmem:[%s8516_s7 + $0x224] ss:$16 sps:$4 sm:$0xff]  }
 0x2ff   :  { %4827 = vmatpush1.bf16.msra.mxu0 %v6048_v45  ;;  %4991 = vmatpush1.bf16.msra.mxu1 %v6051_v46  ;;  %v6107_v45 = vld [vmem:[%s8516_s7 + $0x22c] ss:$16 sps:$4 sm:$0xff]  }
 0x300   :  { %4828 = vmatprep.subr.bf16.mxu0 %v6056_v57  ;;  %4992 = vmatprep.subr.bf16.mxu1 %v6059_v47  ;;  %v6102_v57 = vld [vmem:[%s8516_s7 + $0x220] ss:$16 sps:$4 sm:$0xff]   ;;  %v6105_v47 = vld [vmem:[%s8516_s7 + $0x228] ss:$16 sps:$4 sm:$0xff]  }
 0x303   :  { %4829 = vmatpush1.bf16.msra.mxu0 %v6054_v48  ;;  %4993 = vmatpush1.bf16.msra.mxu1 %v6057_v49  ;;  %v6110_v48 = vld [vmem:[%s8516_s7 + $0x244] ss:$16 sps:$4 sm:$0xff]   ;;  %v6113_v49 = vld [vmem:[%s8516_s7 + $0x24c] ss:$16 sps:$4 sm:$0xff]  }
 0x304   :  { %4830 = vmatprep.subr.bf16.mxu0 %v6062_v50  ;;  %4994 = vmatprep.subr.bf16.mxu1 %v6065_v22  ;;  %v6108_v50 = vld [vmem:[%s8516_s7 + $0x240] ss:$16 sps:$4 sm:$0xff]   ;;  %v6111_v22 = vld [vmem:[%s8516_s7 + $0x248] ss:$16 sps:$4 sm:$0xff]  }
 0x307   :  { %4831 = vmatpush1.bf16.msra.mxu0 %v6060_v51  ;;  %4995 = vmatpush1.bf16.msra.mxu1 %v6063_v52  ;;  %v6116_v51 = vld [vmem:[%s8516_s7 + $0x264] ss:$16 sps:$4 sm:$0xff]   ;;  %v6119_v52 = vld [vmem:[%s8516_s7 + $0x26c] ss:$16 sps:$4 sm:$0xff]  }
 0x308   :  { %4832 = vmatprep.subr.bf16.mxu0 %v6068_v53  ;;  %4996 = vmatprep.subr.bf16.mxu1 %v6071_v61  ;;  %v6114_v53 = vld [vmem:[%s8516_s7 + $0x260] ss:$16 sps:$4 sm:$0xff]   ;;  %v6117_v61 = vld [vmem:[%s8516_s7 + $0x268] ss:$16 sps:$4 sm:$0xff]  }
 0x30b   :  { %4833 = vmatpush1.bf16.msra.mxu0 %v6066_v62  ;;  %4997 = vmatpush1.bf16.msra.mxu1 %v6069_v3  ;;  %v6122_v62 = vld [vmem:[%s8516_s7 + $0x284] ss:$16 sps:$4 sm:$0xff]   ;;  %v6125_v3 = vld [vmem:[%s8516_s7 + $0x28c] ss:$16 sps:$4 sm:$0xff]  }
 0x30c   :  { %4834 = vmatprep.subr.bf16.mxu0 %v6074_v4  ;;  %4998 = vmatprep.subr.bf16.mxu1 %v6077_v5  ;;  %v6120_v4 = vld [vmem:[%s8516_s7 + $0x280] ss:$16 sps:$4 sm:$0xff]   ;;  %v6123_v5 = vld [vmem:[%s8516_s7 + $0x288] ss:$16 sps:$4 sm:$0xff]  }
 0x30f   :  { %4835 = vmatpush1.bf16.msra.mxu0 %v6072_v6  ;;  %4999 = vmatpush1.bf16.msra.mxu1 %v6075_v7  ;;  %v6128_v6 = vld [vmem:[%s8516_s7 + $0x2a4] ss:$16 sps:$4 sm:$0xff]   ;;  %v6131_v7 = vld [vmem:[%s8516_s7 + $0x2ac] ss:$16 sps:$4 sm:$0xff]  }
 0x310   :  { %4836 = vmatprep.subr.bf16.mxu0 %v6080_v8  ;;  %5000 = vmatprep.subr.bf16.mxu1 %v6083_v9  ;;  %v6126_v8 = vld [vmem:[%s8516_s7 + $0x2a0] ss:$16 sps:$4 sm:$0xff]   ;;  %v6129_v9 = vld [vmem:[%s8516_s7 + $0x2a8] ss:$16 sps:$4 sm:$0xff]  }
 0x313   :  { %4837 = vmatpush1.bf16.msra.mxu0 %v6078_v10  ;;  %5001 = vmatpush1.bf16.msra.mxu1 %v6081_v11  ;;  %v6134_v10 = vld [vmem:[%s8516_s7 + $0x2c4] ss:$16 sps:$4 sm:$0xff]   ;;  %v6137_v11 = vld [vmem:[%s8516_s7 + $0x2cc] ss:$16 sps:$4 sm:$0xff]  }
 0x314   :  { %4838 = vmatprep.subr.bf16.mxu0 %v6086_v13  ;;  %5002 = vmatprep.subr.bf16.mxu1 %v6089_v14  ;;  %v6132_v13 = vld [vmem:[%s8516_s7 + $0x2c0] ss:$16 sps:$4 sm:$0xff]   ;;  %v6135_v14 = vld [vmem:[%s8516_s7 + $0x2c8] ss:$16 sps:$4 sm:$0xff]  }
 0x317   :  { %4839 = vmatpush1.bf16.msra.mxu0 %v6084_v15  ;;  %5003 = vmatpush1.bf16.msra.mxu1 %v6087_v16  ;;  %v6140_v15 = vld [vmem:[%s8516_s7 + $0x2e4] ss:$16 sps:$4 sm:$0xff]   ;;  %v6143_v16 = vld [vmem:[%s8516_s7 + $0x2ec] ss:$16 sps:$4 sm:$0xff]  }
 0x318   :  { %4840 = vmatprep.subr.bf16.mxu0 %v6092_v17  ;;  %5004 = vmatprep.subr.bf16.mxu1 %v6095_v19 }
 0x31b   :  { %4841 = vmatpush1.bf16.msra.mxu0 %v6090_v20  ;;  %5005 = vmatpush1.bf16.msra.mxu1 %v6093_v23 }
 0x31c   :  { %4851 = vmatprep.subr.bf16.mxu0 %v6098_v18  ;;  %5015 = vmatprep.subr.bf16.mxu1 %v6101_v24 }
 0x391   :  { %v3106_v28 = vpop.f32.mrb[16].mxu0  ;;  %v7892_v29 = vpop.f32.mrb[16].mxu1 }
 0x392   :  { %v3107_v30 = vadd.f32 %v3106_v28, %v2715_v56  ;;  %v3108_v31 = vpop.f32.mrb[17].mxu0  ;;  %v3149_v21 = vpop.f32.mrb[17].mxu1  ;;  %v6138_v56 = vld [vmem:[%s8516_s7 + $0x2e0] ss:$16 sps:$4 sm:$0xff]  }
 0x393   :  { %v3109_v32 = vadd.f32 %v3108_v31, %v2719_v26  ;;  %v3150_v33 = vadd.f32 %v3149_v21, %v2727_v27  ;;  %v3110_v34 = vpop.f32.mrb[18].mxu0  ;;  %v3151_v35 = vpop.f32.mrb[18].mxu1  ;;  %v6141_v26 = vld [vmem:[%s8516_s7 + $0x2e8] ss:$16 sps:$4 sm:$0xff]   ;;  %v6149_v31 = vld [vmem:[%s8516_s7 + $0x30c] ss:$16 sps:$4 sm:$0xff]  }
 0x394   :  { %v3236_v36 = vmax.f32 %v3107_v30, 0.0  ;;  %v3111_v37 = vpop.f32.mrb[19].mxu0  ;;  %v3152_v38 = vpop.f32.mrb[19].mxu1  ;;  %v6146_v30 = vld [vmem:[%s8516_s7 + $0x304] ss:$16 sps:$4 sm:$0xff]  }
 0x395   :  { %v3237_v39 = vmax.f32 %v3109_v32, 0.0  ;;  %v3239_v40 = vmax.f32 %v3150_v33, 0.0  ;;  %v6144_v21 = vld [vmem:[%s8516_s7 + $0x300] ss:$16 sps:$4 sm:$0xff]   ;;  %v6147_v32 = vld [vmem:[%s8516_s7 + $0x308] ss:$16 sps:$4 sm:$0xff]  }
 0x396   :  { %v3244_v44 = vpack.c.bf16 %v3236_v36, %v3236_v36  ;;  %v6152_v33 = vld [vmem:[%s8516_s7 + $0x324] ss:$16 sps:$4 sm:$0xff]   ;;  %v6155_v34 = vld [vmem:[%s8516_s7 + $0x32c] ss:$16 sps:$4 sm:$0xff]   ;;  %v6150_v35 = vld [vmem:[%s8516_s7 + $0x320] ss:$16 sps:$4 sm:$0xff]  }
 0x397   :  { %v3245_v41 = vpack.c.bf16 %v3237_v39, %v3237_v39  ;;  %v3247_v46 = vpack.c.bf16 %v3239_v40, %v3239_v40  ;;  %v6153_v36 = vld [vmem:[%s8516_s7 + $0x328] ss:$16 sps:$4 sm:$0xff]   ;;  %v6158_v37 = vld [vmem:[%s8516_s7 + $0x344] ss:$16 sps:$4 sm:$0xff]   ;;  %v6161_v38 = vld [vmem:[%s8516_s7 + $0x34c] ss:$16 sps:$4 sm:$0xff]  }
 0x398   :  { %v6156_v39 = vld [vmem:[%s8516_s7 + $0x340] ss:$16 sps:$4 sm:$0xff]   ;;  %v6159_v40 = vld [vmem:[%s8516_s7 + $0x348] ss:$16 sps:$4 sm:$0xff]  }
 0x399   :  { %4842 = vmatprep.mubr.bf16.mxu0 %v3245_v41  ;;  %5006 = vmatprep.mubr.bf16.mxu1 %v3245_v41  ;;  %v6164_v41 = vld [vmem:[%s8516_s7 + $0x364] ss:$16 sps:$4 sm:$0xff]  }
 0x39a   :  { %4843 = vmatmul.mubr.bf16.vlgmr.msra.gmra.mrb[24].mxu0 %v3244_v44  ;;  %5007 = vmatmul.mubr.bf16.vlgmr.msra.gmra.mrb[24].mxu1 %v3244_v44  ;;  %v6165_v44 = vld [vmem:[%s8516_s7 + $0x368] ss:$16 sps:$4 sm:$0xff]  }
 0x39b   :  { %4852 = vmatpush1.bf16.msra.mxu0 %v6096_v42  ;;  %5016 = vmatpush1.bf16.msra.mxu1 %v6099_v43  ;;  %v6167_v42 = vld [vmem:[%s8516_s7 + $0x36c] ss:$16 sps:$4 sm:$0xff]   ;;  %v6162_v43 = vld [vmem:[%s8516_s7 + $0x360] ss:$16 sps:$4 sm:$0xff]  }
 0x39c   :  { %4883 = vmatprep.mubr.bf16.mxu0 %v3247_v46  ;;  %5047 = vmatprep.mubr.bf16.mxu1 %v3247_v46  ;;  %v6168_v46 = vld [vmem:[%s8516_s7 + $0x380] ss:$16 sps:$4 sm:$0xff]  }
 0x39d   :  { %4853 = vmatprep.subr.bf16.mxu0 %v6104_v12  ;;  %5017 = vmatprep.subr.bf16.mxu1 %v6107_v45  ;;  %v6170_v12 = vld [vmem:[%s8516_s7 + $0x384] ss:$16 sps:$4 sm:$0xff]   ;;  %v6173_v45 = vld [vmem:[%s8516_s7 + $0x38c] ss:$16 sps:$4 sm:$0xff]  }
 0x39f   :  { %4854 = vmatpush1.bf16.msra.mxu0 %v6102_v57  ;;  %5018 = vmatpush1.bf16.msra.mxu1 %v6105_v47  ;;  %v6171_v57 = vld [vmem:[%s8516_s7 + $0x388] ss:$16 sps:$4 sm:$0xff]   ;;  %v6176_v47 = vld [vmem:[%s8516_s7 + $0x3a4] ss:$16 sps:$4 sm:$0xff]  }
 0x3a0   :  { %4855 = vmatprep.subr.bf16.mxu0 %v6110_v48  ;;  %5019 = vmatprep.subr.bf16.mxu1 %v6113_v49  ;;  %v6179_v48 = vld [vmem:[%s8516_s7 + $0x3ac] ss:$16 sps:$4 sm:$0xff]   ;;  %v6174_v49 = vld [vmem:[%s8516_s7 + $0x3a0] ss:$16 sps:$4 sm:$0xff]  }
 0x3a3   :  { %4856 = vmatpush1.bf16.msra.mxu0 %v6108_v50  ;;  %5020 = vmatpush1.bf16.msra.mxu1 %v6111_v22  ;;  %v6177_v50 = vld [vmem:[%s8516_s7 + $0x3a8] ss:$16 sps:$4 sm:$0xff]   ;;  %v2723_v22 = vrot.slane %v7884_v25, %v7357_v58 }
 0x3a4   :  { %4857 = vmatprep.subr.bf16.mxu0 %v6116_v51  ;;  %5021 = vmatprep.subr.bf16.mxu1 %v6119_v52  ;;  %v6182_v51 = vld [vmem:[%s8516_s7 + $0x3c4] ss:$16 sps:$4 sm:$0xff]   ;;  %v6185_v52 = vld [vmem:[%s8516_s7 + $0x3cc] ss:$16 sps:$4 sm:$0xff]  }
 0x3a7   :  { %4858 = vmatpush1.bf16.msra.mxu0 %v6114_v53  ;;  %5022 = vmatpush1.bf16.msra.mxu1 %v6117_v61  ;;  %v2735_v53 = vrot.slane %v7884_v25, %v323_v1  ;;  %v6180_v61 = vld [vmem:[%s8516_s7 + $0x3c0] ss:$16 sps:$4 sm:$0xff]   ;;  %v6191_v1 = vld [vmem:[%s8516_s7 + $0x3ec] ss:$16 sps:$4 sm:$0xff]  }
 0x3a8   :  { %4859 = vmatprep.subr.bf16.mxu0 %v6122_v62  ;;  %5023 = vmatprep.subr.bf16.mxu1 %v6125_v3  ;;  %v6183_v62 = vld [vmem:[%s8516_s7 + $0x3c8] ss:$16 sps:$4 sm:$0xff]   ;;  %v3148_v3 = vadd.f32 %v7892_v29, %v2723_v22  ;;  %v6248_v22 = vld [vmem:[%s8516_s7 + $0x524] ss:$16 sps:$4 sm:$0xff]  }
 0x3a9   :  { %v6189_v29 = vld [vmem:[%s8516_s7 + $0x3e8] ss:$16 sps:$4 sm:$0xff]  }
 0x3ab   :  { %4860 = vmatpush1.bf16.msra.mxu0 %v6120_v4  ;;  %5024 = vmatpush1.bf16.msra.mxu1 %v6123_v5  ;;  %v6188_v4 = vld [vmem:[%s8516_s7 + $0x3e4] ss:$16 sps:$4 sm:$0xff]  }
 0x3ac   :  { %4861 = vmatprep.subr.bf16.mxu0 %v6128_v6  ;;  %5025 = vmatprep.subr.bf16.mxu1 %v6131_v7  ;;  %v6186_v6 = vld [vmem:[%s8516_s7 + $0x3e0] ss:$16 sps:$4 sm:$0xff]   ;;  %v3238_v7 = vmax.f32 %v3148_v3, 0.0 }
 0x3ad   :  { %v6252_v3 = vld [vmem:[%s8516_s7 + $0x540] ss:$16 sps:$4 sm:$0xff]  }
 0x3af   :  { %4862 = vmatpush1.bf16.msra.mxu0 %v6126_v8  ;;  %5026 = vmatpush1.bf16.msra.mxu1 %v6129_v9  ;;  %v6194_v8 = vld [vmem:[%s8516_s7 + $0x404] ss:$16 sps:$4 sm:$0xff]   ;;  %v6197_v9 = vld [vmem:[%s8516_s7 + $0x40c] ss:$16 sps:$4 sm:$0xff]  }
 0x3b0   :  { %4863 = vmatprep.subr.bf16.mxu0 %v6134_v10  ;;  %5027 = vmatprep.subr.bf16.mxu1 %v6137_v11  ;;  %v6192_v11 = vld [vmem:[%s8516_s7 + $0x400] ss:$16 sps:$4 sm:$0xff]  }
 0x3b1   :  { %v7978_v17 = vpop.f32.mrb[20].mxu0  ;;  %v7980_v19 = vpop.f32.mrb[20].mxu1 }
 0x3b2   :  { %v7982_v20 = vpop.f32.mrb[21].mxu0  ;;  %v7984_v23 = vpop.f32.mrb[21].mxu1 }
 0x3b3   :  { %v3192_v18 = vpop.f32.mrb[22].mxu0  ;;  %v3233_v24 = vpop.f32.mrb[22].mxu1  ;;  %4864 = vmatpush1.bf16.msra.mxu0 %v6132_v13  ;;  %5028 = vmatpush1.bf16.msra.mxu1 %v6135_v14  ;;  %v3191_v5 = vadd.f32 %v7982_v20, %v2735_v53  ;;  %v3246_v13 = vpack.c.bf16 %v3238_v7, %v3238_v7  ;;  %v6195_v14 = vld [vmem:[%s8516_s7 + $0x408] ss:$16 sps:$4 sm:$0xff]   ;;  %v6203_v20 = vld [vmem:[%s8516_s7 + $0x42c] ss:$16 sps:$4 sm:$0xff]  }
 0x3b4   :  { %v3193_v27 = vpop.f32.mrb[23].mxu0  ;;  %v3234_v28 = vpop.f32.mrb[23].mxu1  ;;  %4865 = vmatprep.subr.bf16.mxu0 %v6140_v15  ;;  %5029 = vmatprep.subr.bf16.mxu1 %v6143_v16  ;;  %v6200_v16 = vld [vmem:[%s8516_s7 + $0x424] ss:$16 sps:$4 sm:$0xff]   ;;  %v6198_v18 = vld [vmem:[%s8516_s7 + $0x420] ss:$16 sps:$4 sm:$0xff]  }
 0x3b5   :  { %v3241_v10 = vmax.f32 %v3191_v5, 0.0  ;;  %v6201_v24 = vld [vmem:[%s8516_s7 + $0x428] ss:$16 sps:$4 sm:$0xff]   ;;  %v6204_v27 = vld [vmem:[%s8516_s7 + $0x440] ss:$16 sps:$4 sm:$0xff]  }
 0x3b6   :  { %v6207_v28 = vld [vmem:[%s8516_s7 + $0x448] ss:$16 sps:$4 sm:$0xff]   ;;  %v6263_v5 = vld [vmem:[%s8516_s7 + $0x56c] ss:$16 sps:$4 sm:$0xff]   ;;  %v6266_v7 = vld [vmem:[%s8516_s7 + $0x584] ss:$16 sps:$4 sm:$0xff]  }
 0x3b7   :  { %4866 = vmatpush1.bf16.msra.mxu0 %v6138_v56  ;;  %5030 = vmatpush1.bf16.msra.mxu1 %v6141_v26  ;;  %v3249_v15 = vpack.c.bf16 %v3241_v10, %v3241_v10  ;;  %v6206_v56 = vld [vmem:[%s8516_s7 + $0x444] ss:$16 sps:$4 sm:$0xff]   ;;  %v6209_v26 = vld [vmem:[%s8516_s7 + $0x44c] ss:$16 sps:$4 sm:$0xff]   ;;  %v6249_v53 = vld [vmem:[%s8516_s7 + $0x528] ss:$16 sps:$4 sm:$0xff]  }
 0x3b8   :  { %4867 = vmatprep.subr.bf16.mxu0 %v6146_v30  ;;  %5031 = vmatprep.subr.bf16.mxu1 %v6149_v31  ;;  %v6212_v30 = vld [vmem:[%s8516_s7 + $0x464] ss:$16 sps:$4 sm:$0xff]   ;;  %v6215_v31 = vld [vmem:[%s8516_s7 + $0x46c] ss:$16 sps:$4 sm:$0xff]   ;;  %v6267_v10 = vld [vmem:[%s8516_s7 + $0x588] ss:$16 sps:$4 sm:$0xff]  }
 0x3bb   :  { %4868 = vmatpush1.bf16.msra.mxu0 %v6144_v21  ;;  %5032 = vmatpush1.bf16.msra.mxu1 %v6147_v32  ;;  %v6210_v21 = vld [vmem:[%s8516_s7 + $0x460] ss:$16 sps:$4 sm:$0xff]   ;;  %v6213_v32 = vld [vmem:[%s8516_s7 + $0x468] ss:$16 sps:$4 sm:$0xff]  }
 0x3bc   :  { %4869 = vmatprep.subr.bf16.mxu0 %v6152_v33  ;;  %5033 = vmatprep.subr.bf16.mxu1 %v6155_v34  ;;  %v6218_v33 = vld [vmem:[%s8516_s7 + $0x484] ss:$16 sps:$4 sm:$0xff]   ;;  %v6221_v34 = vld [vmem:[%s8516_s7 + $0x48c] ss:$16 sps:$4 sm:$0xff]  }
 0x3bf   :  { %4870 = vmatpush1.bf16.msra.mxu0 %v6150_v35  ;;  %5034 = vmatpush1.bf16.msra.mxu1 %v6153_v36  ;;  %v6216_v35 = vld [vmem:[%s8516_s7 + $0x480] ss:$16 sps:$4 sm:$0xff]   ;;  %v6219_v36 = vld [vmem:[%s8516_s7 + $0x488] ss:$16 sps:$4 sm:$0xff]  }
 0x3c0   :  { %4871 = vmatprep.subr.bf16.mxu0 %v6158_v37  ;;  %5035 = vmatprep.subr.bf16.mxu1 %v6161_v38  ;;  %v6224_v37 = vld [vmem:[%s8516_s7 + $0x4a4] ss:$16 sps:$4 sm:$0xff]   ;;  %v6227_v38 = vld [vmem:[%s8516_s7 + $0x4ac] ss:$16 sps:$4 sm:$0xff]  }
 0x3c3   :  { %4872 = vmatpush1.bf16.msra.mxu0 %v6156_v39  ;;  %5036 = vmatpush1.bf16.msra.mxu1 %v6159_v40  ;;  %v6222_v39 = vld [vmem:[%s8516_s7 + $0x4a0] ss:$16 sps:$4 sm:$0xff]   ;;  %v6225_v40 = vld [vmem:[%s8516_s7 + $0x4a8] ss:$16 sps:$4 sm:$0xff]  }
 0x3c4   :  { %4873 = vmatprep.subr.bf16.mxu0 %v6164_v41  ;;  %5037 = vmatprep.subr.bf16.mxu1 %v6167_v42  ;;  %v6230_v41 = vld [vmem:[%s8516_s7 + $0x4c4] ss:$16 sps:$4 sm:$0xff]   ;;  %v6233_v42 = vld [vmem:[%s8516_s7 + $0x4cc] ss:$16 sps:$4 sm:$0xff]  }
 0x3c7   :  { %4874 = vmatpush1.bf16.msra.mxu0 %v6162_v43  ;;  %5038 = vmatpush1.bf16.msra.mxu1 %v6165_v44  ;;  %v6228_v43 = vld [vmem:[%s8516_s7 + $0x4c0] ss:$16 sps:$4 sm:$0xff]   ;;  %v6231_v44 = vld [vmem:[%s8516_s7 + $0x4c8] ss:$16 sps:$4 sm:$0xff]  }
 0x3c8   :  { %4875 = vmatprep.subr.bf16.mxu0 %v6170_v12  ;;  %5039 = vmatprep.subr.bf16.mxu1 %v6173_v45  ;;  %v6236_v12 = vld [vmem:[%s8516_s7 + $0x4e4] ss:$16 sps:$4 sm:$0xff]   ;;  %v6239_v45 = vld [vmem:[%s8516_s7 + $0x4ec] ss:$16 sps:$4 sm:$0xff]  }
 0x3cb   :  { %4876 = vmatpush1.bf16.msra.mxu0 %v6168_v46  ;;  %5040 = vmatpush1.bf16.msra.mxu1 %v6171_v57  ;;  %v6234_v46 = vld [vmem:[%s8516_s7 + $0x4e0] ss:$16 sps:$4 sm:$0xff]   ;;  %v6237_v57 = vld [vmem:[%s8516_s7 + $0x4e8] ss:$16 sps:$4 sm:$0xff]  }
 0x3cc   :  { %4877 = vmatprep.subr.bf16.mxu0 %v6176_v47  ;;  %5041 = vmatprep.subr.bf16.mxu1 %v6179_v48  ;;  %v6242_v47 = vld [vmem:[%s8516_s7 + $0x504] ss:$16 sps:$4 sm:$0xff]   ;;  %v6245_v48 = vld [vmem:[%s8516_s7 + $0x50c] ss:$16 sps:$4 sm:$0xff]  }
 0x3cf   :  { %4878 = vmatpush1.bf16.msra.mxu0 %v6174_v49  ;;  %5042 = vmatpush1.bf16.msra.mxu1 %v6177_v50  ;;  %v6240_v49 = vld [vmem:[%s8516_s7 + $0x500] ss:$16 sps:$4 sm:$0xff]   ;;  %v6243_v50 = vld [vmem:[%s8516_s7 + $0x508] ss:$16 sps:$4 sm:$0xff]  }
 0x3d0   :  { %4879 = vmatprep.subr.bf16.mxu0 %v6182_v51  ;;  %5043 = vmatprep.subr.bf16.mxu1 %v6185_v52  ;;  %v6251_v51 = vld [vmem:[%s8516_s7 + $0x52c] ss:$16 sps:$4 sm:$0xff]   ;;  %v6246_v52 = vld [vmem:[%s8516_s7 + $0x520] ss:$16 sps:$4 sm:$0xff]  }
 0x3d3   :  { %4880 = vmatpush1.bf16.msra.mxu0 %v6180_v61  ;;  %5044 = vmatpush1.bf16.msra.mxu1 %v6183_v62  ;;  %v6254_v61 = vld [vmem:[%s8516_s7 + $0x544] ss:$16 sps:$4 sm:$0xff]   ;;  %v6257_v62 = vld [vmem:[%s8516_s7 + $0x54c] ss:$16 sps:$4 sm:$0xff]  }
 0x3d4   :  { %4881 = vmatprep.subr.bf16.mxu0 %v6188_v4  ;;  %5045 = vmatprep.subr.bf16.mxu1 %v6191_v1  ;;  %v6255_v4 = vld [vmem:[%s8516_s7 + $0x548] ss:$16 sps:$4 sm:$0xff]   ;;  %v6260_v1 = vld [vmem:[%s8516_s7 + $0x564] ss:$16 sps:$4 sm:$0xff]  }
 0x3d7   :  { %4882 = vmatpush1.bf16.msra.mxu0 %v6186_v6  ;;  %5046 = vmatpush1.bf16.msra.mxu1 %v6189_v29  ;;  %v6258_v6 = vld [vmem:[%s8516_s7 + $0x560] ss:$16 sps:$4 sm:$0xff]   ;;  %v6261_v29 = vld [vmem:[%s8516_s7 + $0x568] ss:$16 sps:$4 sm:$0xff]  }
 0x3d8   :  { %4892 = vmatprep.subr.bf16.mxu0 %v6194_v8  ;;  %5056 = vmatprep.subr.bf16.mxu1 %v6197_v9  ;;  %v6269_v8 = vld [vmem:[%s8516_s7 + $0x58c] ss:$16 sps:$4 sm:$0xff]   ;;  %v6264_v9 = vld [vmem:[%s8516_s7 + $0x580] ss:$16 sps:$4 sm:$0xff]  }
 0x3da   :  { %4884 = vmatmul.mubr.bf16.vlgmr.msra.gmra.mrb[24].mxu0 %v3246_v13  ;;  %5048 = vmatmul.mubr.bf16.vlgmr.msra.gmra.mrb[24].mxu1 %v3246_v13  ;;  %v6275_v13 = vld [vmem:[%s8516_s7 + $0x5ac] ss:$16 sps:$4 sm:$0xff]  }
 0x3db   :  { %4893 = vmatpush1.bf16.msra.mxu0 %v6192_v11  ;;  %4924 = vmatprep.mubr.bf16.mxu0 %v3249_v15  ;;  %v6272_v11 = vld [vmem:[%s8516_s7 + $0x5a4] ss:$16 sps:$4 sm:$0xff]  }
 0x3dc   :  { %5057 = vmatpush1.bf16.msra.mxu1 %v6195_v14  ;;  %5088 = vmatprep.mubr.bf16.mxu1 %v3249_v15  ;;  %v6270_v14 = vld [vmem:[%s8516_s7 + $0x5a0] ss:$16 sps:$4 sm:$0xff]   ;;  %v2731_v15 = vrot.slane %v7884_v25, %v319_v63 }
 0x3dd   :  { %4894 = vmatprep.subr.bf16.mxu0 %v6200_v16  ;;  %5058 = vmatprep.subr.bf16.mxu1 %v6203_v20  ;;  %v6273_v16 = vld [vmem:[%s8516_s7 + $0x5a8] ss:$16 sps:$4 sm:$0xff]   ;;  %v6278_v20 = vld [vmem:[%s8516_s7 + $0x5c4] ss:$16 sps:$4 sm:$0xff]   ;;  %v6276_v63 = vld [vmem:[%s8516_s7 + $0x5c0] ss:$16 sps:$4 sm:$0xff]  }
 0x3df   :  { %4895 = vmatpush1.bf16.msra.mxu0 %v6198_v18  ;;  %v6281_v18 = vld [vmem:[%s8516_s7 + $0x5cc] ss:$16 sps:$4 sm:$0xff]  }
 0x3e0   :  { %5059 = vmatpush1.bf16.msra.mxu1 %v6201_v24  ;;  %4896 = vmatprep.subr.bf16.mxu0 %v6206_v56  ;;  %v2743_v24 = vrot.slane %v7884_v25, %v331_v2  ;;  %v3189_v56 = vadd.f32 %v7978_v17, %v2731_v15  ;;  %v6287_v2 = vld [vmem:[%s8516_s7 + $0x5ec] ss:$16 sps:$4 sm:$0xff]   ;;  %v6282_v17 = vld [vmem:[%s8516_s7 + $0x5e0] ss:$16 sps:$4 sm:$0xff]   ;;  %v6345_v15 = vld [vmem:[%s8516_s7 + $0x728] ss:$16 sps:$4 sm:$0xff]  }
 0x3e1   :  { %5060 = vmatprep.subr.bf16.mxu1 %v6209_v26  ;;  %v6279_v26 = vld [vmem:[%s8516_s7 + $0x5c8] ss:$16 sps:$4 sm:$0xff]  }
 0x3e3   :  { %4897 = vmatpush1.bf16.msra.mxu0 %v6204_v27  ;;  %v6284_v27 = vld [vmem:[%s8516_s7 + $0x5e4] ss:$16 sps:$4 sm:$0xff]  }
 0x3e4   :  { %5061 = vmatpush1.bf16.msra.mxu1 %v6207_v28  ;;  %4898 = vmatprep.subr.bf16.mxu0 %v6212_v30  ;;  %v3232_v28 = vadd.f32 %v7984_v23, %v2743_v24  ;;  %v3240_v30 = vmax.f32 %v3189_v56, 0.0  ;;  %v6293_v23 = vld [vmem:[%s8516_s7 + $0x60c] ss:$16 sps:$4 sm:$0xff]   ;;  %v6351_v24 = vld [vmem:[%s8516_s7 + $0x748] ss:$16 sps:$4 sm:$0xff]  }
 0x3e5   :  { %5062 = vmatprep.subr.bf16.mxu1 %v6215_v31  ;;  %v6285_v31 = vld [vmem:[%s8516_s7 + $0x5e8] ss:$16 sps:$4 sm:$0xff]   ;;  %v6359_v56 = vld [vmem:[%s8516_s7 + $0x76c] ss:$16 sps:$4 sm:$0xff]  }
 0x3e7   :  { %4899 = vmatpush1.bf16.msra.mxu0 %v6210_v21  ;;  %v6290_v21 = vld [vmem:[%s8516_s7 + $0x604] ss:$16 sps:$4 sm:$0xff]  }
 0x3e8   :  { %5063 = vmatpush1.bf16.msra.mxu1 %v6213_v32  ;;  %4900 = vmatprep.subr.bf16.mxu0 %v6218_v33  ;;  %v3243_v32 = vmax.f32 %v3232_v28, 0.0  ;;  %v6288_v33 = vld [vmem:[%s8516_s7 + $0x600] ss:$16 sps:$4 sm:$0xff]   ;;  %v6365_v28 = vld [vmem:[%s8516_s7 + $0x78c] ss:$16 sps:$4 sm:$0xff]  }
 0x3e9   :  { %5064 = vmatprep.subr.bf16.mxu1 %v6221_v34  ;;  %v3248_v34 = vpack.c.bf16 %v3240_v30, %v3240_v30  ;;  %v6363_v30 = vld [vmem:[%s8516_s7 + $0x788] ss:$16 sps:$4 sm:$0xff]  }
 0x3eb   :  { %4901 = vmatpush1.bf16.msra.mxu0 %v6216_v35  ;;  %v6291_v35 = vld [vmem:[%s8516_s7 + $0x608] ss:$16 sps:$4 sm:$0xff]  }
 0x3ec   :  { %5065 = vmatpush1.bf16.msra.mxu1 %v6219_v36  ;;  %4902 = vmatprep.subr.bf16.mxu0 %v6224_v37  ;;  %v6296_v36 = vld [vmem:[%s8516_s7 + $0x624] ss:$16 sps:$4 sm:$0xff]   ;;  %v3251_v37 = vpack.c.bf16 %v3243_v32, %v3243_v32  ;;  %v2739_v32 = vrot.slane %v7884_v25, %v327_v0  ;;  %v6375_v25 = vld [vmem:[%s8516_s7 + $0x7c8] ss:$16 sps:$4 sm:$0xff]  }
 0x3ed   :  { %5066 = vmatprep.subr.bf16.mxu1 %v6227_v38  ;;  %v6299_v38 = vld [vmem:[%s8516_s7 + $0x62c] ss:$16 sps:$4 sm:$0xff]  }
 0x3ee   :  { %v3230_v0 = vadd.f32 %v7980_v19, %v2739_v32  ;;  %v6378_v19 = vld [vmem:[%s8516_s7 + $0x7e0] ss:$16 sps:$4 sm:$0xff]  }
 0x3ef   :  { %4903 = vmatpush1.bf16.msra.mxu0 %v6222_v39  ;;  %v6294_v39 = vld [vmem:[%s8516_s7 + $0x620] ss:$16 sps:$4 sm:$0xff]  }
 0x3f0   :  { %5067 = vmatpush1.bf16.msra.mxu1 %v6225_v40  ;;  %4904 = vmatprep.subr.bf16.mxu0 %v6230_v41  ;;  %v6297_v40 = vld [vmem:[%s8516_s7 + $0x628] ss:$16 sps:$4 sm:$0xff]   ;;  %v6302_v41 = vld [vmem:[%s8516_s7 + $0x644] ss:$16 sps:$4 sm:$0xff]  }
 0x3f1   :  { %5068 = vmatprep.subr.bf16.mxu1 %v6233_v42  ;;  %v6305_v42 = vld [vmem:[%s8516_s7 + $0x64c] ss:$16 sps:$4 sm:$0xff]  }
 0x3f3   :  { %4905 = vmatpush1.bf16.msra.mxu0 %v6228_v43  ;;  %v6300_v43 = vld [vmem:[%s8516_s7 + $0x640] ss:$16 sps:$4 sm:$0xff]  }
 0x3f4   :  { %5069 = vmatpush1.bf16.msra.mxu1 %v6231_v44  ;;  %4906 = vmatprep.subr.bf16.mxu0 %v6236_v12  ;;  %v6303_v44 = vld [vmem:[%s8516_s7 + $0x648] ss:$16 sps:$4 sm:$0xff]   ;;  %v6308_v12 = vld [vmem:[%s8516_s7 + $0x664] ss:$16 sps:$4 sm:$0xff]  }
 0x3f5   :  { %5070 = vmatprep.subr.bf16.mxu1 %v6239_v45  ;;  %v6311_v45 = vld [vmem:[%s8516_s7 + $0x66c] ss:$16 sps:$4 sm:$0xff]  }
 0x3f7   :  { %4907 = vmatpush1.bf16.msra.mxu0 %v6234_v46  ;;  %v6306_v46 = vld [vmem:[%s8516_s7 + $0x660] ss:$16 sps:$4 sm:$0xff]  }
 0x3f8   :  { %5071 = vmatpush1.bf16.msra.mxu1 %v6237_v57  ;;  %4908 = vmatprep.subr.bf16.mxu0 %v6242_v47  ;;  %v6309_v57 = vld [vmem:[%s8516_s7 + $0x668] ss:$16 sps:$4 sm:$0xff]   ;;  %v6314_v47 = vld [vmem:[%s8516_s7 + $0x684] ss:$16 sps:$4 sm:$0xff]  }
 0x3f9   :  { %5072 = vmatprep.subr.bf16.mxu1 %v6245_v48  ;;  %v6317_v48 = vld [vmem:[%s8516_s7 + $0x68c] ss:$16 sps:$4 sm:$0xff]  }
 0x3fb   :  { %4909 = vmatpush1.bf16.msra.mxu0 %v6240_v49  ;;  %v6312_v49 = vld [vmem:[%s8516_s7 + $0x680] ss:$16 sps:$4 sm:$0xff]  }
 0x3fc   :  { %5073 = vmatpush1.bf16.msra.mxu1 %v6243_v50  ;;  %4910 = vmatprep.subr.bf16.mxu0 %v6248_v22  ;;  %v6315_v50 = vld [vmem:[%s8516_s7 + $0x688] ss:$16 sps:$4 sm:$0xff]   ;;  %v6320_v22 = vld [vmem:[%s8516_s7 + $0x6a4] ss:$16 sps:$4 sm:$0xff]  }
 0x3fd   :  { %5074 = vmatprep.subr.bf16.mxu1 %v6251_v51  ;;  %v6323_v51 = vld [vmem:[%s8516_s7 + $0x6ac] ss:$16 sps:$4 sm:$0xff]  }
 0x3ff   :  { %4911 = vmatpush1.bf16.msra.mxu0 %v6246_v52  ;;  %v6318_v52 = vld [vmem:[%s8516_s7 + $0x6a0] ss:$16 sps:$4 sm:$0xff]  }
 0x400   :  { %5075 = vmatpush1.bf16.msra.mxu1 %v6249_v53  ;;  %4912 = vmatprep.subr.bf16.mxu0 %v6254_v61  ;;  %v6321_v53 = vld [vmem:[%s8516_s7 + $0x6a8] ss:$16 sps:$4 sm:$0xff]   ;;  %v6326_v61 = vld [vmem:[%s8516_s7 + $0x6c4] ss:$16 sps:$4 sm:$0xff]  }
 0x401   :  { %5076 = vmatprep.subr.bf16.mxu1 %v6257_v62  ;;  %v6329_v62 = vld [vmem:[%s8516_s7 + $0x6cc] ss:$16 sps:$4 sm:$0xff]  }
 0x403   :  { %4913 = vmatpush1.bf16.msra.mxu0 %v6252_v3  ;;  %v6324_v3 = vld [vmem:[%s8516_s7 + $0x6c0] ss:$16 sps:$4 sm:$0xff]  }
 0x404   :  { %5077 = vmatpush1.bf16.msra.mxu1 %v6255_v4  ;;  %4914 = vmatprep.subr.bf16.mxu0 %v6260_v1  ;;  %v6327_v4 = vld [vmem:[%s8516_s7 + $0x6c8] ss:$16 sps:$4 sm:$0xff]   ;;  %v6332_v1 = vld [vmem:[%s8516_s7 + $0x6e4] ss:$16 sps:$4 sm:$0xff]  }
 0x405   :  { %5078 = vmatprep.subr.bf16.mxu1 %v6263_v5  ;;  %v6335_v5 = vld [vmem:[%s8516_s7 + $0x6ec] ss:$16 sps:$4 sm:$0xff]  }
 0x407   :  { %4915 = vmatpush1.bf16.msra.mxu0 %v6258_v6  ;;  %v6330_v6 = vld [vmem:[%s8516_s7 + $0x6e0] ss:$16 sps:$4 sm:$0xff]  }
 0x408   :  { %5079 = vmatpush1.bf16.msra.mxu1 %v6261_v29  ;;  %4916 = vmatprep.subr.bf16.mxu0 %v6266_v7  ;;  %v6333_v29 = vld [vmem:[%s8516_s7 + $0x6e8] ss:$16 sps:$4 sm:$0xff]   ;;  %v6338_v7 = vld [vmem:[%s8516_s7 + $0x704] ss:$16 sps:$4 sm:$0xff]  }
 0x409   :  { %5080 = vmatprep.subr.bf16.mxu1 %v6269_v8  ;;  %v6341_v8 = vld [vmem:[%s8516_s7 + $0x70c] ss:$16 sps:$4 sm:$0xff]  }
 0x40b   :  { %4917 = vmatpush1.bf16.msra.mxu0 %v6264_v9  ;;  %v6336_v9 = vld [vmem:[%s8516_s7 + $0x700] ss:$16 sps:$4 sm:$0xff]  }
 0x40c   :  { %5081 = vmatpush1.bf16.msra.mxu1 %v6267_v10  ;;  %4918 = vmatprep.subr.bf16.mxu0 %v6272_v11  ;;  %v6339_v10 = vld [vmem:[%s8516_s7 + $0x708] ss:$16 sps:$4 sm:$0xff]   ;;  %v6344_v11 = vld [vmem:[%s8516_s7 + $0x724] ss:$16 sps:$4 sm:$0xff]  }
 0x40d   :  { %5082 = vmatprep.subr.bf16.mxu1 %v6275_v13  ;;  %v6347_v13 = vld [vmem:[%s8516_s7 + $0x72c] ss:$16 sps:$4 sm:$0xff]  }
 0x40f   :  { %4919 = vmatpush1.bf16.msra.mxu0 %v6270_v14  ;;  %v6342_v14 = vld [vmem:[%s8516_s7 + $0x720] ss:$16 sps:$4 sm:$0xff]  }
 0x410   :  { %5083 = vmatpush1.bf16.msra.mxu1 %v6273_v16  ;;  %4920 = vmatprep.subr.bf16.mxu0 %v6278_v20  ;;  %v6350_v16 = vld [vmem:[%s8516_s7 + $0x744] ss:$16 sps:$4 sm:$0xff]   ;;  %v6353_v20 = vld [vmem:[%s8516_s7 + $0x74c] ss:$16 sps:$4 sm:$0xff]  }
 0x411   :  { %5084 = vmatprep.subr.bf16.mxu1 %v6281_v18  ;;  %v6348_v18 = vld [vmem:[%s8516_s7 + $0x740] ss:$16 sps:$4 sm:$0xff]  }
 0x413   :  { %4921 = vmatpush1.bf16.msra.mxu0 %v6276_v63  ;;  %v6356_v63 = vld [vmem:[%s8516_s7 + $0x764] ss:$16 sps:$4 sm:$0xff]  }
 0x414   :  { %5085 = vmatpush1.bf16.msra.mxu1 %v6279_v26  ;;  %4922 = vmatprep.subr.bf16.mxu0 %v6284_v27  ;;  %v6354_v26 = vld [vmem:[%s8516_s7 + $0x760] ss:$16 sps:$4 sm:$0xff]   ;;  %v6357_v27 = vld [vmem:[%s8516_s7 + $0x768] ss:$16 sps:$4 sm:$0xff]  }
 0x415   :  { %5086 = vmatprep.subr.bf16.mxu1 %v6287_v2  ;;  %v6362_v2 = vld [vmem:[%s8516_s7 + $0x784] ss:$16 sps:$4 sm:$0xff]  }
 0x417   :  { %4923 = vmatpush1.bf16.msra.mxu0 %v6282_v17  ;;  %v6360_v17 = vld [vmem:[%s8516_s7 + $0x780] ss:$16 sps:$4 sm:$0xff]  }
 0x418   :  { %5087 = vmatpush1.bf16.msra.mxu1 %v6285_v31  ;;  %4933 = vmatprep.subr.bf16.mxu0 %v6290_v21  ;;  %v6368_v31 = vld [vmem:[%s8516_s7 + $0x7a4] ss:$16 sps:$4 sm:$0xff]   ;;  %v6371_v21 = vld [vmem:[%s8516_s7 + $0x7ac] ss:$16 sps:$4 sm:$0xff]  }
 0x419   :  { %5097 = vmatprep.subr.bf16.mxu1 %v6293_v23  ;;  %v6366_v23 = vld [vmem:[%s8516_s7 + $0x7a0] ss:$16 sps:$4 sm:$0xff]  }
 0x41a   :  { %4925 = vmatmul.mubr.bf16.vlgmr.msra.gmra.mrb[24].mxu0 %v3248_v34 }
 0x41b   :  { %5089 = vmatmul.mubr.bf16.vlgmr.msra.gmra.mrb[24].mxu1 %v3248_v34  ;;  %4934 = vmatpush1.bf16.msra.mxu0 %v6288_v33  ;;  %v6369_v33 = vld [vmem:[%s8516_s7 + $0x7a8] ss:$16 sps:$4 sm:$0xff]   ;;  %v6374_v34 = vld [vmem:[%s8516_s7 + $0x7c4] ss:$16 sps:$4 sm:$0xff]  }
 0x41c   :  { %4965 = vmatprep.mubr.bf16.mxu0 %v3251_v37  ;;  %5098 = vmatpush1.bf16.msra.mxu1 %v6291_v35  ;;  %v6377_v35 = vld [vmem:[%s8516_s7 + $0x7cc] ss:$16 sps:$4 sm:$0xff]  }
 0x41d   :  { %5129 = vmatprep.mubr.bf16.mxu1 %v3251_v37  ;;  %4935 = vmatprep.subr.bf16.mxu0 %v6296_v36  ;;  %v6380_v36 = vld [vmem:[%s8516_s7 + $0x7e4] ss:$16 sps:$4 sm:$0xff]   ;;  %v6383_v37 = vld [vmem:[%s8516_s7 + $0x7ec] ss:$16 sps:$4 sm:$0xff]  }
 0x41e   :  { %5099 = vmatprep.subr.bf16.mxu1 %v6299_v38  ;;  %v3242_v38 = vmax.f32 %v3230_v0, 0.0 }
 0x41f   :  { %4936 = vmatpush1.bf16.msra.mxu0 %v6294_v39  ;;  %v6381_v39 = vld [vmem:[%s8516_s7 + $0x7e8] ss:$16 sps:$4 sm:$0xff]  }
 0x420   :  { %5100 = vmatpush1.bf16.msra.mxu1 %v6297_v40  ;;  %4937 = vmatprep.subr.bf16.mxu0 %v6302_v41  ;;  %v3250_v40 = vpack.c.bf16 %v3242_v38, %v3242_v38  ;;  %v3508_v41 = vld [vmem:[%s8519_s8] sm:$0xf] }
 0x421   :  { %5101 = vmatprep.subr.bf16.mxu1 %v6305_v42  ;;  %v3513_v42 = vrot.slane %v3508_v41, %v7349_v55 }
 0x423   :  { %4938 = vmatpush1.bf16.msra.mxu0 %v6300_v43  ;;  %v3521_v43 = vrot.slane %v3508_v41, %v7357_v58 }
 0x424   :  { %5102 = vmatpush1.bf16.msra.mxu1 %v6303_v44  ;;  %4939 = vmatprep.subr.bf16.mxu0 %v6308_v12  ;;  %v3517_v44 = vrot.slane %v3508_v41, %v7360_v59  ;;  %v3525_v12 = vrot.slane %v3508_v41, %v7363_v60 }
 0x425   :  { %5103 = vmatprep.subr.bf16.mxu1 %v6311_v45 }
 0x427   :  { %4940 = vmatpush1.bf16.msra.mxu0 %v6306_v46 }
 0x428   :  { %5104 = vmatpush1.bf16.msra.mxu1 %v6309_v57  ;;  %4941 = vmatprep.subr.bf16.mxu0 %v6314_v47 }
 0x429   :  { %5105 = vmatprep.subr.bf16.mxu1 %v6317_v48 }
 0x42b   :  { %4942 = vmatpush1.bf16.msra.mxu0 %v6312_v49 }
 0x42c   :  { %5106 = vmatpush1.bf16.msra.mxu1 %v6315_v50  ;;  %4943 = vmatprep.subr.bf16.mxu0 %v6320_v22 }
 0x42d   :  { %5107 = vmatprep.subr.bf16.mxu1 %v6323_v51 }
 0x42f   :  { %4944 = vmatpush1.bf16.msra.mxu0 %v6318_v52 }
 0x430   :  { %5108 = vmatpush1.bf16.msra.mxu1 %v6321_v53  ;;  %4945 = vmatprep.subr.bf16.mxu0 %v6326_v61 }
 0x431   :  { %5109 = vmatprep.subr.bf16.mxu1 %v6329_v62 }
 0x433   :  { %4946 = vmatpush1.bf16.msra.mxu0 %v6324_v3 }
 0x434   :  { %5110 = vmatpush1.bf16.msra.mxu1 %v6327_v4  ;;  %4947 = vmatprep.subr.bf16.mxu0 %v6332_v1 }
 0x435   :  { %5111 = vmatprep.subr.bf16.mxu1 %v6335_v5 }
 0x437   :  { %4948 = vmatpush1.bf16.msra.mxu0 %v6330_v6 }
 0x438   :  { %5112 = vmatpush1.bf16.msra.mxu1 %v6333_v29  ;;  %4949 = vmatprep.subr.bf16.mxu0 %v6338_v7 }
 0x439   :  { %5113 = vmatprep.subr.bf16.mxu1 %v6341_v8 }
 0x43b   :  { %4950 = vmatpush1.bf16.msra.mxu0 %v6336_v9 }
 0x43c   :  { %5114 = vmatpush1.bf16.msra.mxu1 %v6339_v10  ;;  %4951 = vmatprep.subr.bf16.mxu0 %v6344_v11 }
 0x43d   :  { %5115 = vmatprep.subr.bf16.mxu1 %v6347_v13 }
 0x43f   :  { %4952 = vmatpush1.bf16.msra.mxu0 %v6342_v14 }
 0x440   :  { %5116 = vmatpush1.bf16.msra.mxu1 %v6345_v15  ;;  %4953 = vmatprep.subr.bf16.mxu0 %v6350_v16 }
 0x441   :  { %5117 = vmatprep.subr.bf16.mxu1 %v6353_v20 }
 0x443   :  { %4954 = vmatpush1.bf16.msra.mxu0 %v6348_v18 }
 0x444   :  { %5118 = vmatpush1.bf16.msra.mxu1 %v6351_v24  ;;  %4955 = vmatprep.subr.bf16.mxu0 %v6356_v63 }
 0x445   :  { %5119 = vmatprep.subr.bf16.mxu1 %v6359_v56 }
 0x447   :  { %4956 = vmatpush1.bf16.msra.mxu0 %v6354_v26 }
 0x448   :  { %5120 = vmatpush1.bf16.msra.mxu1 %v6357_v27  ;;  %4957 = vmatprep.subr.bf16.mxu0 %v6362_v2 }
 0x449   :  { %5121 = vmatprep.subr.bf16.mxu1 %v6365_v28 }
 0x44b   :  { %4958 = vmatpush1.bf16.msra.mxu0 %v6360_v17 }
 0x44c   :  { %5122 = vmatpush1.bf16.msra.mxu1 %v6363_v30  ;;  %4959 = vmatprep.subr.bf16.mxu0 %v6368_v31 }
 0x44d   :  { %5123 = vmatprep.subr.bf16.mxu1 %v6371_v21 }
 0x44f   :  { %4960 = vmatpush1.bf16.msra.mxu0 %v6366_v23 }
 0x450   :  { %5124 = vmatpush1.bf16.msra.mxu1 %v6369_v33  ;;  %4961 = vmatprep.subr.bf16.mxu0 %v6374_v34 }
 0x451   :  { %5125 = vmatprep.subr.bf16.mxu1 %v6377_v35 }
 0x453   :  { %4962 = vmatpush1.bf16.msra.mxu0 %v6372_v54 }
 0x454   :  { %5126 = vmatpush1.bf16.msra.mxu1 %v6375_v25  ;;  %4963 = vmatprep.subr.bf16.mxu0 %v6380_v36 }
 0x455   :  { %5127 = vmatprep.subr.bf16.mxu1 %v6383_v37 }
 0x457   :  { %4964 = vmatpush1.bf16.msra.mxu0 %v6378_v19 }
 0x458   :  { %5128 = vmatpush1.bf16.msra.mxu1 %v6381_v39 }
 0x45a   :  { %4966 = vmatmul.mubr.bf16.vlgmr.msra.gmra.mrb[24].mxu0 %v3250_v40 }
 0x45b   :  { %5130 = vmatmul.mubr.bf16.vlgmr.msra.gmra.mrb[24].mxu1 %v3250_v40 }
 0x52d   :  { %v4967_v45 = vpop.f32.mrb[24].mxu0 }
 0x52e   :  { %v5891_v46 = vadd.f32 %v4967_v45, %v3513_v42  ;;  %v5131_v57 = vpop.f32.mrb[24].mxu1  ;;  %v4969_v47 = vpop.f32.mrb[25].mxu0 }
 0x52f   :  { %v5893_v48 = vadd.f32 %v5131_v57, %v3521_v43  ;;  %v5892_v49 = vadd.f32 %v4969_v47, %v3517_v44  ;;  %v5133_v50 = vpop.f32.mrb[25].mxu1  ;;  %v4971_v22 = vpop.f32.mrb[26].mxu0 }
 0x530   :  { %v5138_v51 = vmax.f32 %v5891_v46, 0.0  ;;  %v5894_v52 = vadd.f32 %v5133_v50, %v3525_v12  ;;  %v5135_v53 = vpop.f32.mrb[26].mxu1  ;;  %v4972_v61 = vpop.f32.mrb[27].mxu0 }
 0x531   :  { %v5140_v62 = vmax.f32 %v5893_v48, 0.0  ;;  %v5139_v55 = vmax.f32 %v5892_v49, 0.0  ;;  %v5136_v3 = vpop.f32.mrb[27].mxu1 }
 0x532   :  { %5142 = vst [vmem:[%s8520_s10] sm:$0xff] %v5138_v51  ;;  %v5141_v58 = vmax.f32 %v5894_v52, 0.0 }
 0x533   :  { %5144 = vst [vmem:[%s8520_s10 + $0x10] sm:$0xff] %v5140_v62  ;;  %5143 = vst [vmem:[%s8520_s10 + $0x8] sm:$0xff] %v5139_v55 }
 0x534   :  { %5145 = vst [vmem:[%s8520_s10 + $0x18] sm:$0xff] %v5141_v58 }

// kernel: ae_cnn_forward.11
= control target key start
LH: loop header
LB: loop body
LE: loop exit
PB: predicated region body
PF: predicated region fallthrough
CT: control target
= control target key end

     0   :  { %s905_s1 = inlined_call_operand.vmem [shape: bf16[512,256], index: 1, kind: input, shape index: {}]   ;;  %s906_s0 = inlined_call_operand.vmem [shape: f32[8,512], index: 0, kind: input, shape index: {}]   ;;  %s907_s2 = inlined_call_operand.vmem [shape: f32[1,256], index: 2, kind: input, shape index: {}]   ;;  %s908_s3 = inlined_call_operand.vmem [shape: f32[8,256], index: 3, kind: output, shape index: {}]  }
   0x1   :  { %v576_v0 = vld [vmem:[%s905_s1 + $0x4] ss:$8 sps:$4 sm:$0xff]   ;;  %v580_v2 = vld [vmem:[%s905_s1] ss:$8 sps:$4 sm:$0xff]   ;;  %v582_v4 = vld [vmem:[%s905_s1 + $0x14] ss:$8 sps:$4 sm:$0xff]  }
   0x2   :  { %v578_v1 = vld [vmem:[%s905_s1 + $0x104] ss:$8 sps:$4 sm:$0xff]   ;;  %418 = vmatprep.subr.bf16.mxu1 %v576_v0  ;;  %v581_v3 = vld [vmem:[%s905_s1 + $0x100] ss:$8 sps:$4 sm:$0xff]   ;;  %v584_v5 = vld [vmem:[%s905_s1 + $0x114] ss:$8 sps:$4 sm:$0xff]  }
   0x3   :  { %459 = vmatprep.subr.bf16.mxu0 %v578_v1  ;;  %419 = vmatpush1.bf16.msra.mxu1 %v580_v2  ;;  %v586_v6 = vld [vmem:[%s905_s1 + $0x10] ss:$8 sps:$4 sm:$0xff]   ;;  %v588_v8 = vld [vmem:[%s905_s1 + $0x24] ss:$8 sps:$4 sm:$0xff]   ;;  %v592_v10 = vld [vmem:[%s905_s1 + $0x20] ss:$8 sps:$4 sm:$0xff]  }
   0x4   :  { %460 = vmatpush1.bf16.msra.mxu0 %v581_v3  ;;  %420 = vmatprep.subr.bf16.mxu1 %v582_v4  ;;  %v587_v7 = vld [vmem:[%s905_s1 + $0x110] ss:$8 sps:$4 sm:$0xff]   ;;  %v590_v9 = vld [vmem:[%s905_s1 + $0x124] ss:$8 sps:$4 sm:$0xff]   ;;  %v593_v11 = vld [vmem:[%s905_s1 + $0x120] ss:$8 sps:$4 sm:$0xff]  }
   0x5   :  { %461 = vmatprep.subr.bf16.mxu0 %v584_v5  ;;  %v594_v12 = vld [vmem:[%s905_s1 + $0x34] ss:$8 sps:$4 sm:$0xff]   ;;  %v598_v14 = vld [vmem:[%s905_s1 + $0x30] ss:$8 sps:$4 sm:$0xff]   ;;  %v600_v16 = vld [vmem:[%s905_s1 + $0x44] ss:$8 sps:$4 sm:$0xff]  }
   0x6   :  { %v596_v13 = vld [vmem:[%s905_s1 + $0x134] ss:$8 sps:$4 sm:$0xff]   ;;  %v599_v15 = vld [vmem:[%s905_s1 + $0x130] ss:$8 sps:$4 sm:$0xff]   ;;  %v602_v17 = vld [vmem:[%s905_s1 + $0x144] ss:$8 sps:$4 sm:$0xff]  }
   0x7   :  { %421 = vmatpush1.bf16.msra.mxu1 %v586_v6  ;;  %v604_v18 = vld [vmem:[%s905_s1 + $0x40] ss:$8 sps:$4 sm:$0xff]   ;;  %v606_v20 = vld [vmem:[%s905_s1 + $0x54] ss:$8 sps:$4 sm:$0xff]   ;;  %v610_v22 = vld [vmem:[%s905_s1 + $0x50] ss:$8 sps:$4 sm:$0xff]  }
   0x8   :  { %462 = vmatpush1.bf16.msra.mxu0 %v587_v7  ;;  %422 = vmatprep.subr.bf16.mxu1 %v588_v8  ;;  %v605_v19 = vld [vmem:[%s905_s1 + $0x140] ss:$8 sps:$4 sm:$0xff]   ;;  %v608_v21 = vld [vmem:[%s905_s1 + $0x154] ss:$8 sps:$4 sm:$0xff]   ;;  %v611_v23 = vld [vmem:[%s905_s1 + $0x150] ss:$8 sps:$4 sm:$0xff]   ;;  %v88_v8 = vlaneseq }
   0x9   :  { %463 = vmatprep.subr.bf16.mxu0 %v590_v9  ;;  %v612_v24 = vld [vmem:[%s905_s1 + $0x64] ss:$8 sps:$4 sm:$0xff]   ;;  %v616_v26 = vld [vmem:[%s905_s1 + $0x60] ss:$8 sps:$4 sm:$0xff]   ;;  %v618_v28 = vld [vmem:[%s905_s1 + $0x74] ss:$8 sps:$4 sm:$0xff]  }
   0xa   :  { %v614_v25 = vld [vmem:[%s905_s1 + $0x164] ss:$8 sps:$4 sm:$0xff]   ;;  %v617_v27 = vld [vmem:[%s905_s1 + $0x160] ss:$8 sps:$4 sm:$0xff]   ;;  %v620_v29 = vld [vmem:[%s905_s1 + $0x174] ss:$8 sps:$4 sm:$0xff]  }
   0xb   :  { %423 = vmatpush1.bf16.msra.mxu1 %v592_v10  ;;  %v622_v30 = vld [vmem:[%s905_s1 + $0x70] ss:$8 sps:$4 sm:$0xff]   ;;  %v624_v32 = vld [vmem:[%s905_s1 + $0x84] ss:$8 sps:$4 sm:$0xff]   ;;  %v628_v34 = vld [vmem:[%s905_s1 + $0x80] ss:$8 sps:$4 sm:$0xff]  }
   0xc   :  { %464 = vmatpush1.bf16.msra.mxu0 %v593_v11  ;;  %424 = vmatprep.subr.bf16.mxu1 %v594_v12  ;;  %v623_v31 = vld [vmem:[%s905_s1 + $0x170] ss:$8 sps:$4 sm:$0xff]   ;;  %v626_v33 = vld [vmem:[%s905_s1 + $0x184] ss:$8 sps:$4 sm:$0xff]   ;;  %v629_v35 = vld [vmem:[%s905_s1 + $0x180] ss:$8 sps:$4 sm:$0xff]  }
   0xd   :  { %465 = vmatprep.subr.bf16.mxu0 %v596_v13  ;;  %v630_v36 = vld [vmem:[%s905_s1 + $0x94] ss:$8 sps:$4 sm:$0xff]   ;;  %v634_v38 = vld [vmem:[%s905_s1 + $0x90] ss:$8 sps:$4 sm:$0xff]   ;;  %v636_v40 = vld [vmem:[%s905_s1 + $0xa4] ss:$8 sps:$4 sm:$0xff]  }
   0xe   :  { %v632_v37 = vld [vmem:[%s905_s1 + $0x194] ss:$8 sps:$4 sm:$0xff]   ;;  %v635_v39 = vld [vmem:[%s905_s1 + $0x190] ss:$8 sps:$4 sm:$0xff]   ;;  %v638_v41 = vld [vmem:[%s905_s1 + $0x1a4] ss:$8 sps:$4 sm:$0xff]  }
   0xf   :  { %425 = vmatpush1.bf16.msra.mxu1 %v598_v14  ;;  %v640_v42 = vld [vmem:[%s905_s1 + $0xa0] ss:$8 sps:$4 sm:$0xff]   ;;  %v642_v44 = vld [vmem:[%s905_s1 + $0xb4] ss:$8 sps:$4 sm:$0xff]   ;;  %v646_v49 = vld [vmem:[%s905_s1 + $0xb0] ss:$8 sps:$4 sm:$0xff]  }
  0x10   :  { %466 = vmatpush1.bf16.msra.mxu0 %v599_v15  ;;  %426 = vmatprep.subr.bf16.mxu1 %v600_v16  ;;  %v641_v43 = vld [vmem:[%s905_s1 + $0x1a0] ss:$8 sps:$4 sm:$0xff]   ;;  %v644_v45 = vld [vmem:[%s905_s1 + $0x1b4] ss:$8 sps:$4 sm:$0xff]   ;;  %v647_v50 = vld [vmem:[%s905_s1 + $0x1b0] ss:$8 sps:$4 sm:$0xff]  }
  0x11   :  { %467 = vmatprep.subr.bf16.mxu0 %v602_v17  ;;  %v15_v46 = vld [vmem:[%s906_s0 + $0x8] sm:$0xff]  ;;  %v17_v48 = vld [vmem:[%s906_s0 + $0x18] sm:$0xff]  ;;  %v14_v4 = vld [vmem:[%s906_s0] sm:$0xff]  ;;  %v89_v9 = vshrl.u32 %v88_v8, 7 }
  0x12   :  { %v19_v47 = vpack.c.bf16 %v15_v46, %v15_v46  ;;  %v21_v51 = vpack.c.bf16 %v17_v48, %v17_v48  ;;  %v648_v52 = vld [vmem:[%s905_s1 + $0xc4] ss:$8 sps:$4 sm:$0xff]   ;;  %v652_v54 = vld [vmem:[%s905_s1 + $0xc0] ss:$8 sps:$4 sm:$0xff]   ;;  %v654_v56 = vld [vmem:[%s905_s1 + $0xd4] ss:$8 sps:$4 sm:$0xff]   ;;  %v18_v6 = vpack.c.bf16 %v14_v4, %v14_v4 }
  0x13   :  { %427 = vmatpush1.bf16.msra.mxu1 %v604_v18  ;;  %v650_v53 = vld [vmem:[%s905_s1 + $0x1c4] ss:$8 sps:$4 sm:$0xff]   ;;  %v653_v55 = vld [vmem:[%s905_s1 + $0x1c0] ss:$8 sps:$4 sm:$0xff]   ;;  %v656_v57 = vld [vmem:[%s905_s1 + $0x1d4] ss:$8 sps:$4 sm:$0xff]  }
  0x14   :  { %468 = vmatpush1.bf16.msra.mxu0 %v605_v19  ;;  %428 = vmatprep.subr.bf16.mxu1 %v606_v20  ;;  %v658_v58 = vld [vmem:[%s905_s1 + $0xd0] ss:$8 sps:$4 sm:$0xff]   ;;  %v660_v60 = vld [vmem:[%s905_s1 + $0xe4] ss:$8 sps:$4 sm:$0xff]   ;;  %v664_v62 = vld [vmem:[%s905_s1 + $0xe0] ss:$8 sps:$4 sm:$0xff]  }
  0x15   :  { %469 = vmatprep.subr.bf16.mxu0 %v608_v21  ;;  %450 = vmatprep.mubr.bf16.mxu1 %v19_v47  ;;  %v659_v59 = vld [vmem:[%s905_s1 + $0x1d0] ss:$8 sps:$4 sm:$0xff]   ;;  %v662_v61 = vld [vmem:[%s905_s1 + $0x1e4] ss:$8 sps:$4 sm:$0xff]   ;;  %v665_v63 = vld [vmem:[%s905_s1 + $0x1e0] ss:$8 sps:$4 sm:$0xff]  }
  0x16   :  { %491 = vmatprep.mubr.bf16.mxu0 %v21_v51  ;;  %v666_v0 = vld [vmem:[%s905_s1 + $0xf4] ss:$8 sps:$4 sm:$0xff]   ;;  %v670_v2 = vld [vmem:[%s905_s1 + $0xf0] ss:$8 sps:$4 sm:$0xff]   ;;  %v90_v10 = vsub.s32 0, %v89_v9  ;;  %v94_v12 = vsub.s32 1, %v89_v9 }
  0x17   :  { %429 = vmatpush1.bf16.msra.mxu1 %v610_v22  ;;  %v668_v1 = vld [vmem:[%s905_s1 + $0x1f4] ss:$8 sps:$4 sm:$0xff]   ;;  %v671_v3 = vld [vmem:[%s905_s1 + $0x1f0] ss:$8 sps:$4 sm:$0xff]   ;;  %v86_v11 = vld [vmem:[%s907_s2] sm:$0x3] }
  0x18   :  { %470 = vmatpush1.bf16.msra.mxu0 %v611_v23  ;;  %430 = vmatprep.subr.bf16.mxu1 %v612_v24  ;;  %v16_v5 = vld [vmem:[%s906_s0 + $0x10] sm:$0xff]  ;;  %v91_v13 = vrot.slane %v86_v11, %v90_v10  ;;  %v95_v14 = vrot.slane %v86_v11, %v94_v12 }
  0x19   :  { %471 = vmatprep.subr.bf16.mxu0 %v614_v25  ;;  %v20_v7 = vpack.c.bf16 %v16_v5, %v16_v5 }
  0x1b   :  { %431 = vmatpush1.bf16.msra.mxu1 %v616_v26 }
  0x1c   :  { %472 = vmatpush1.bf16.msra.mxu0 %v617_v27  ;;  %432 = vmatprep.subr.bf16.mxu1 %v618_v28 }
  0x1d   :  { %473 = vmatprep.subr.bf16.mxu0 %v620_v29 }
  0x1f   :  { %433 = vmatpush1.bf16.msra.mxu1 %v622_v30 }
  0x20   :  { %474 = vmatpush1.bf16.msra.mxu0 %v623_v31  ;;  %434 = vmatprep.subr.bf16.mxu1 %v624_v32 }
  0x21   :  { %475 = vmatprep.subr.bf16.mxu0 %v626_v33 }
  0x23   :  { %435 = vmatpush1.bf16.msra.mxu1 %v628_v34 }
  0x24   :  { %476 = vmatpush1.bf16.msra.mxu0 %v629_v35  ;;  %436 = vmatprep.subr.bf16.mxu1 %v630_v36 }
  0x25   :  { %477 = vmatprep.subr.bf16.mxu0 %v632_v37 }
  0x27   :  { %437 = vmatpush1.bf16.msra.mxu1 %v634_v38 }
  0x28   :  { %478 = vmatpush1.bf16.msra.mxu0 %v635_v39  ;;  %438 = vmatprep.subr.bf16.mxu1 %v636_v40 }
  0x29   :  { %479 = vmatprep.subr.bf16.mxu0 %v638_v41 }
  0x2b   :  { %439 = vmatpush1.bf16.msra.mxu1 %v640_v42 }
  0x2c   :  { %480 = vmatpush1.bf16.msra.mxu0 %v641_v43  ;;  %440 = vmatprep.subr.bf16.mxu1 %v642_v44 }
  0x2d   :  { %481 = vmatprep.subr.bf16.mxu0 %v644_v45 }
  0x2f   :  { %441 = vmatpush1.bf16.msra.mxu1 %v646_v49 }
  0x30   :  { %482 = vmatpush1.bf16.msra.mxu0 %v647_v50  ;;  %442 = vmatprep.subr.bf16.mxu1 %v648_v52 }
  0x31   :  { %483 = vmatprep.subr.bf16.mxu0 %v650_v53 }
  0x33   :  { %443 = vmatpush1.bf16.msra.mxu1 %v652_v54 }
  0x34   :  { %484 = vmatpush1.bf16.msra.mxu0 %v653_v55  ;;  %444 = vmatprep.subr.bf16.mxu1 %v654_v56 }
  0x35   :  { %485 = vmatprep.subr.bf16.mxu0 %v656_v57 }
  0x37   :  { %445 = vmatpush1.bf16.msra.mxu1 %v658_v58 }
  0x38   :  { %486 = vmatpush1.bf16.msra.mxu0 %v659_v59  ;;  %446 = vmatprep.subr.bf16.mxu1 %v660_v60 }
  0x39   :  { %487 = vmatprep.subr.bf16.mxu0 %v662_v61 }
  0x3b   :  { %447 = vmatpush1.bf16.msra.mxu1 %v664_v62 }
  0x3c   :  { %488 = vmatpush1.bf16.msra.mxu0 %v665_v63  ;;  %448 = vmatprep.subr.bf16.mxu1 %v666_v0 }
  0x3d   :  { %489 = vmatprep.subr.bf16.mxu0 %v668_v1 }
  0x3f   :  { %449 = vmatpush1.bf16.msra.mxu1 %v670_v2 }
  0x40   :  { %490 = vmatpush1.bf16.msra.mxu0 %v671_v3 }
  0x42   :  { %451 = vmatmul.mubr.bf16.vlgmr.msra.gmra.mrb[0].mxu1 %v18_v6 }
  0x43   :  { %492 = vmatmul.mubr.bf16.vlgmr.msra.gmra.mrb[0].mxu0 %v20_v7 }
 0x115   :  { %v452_v15 = vpop.f32.mrb[0].mxu1 }
 0x116   :  { %v493_v16 = vpop.f32.mrb[0].mxu0  ;;  %v453_v17 = vadd.f32 %v452_v15, %v91_v13  ;;  %v454_v18 = vpop.f32.mrb[1].mxu1 }
 0x117   :  { %v495_v19 = vpop.f32.mrb[1].mxu0  ;;  %v455_v20 = vadd.f32 %v454_v18, %v95_v14  ;;  %v456_v21 = vpop.f32.mrb[2].mxu1 }
 0x118   :  { %v497_v22 = vpop.f32.mrb[2].mxu0  ;;  %v494_v23 = vadd.f32 %v493_v16, %v453_v17  ;;  %v457_v24 = vpop.f32.mrb[3].mxu1 }
 0x119   :  { %v498_v25 = vpop.f32.mrb[3].mxu0  ;;  %v496_v26 = vadd.f32 %v495_v19, %v455_v20 }
 0x11a   :  { %v500_v27 = vmax.f32 %v494_v23, 0.0 }
 0x11b   :  { %v501_v28 = vmax.f32 %v496_v26, 0.0 }
 0x11c   :  { %502 = vst [vmem:[%s908_s3] sm:$0xff] %v500_v27 }
 0x11d   :  { %503 = vst [vmem:[%s908_s3 + $0x8] sm:$0xff] %v501_v28 }

// kernel: tile.23
= control target key start
LH: loop header
LB: loop body
LE: loop exit
PB: predicated region body
PF: predicated region fallthrough
CT: control target
= control target key end

     0   :  { %s22_s0 = inlined_call_operand.vmem [shape: f32[32], index: 0, kind: input, shape index: {}]   ;;  %s23_s1 = inlined_call_operand.vmem [shape: f32[4,32], index: 1, kind: output, shape index: {}]  }
   0x1   :  { %v4_v0 = vld [vmem:[%s22_s0] ss:$0 sm:$0xff] }
   0x2   :  { %5 = vst [vmem:[%s23_s1] sm:$0xf] %v4_v0 }

// kernel: tile.24
= control target key start
LH: loop header
LB: loop body
LE: loop exit
PB: predicated region body
PF: predicated region fallthrough
CT: control target
= control target key end

     0   :  { %vm7_vm0 = vcmask 261120   ;;  %s37_s8 = smov 32   ;;  %s38_s9 = smov 64   ;;  %vm13_vm1 = vcmask 1048320   ;;  %vm19_vm2 = vcmask 785920   ;;  %vm25_vm3 = vcmask 523520   ;;  %s55_s0 = inlined_call_operand.vmem [shape: f32[4,32], index: 0, kind: input, shape index: {}]   ;;  %s56_s1 = inlined_call_operand.vmem [shape: f32[1,128], index: 1, kind: output, shape index: {}]  }
   0x1   :  { %v4_v0 = vld [vmem:[%s55_s0] sm:$0xf]  ;;  %s36_s0 = smov 96  }
   0x2   :  { %5 = vst [vmem:[#allocation1] sm:$0xf] %v4_v0 }
   0x9   :  { %v10_v1 = vld [vmem:[#allocation1 + $0x3] sm:$0x1]   ;;  %v22_v2 = vld [vmem:[#allocation1 + $0x1] sm:$0x1]   ;;  %v6_v3 = vld [vmem:[#allocation1] sm:$0x1]  }
   0xa   :  { %11 = vrot.lane.b32.xlu0 %v10_v1, %s36_s0  ;;  %23 = vrot.lane.b32.xlu1 %v22_v2, %s37_s8  ;;  %v16_v4 = vld [vmem:[#allocation1 + $0x2] sm:$0x1]   ;;  %8 = vst.msk [vmem:[#allocation0] sm:$0x1] %vm7_vm0, %v6_v3  }
   0xe   :  { %17 = vrot.lane.b32.xlu0 %v16_v4, %s38_s9 }
  0x7c   :  { %v12_v5 = vpop.permute.xlu0 %11   ;;  %v24_v6 = vpop.permute.xlu1 %23  }
  0x7d   :  { %14 = vst.msk [vmem:[#allocation0] sm:$0x1] %vm13_vm1, %v12_v5  }
  0x80   :  { %v18_v7 = vpop.permute.xlu0 %17  }
  0x81   :  { %20 = vst.msk [vmem:[#allocation0] sm:$0x1] %vm19_vm2, %v18_v7  }
  0x82   :  { %26 = vst.msk [vmem:[#allocation0] sm:$0x1] %vm25_vm3, %v24_v6  }
  0x89   :  { %v30_v8 = vld [vmem:[#allocation0] sm:$0x1] }
  0x8a   :  { %32 = vst [vmem:[%s56_s1] sm:$0x1] %v30_v8 }

// kernel: tile.28
= control target key start
LH: loop header
LB: loop body
LE: loop exit
PB: predicated region body
PF: predicated region fallthrough
CT: control target
= control target key end

     0   :  { %s22_s0 = inlined_call_operand.vmem [shape: f32[4], index: 0, kind: input, shape index: {}]   ;;  %s23_s1 = inlined_call_operand.vmem [shape: f32[4,4], index: 1, kind: output, shape index: {}]  }
   0x1   :  { %v4_v0 = vld [vmem:[%s22_s0] ss:$0 sm:$0xff] }
   0x2   :  { %5 = vst [vmem:[%s23_s1] sm:$0xf] %v4_v0 }

// kernel: tile.29
= control target key start
LH: loop header
LB: loop body
LE: loop exit
PB: predicated region body
PF: predicated region fallthrough
CT: control target
= control target key end

     0   :  { %vm7_vm0 = vcmask 31744   ;;  %s37_s8 = smov 4   ;;  %s38_s9 = smov 8   ;;  %vm13_vm1 = vcmask 130144   ;;  %vm19_vm2 = vcmask 97344   ;;  %vm25_vm3 = vcmask 64544   ;;  %s55_s0 = inlined_call_operand.vmem [shape: f32[4,4], index: 0, kind: input, shape index: {}]   ;;  %s56_s1 = inlined_call_operand.vmem [shape: f32[16], index: 1, kind: output, shape index: {}]  }
   0x1   :  { %v4_v0 = vld [vmem:[%s55_s0] sm:$0xf]  ;;  %s36_s0 = smov 12  }
   0x2   :  { %5 = vst [vmem:[#allocation1] sm:$0xf] %v4_v0 }
   0x9   :  { %v10_v1 = vld [vmem:[#allocation1 + $0x3] sm:$0x1]   ;;  %v22_v2 = vld [vmem:[#allocation1 + $0x1] sm:$0x1]   ;;  %v6_v3 = vld [vmem:[#allocation1] sm:$0x1]  }
   0xa   :  { %11 = vrot.lane.b32.xlu0 %v10_v1, %s36_s0  ;;  %23 = vrot.lane.b32.xlu1 %v22_v2, %s37_s8  ;;  %v16_v4 = vld [vmem:[#allocation1 + $0x2] sm:$0x1]   ;;  %8 = vst.msk [vmem:[#allocation0] sm:$0x1] %vm7_vm0, %v6_v3  }
   0xe   :  { %17 = vrot.lane.b32.xlu0 %v16_v4, %s38_s9 }
  0x7c   :  { %v12_v5 = vpop.permute.xlu0 %11   ;;  %v24_v6 = vpop.permute.xlu1 %23  }
  0x7d   :  { %14 = vst.msk [vmem:[#allocation0] sm:$0x1] %vm13_vm1, %v12_v5  }
  0x80   :  { %v18_v7 = vpop.permute.xlu0 %17  }
  0x81   :  { %20 = vst.msk [vmem:[#allocation0] sm:$0x1] %vm19_vm2, %v18_v7  }
  0x82   :  { %26 = vst.msk [vmem:[#allocation0] sm:$0x1] %vm25_vm3, %v24_v6  }
  0x89   :  { %v30_v8 = vld [vmem:[#allocation0] sm:$0x1] }
  0x8a   :  { %32 = vst [vmem:[%s56_s1] sm:$0x1] %v30_v8 }

// kernel: ae_cnn_forward.12
= control target key start
LH: loop header
LB: loop body
LE: loop exit
PB: predicated region body
PF: predicated region fallthrough
CT: control target
= control target key end

     0   :  { %s407_s1 = inlined_call_operand.vmem [shape: bf16[256,128], index: 1, kind: input, shape index: {}]   ;;  %s408_s0 = inlined_call_operand.vmem [shape: f32[32,256], index: 0, kind: input, shape index: {}]   ;;  %s409_s2 = inlined_call_operand.vmem [shape: f32[1,128], index: 2, kind: input, shape index: {}]   ;;  %s410_s3 = inlined_call_operand.vmem [shape: f32[32,128], index: 3, kind: output, shape index: {}]  }
   0x1   :  { %v284_v0 = vld [vmem:[%s407_s1 + $0x40] sm:$0xff]   ;;  %v286_v2 = vld [vmem:[%s407_s1 + $0x48] sm:$0xff]   ;;  %v288_v4 = vld [vmem:[%s407_s1 + $0x50] sm:$0xff]  }
   0x2   :  { %v285_v1 = vld [vmem:[%s407_s1] sm:$0xff]   ;;  %240 = vmatprep.subr.bf16.mxu0 %v284_v0  ;;  %268 = vmatprep.subr.bf16.mxu1 %v284_v0  ;;  %v287_v3 = vld [vmem:[%s407_s1 + $0x8] sm:$0xff]   ;;  %v289_v5 = vld [vmem:[%s407_s1 + $0x10] sm:$0xff]  }
   0x3   :  { %241 = vmatpush3.bf16.msra.mxu0 %v285_v1  ;;  %276 = vmatpush3.bf16.msra.mxu1 %v285_v1  ;;  %v290_v6 = vld [vmem:[%s407_s1 + $0x58] sm:$0xff]   ;;  %v292_v8 = vld [vmem:[%s407_s1 + $0x60] sm:$0xff]   ;;  %v294_v10 = vld [vmem:[%s407_s1 + $0x68] sm:$0xff]  }
   0x4   :  { %242 = vmatprep.subr.bf16.mxu0 %v286_v2  ;;  %269 = vmatprep.subr.bf16.mxu1 %v286_v2  ;;  %v291_v7 = vld [vmem:[%s407_s1 + $0x18] sm:$0xff]   ;;  %v293_v9 = vld [vmem:[%s407_s1 + $0x20] sm:$0xff]   ;;  %v16_v11 = vld [vmem:[%s408_s0 + $0x8] sm:$0xff] }
   0x5   :  { %v18_v12 = vld [vmem:[%s408_s0 + $0x18] sm:$0xff]  ;;  %v20_v13 = vld [vmem:[%s408_s0 + $0x28] sm:$0xff]  ;;  %v296_v18 = vld [vmem:[%s407_s1 + $0x70] sm:$0xff]  }
   0x6   :  { %v24_v14 = vpack.c.bf16 %v18_v12, %v16_v11  ;;  %v22_v15 = vld [vmem:[%s408_s0 + $0x38] sm:$0xff]  ;;  %v295_v17 = vld [vmem:[%s407_s1 + $0x28] sm:$0xff]   ;;  %v297_v19 = vld [vmem:[%s407_s1 + $0x30] sm:$0xff]  }
   0x7   :  { %243 = vmatpush3.bf16.msra.mxu0 %v287_v3  ;;  %277 = vmatpush3.bf16.msra.mxu1 %v287_v3  ;;  %v26_v16 = vpack.c.bf16 %v22_v15, %v20_v13  ;;  %v298_v20 = vld [vmem:[%s407_s1 + $0x78] sm:$0xff]   ;;  %v15_v22 = vld [vmem:[%s408_s0] sm:$0xff]  ;;  %v17_v23 = vld [vmem:[%s408_s0 + $0x10] sm:$0xff] }
   0x8   :  { %244 = vmatprep.subr.bf16.mxu0 %v288_v4  ;;  %270 = vmatprep.subr.bf16.mxu1 %v288_v4  ;;  %v299_v21 = vld [vmem:[%s407_s1 + $0x38] sm:$0xff]   ;;  %v19_v24 = vld [vmem:[%s408_s0 + $0x20] sm:$0xff]  ;;  %v21_v25 = vld [vmem:[%s408_s0 + $0x30] sm:$0xff]  ;;  %v23_v26 = vpack.c.bf16 %v17_v23, %v15_v22 }
   0x9   :  { %194 = vmatprep.mubr.bf16.mxu0 %v24_v14  ;;  %202 = vmatprep.mubr.bf16.mxu1 %v26_v16  ;;  %v25_v27 = vpack.c.bf16 %v21_v25, %v19_v24  ;;  %v223_v30 = vld [vmem:[%s409_s2] ss:$0 sm:$0xff] }
   0xb   :  { %245 = vmatpush3.bf16.msra.mxu0 %v289_v5  ;;  %278 = vmatpush3.bf16.msra.mxu1 %v289_v5 }
   0xc   :  { %246 = vmatprep.subr.bf16.mxu0 %v290_v6  ;;  %271 = vmatprep.subr.bf16.mxu1 %v290_v6 }
   0xf   :  { %247 = vmatpush3.bf16.msra.mxu0 %v291_v7  ;;  %279 = vmatpush3.bf16.msra.mxu1 %v291_v7 }
  0x10   :  { %248 = vmatprep.subr.bf16.mxu0 %v292_v8  ;;  %272 = vmatprep.subr.bf16.mxu1 %v292_v8 }
  0x13   :  { %249 = vmatpush3.bf16.msra.mxu0 %v293_v9  ;;  %280 = vmatpush3.bf16.msra.mxu1 %v293_v9 }
  0x14   :  { %250 = vmatprep.subr.bf16.mxu0 %v294_v10  ;;  %273 = vmatprep.subr.bf16.mxu1 %v294_v10 }
  0x17   :  { %251 = vmatpush3.bf16.msra.mxu0 %v295_v17  ;;  %281 = vmatpush3.bf16.msra.mxu1 %v295_v17 }
  0x18   :  { %252 = vmatprep.subr.bf16.mxu0 %v296_v18  ;;  %274 = vmatprep.subr.bf16.mxu1 %v296_v18 }
  0x1b   :  { %253 = vmatpush3.bf16.msra.mxu0 %v297_v19  ;;  %282 = vmatpush3.bf16.msra.mxu1 %v297_v19 }
  0x1c   :  { %254 = vmatprep.subr.bf16.mxu0 %v298_v20  ;;  %275 = vmatprep.subr.bf16.mxu1 %v298_v20 }
  0x1f   :  { %255 = vmatpush3.bf16.msra.mxu0 %v299_v21  ;;  %283 = vmatpush3.bf16.msra.mxu1 %v299_v21 }
  0x22   :  { %195 = vmatmul.mubr.bf16.vlgmr.msra.gmra.mrb[0].mxu0 %v23_v26  ;;  %203 = vmatmul.mubr.bf16.vlgmr.msra.gmra.mrb[0].mxu1 %v25_v27 }
  0xf5   :  { %v256_v28 = vpop.f32.mrb[0].mxu0  ;;  %v262_v29 = vpop.f32.mrb[0].mxu1 }
  0xf6   :  { %v257_v31 = vpop.f32.mrb[1].mxu0  ;;  %v263_v32 = vpop.f32.mrb[1].mxu1 }
  0xf7   :  { %v258_v33 = vadd.f32 %v257_v31, %v256_v28  ;;  %v264_v34 = vadd.f32 %v263_v32, %v262_v29  ;;  %v259_v35 = vpop.f32.mrb[2].mxu0  ;;  %v265_v36 = vpop.f32.mrb[2].mxu1 }
  0xf8   :  { %v260_v37 = vpop.f32.mrb[3].mxu0  ;;  %v266_v38 = vpop.f32.mrb[3].mxu1 }
  0xf9   :  { %v197_v39 = vadd.f32 %v258_v33, %v223_v30  ;;  %v205_v40 = vadd.f32 %v264_v34, %v223_v30  ;;  %v261_v41 = vadd.f32 %v260_v37, %v259_v35  ;;  %v267_v42 = vadd.f32 %v266_v38, %v265_v36 }
  0xfb   :  { %v211_v43 = vmax.f32 %v197_v39, 0.0  ;;  %v213_v44 = vmax.f32 %v205_v40, 0.0  ;;  %v200_v45 = vadd.f32 %v261_v41, %v223_v30  ;;  %v208_v46 = vadd.f32 %v267_v42, %v223_v30 }
  0xfd   :  { %215 = vst [vmem:[%s410_s3] sm:$0xff] %v211_v43  ;;  %217 = vst [vmem:[%s410_s3 + $0x10] sm:$0xff] %v213_v44  ;;  %v212_v47 = vmax.f32 %v200_v45, 0.0  ;;  %v214_v48 = vmax.f32 %v208_v46, 0.0 }
  0xff   :  { %216 = vst [vmem:[%s410_s3 + $0x8] sm:$0xff] %v212_v47  ;;  %218 = vst [vmem:[%s410_s3 + $0x18] sm:$0xff] %v214_v48 }

// kernel: ae_cnn_forward.13
= control target key start
LH: loop header
LB: loop body
LE: loop exit
PB: predicated region body
PF: predicated region fallthrough
CT: control target
= control target key end

     0   :  { %s451_s1 = inlined_call_operand.vmem [shape: bf16[128,128], index: 1, kind: input, shape index: {}]   ;;  %s452_s0 = inlined_call_operand.vmem [shape: f32[128,128], index: 0, kind: input, shape index: {}]   ;;  %s453_s2 = inlined_call_operand.vmem [shape: f32[1,128], index: 2, kind: input, shape index: {}]   ;;  %s454_s3 = inlined_call_operand.vmem [shape: f32[128,128], index: 3, kind: output, shape index: {}]  }
   0x1   :  { %v300_v0 = vld [vmem:[%s451_s1] sm:$0xff]   ;;  %v301_v1 = vld [vmem:[%s451_s1 + $0x8] sm:$0xff]   ;;  %v302_v2 = vld [vmem:[%s451_s1 + $0x10] sm:$0xff]  }
   0x2   :  { %252 = vmatprep.subr.bf16.mxu0 %v300_v0  ;;  %284 = vmatprep.subr.bf16.mxu1 %v300_v0  ;;  %v303_v3 = vld [vmem:[%s451_s1 + $0x18] sm:$0xff]   ;;  %v15_v4 = vld [vmem:[%s452_s0] sm:$0xff]  ;;  %v16_v5 = vld [vmem:[%s452_s0 + $0x8] sm:$0xff] }
   0x3   :  { %253 = vmatpush3.bf16.msra.mxu0 %v300_v0  ;;  %292 = vmatpush3.bf16.msra.mxu1 %v300_v0  ;;  %v23_v6 = vld [vmem:[%s452_s0 + $0x40] sm:$0xff]  ;;  %v31_v7 = vpack.c.bf16 %v16_v5, %v15_v4  ;;  %v24_v8 = vld [vmem:[%s452_s0 + $0x48] sm:$0xff]  ;;  %v306_v12 = vld [vmem:[%s451_s1 + $0x30] sm:$0xff]  }
   0x4   :  { %254 = vmatprep.subr.bf16.mxu0 %v301_v1  ;;  %285 = vmatprep.subr.bf16.mxu1 %v301_v1  ;;  %v35_v9 = vpack.c.bf16 %v24_v8, %v23_v6  ;;  %v304_v10 = vld [vmem:[%s451_s1 + $0x20] sm:$0xff]   ;;  %v305_v11 = vld [vmem:[%s451_s1 + $0x28] sm:$0xff]   ;;  %v307_v13 = vld [vmem:[%s451_s1 + $0x38] sm:$0xff]  }
   0x5   :  { %268 = vmatprep.mubr.bf16.mxu0 %v31_v7  ;;  %v17_v14 = vld [vmem:[%s452_s0 + $0x10] sm:$0xff]  ;;  %v18_v15 = vld [vmem:[%s452_s0 + $0x18] sm:$0xff]  ;;  %v19_v18 = vld [vmem:[%s452_s0 + $0x20] sm:$0xff] }
   0x6   :  { %276 = vmatprep.mubr.bf16.mxu1 %v35_v9  ;;  %v25_v16 = vld [vmem:[%s452_s0 + $0x50] sm:$0xff]  ;;  %v26_v17 = vld [vmem:[%s452_s0 + $0x58] sm:$0xff]  ;;  %v20_v19 = vld [vmem:[%s452_s0 + $0x28] sm:$0xff]  ;;  %v32_v22 = vpack.c.bf16 %v18_v15, %v17_v14 }
   0x7   :  { %255 = vmatpush3.bf16.msra.mxu0 %v301_v1  ;;  %293 = vmatpush3.bf16.msra.mxu1 %v301_v1  ;;  %v27_v20 = vld [vmem:[%s452_s0 + $0x60] sm:$0xff]  ;;  %v28_v21 = vld [vmem:[%s452_s0 + $0x68] sm:$0xff]  ;;  %v36_v23 = vpack.c.bf16 %v26_v17, %v25_v16  ;;  %v33_v24 = vpack.c.bf16 %v20_v19, %v19_v18  ;;  %v21_v26 = vld [vmem:[%s452_s0 + $0x30] sm:$0xff] }
   0x8   :  { %256 = vmatprep.subr.bf16.mxu0 %v302_v2  ;;  %286 = vmatprep.subr.bf16.mxu1 %v302_v2  ;;  %v37_v25 = vpack.c.bf16 %v28_v21, %v27_v20  ;;  %v22_v27 = vld [vmem:[%s452_s0 + $0x38] sm:$0xff]  ;;  %v29_v28 = vld [vmem:[%s452_s0 + $0x70] sm:$0xff]  ;;  %v227_v32 = vld [vmem:[%s453_s2] ss:$0 sm:$0xff] }
   0x9   :  { %v30_v29 = vld [vmem:[%s452_s0 + $0x78] sm:$0xff]  ;;  %v34_v30 = vpack.c.bf16 %v22_v27, %v21_v26 }
   0xa   :  { %v38_v31 = vpack.c.bf16 %v30_v29, %v29_v28 }
   0xb   :  { %257 = vmatpush3.bf16.msra.mxu0 %v302_v2  ;;  %294 = vmatpush3.bf16.msra.mxu1 %v302_v2 }
   0xc   :  { %258 = vmatprep.subr.bf16.mxu0 %v303_v3  ;;  %287 = vmatprep.subr.bf16.mxu1 %v303_v3 }
   0xf   :  { %259 = vmatpush3.bf16.msra.mxu0 %v303_v3  ;;  %295 = vmatpush3.bf16.msra.mxu1 %v303_v3 }
  0x10   :  { %260 = vmatprep.subr.bf16.mxu0 %v304_v10  ;;  %288 = vmatprep.subr.bf16.mxu1 %v304_v10 }
  0x13   :  { %261 = vmatpush3.bf16.msra.mxu0 %v304_v10  ;;  %296 = vmatpush3.bf16.msra.mxu1 %v304_v10 }
  0x14   :  { %262 = vmatprep.subr.bf16.mxu0 %v305_v11  ;;  %289 = vmatprep.subr.bf16.mxu1 %v305_v11 }
  0x17   :  { %263 = vmatpush3.bf16.msra.mxu0 %v305_v11  ;;  %297 = vmatpush3.bf16.msra.mxu1 %v305_v11 }
  0x18   :  { %264 = vmatprep.subr.bf16.mxu0 %v306_v12  ;;  %290 = vmatprep.subr.bf16.mxu1 %v306_v12 }
  0x1b   :  { %265 = vmatpush3.bf16.msra.mxu0 %v306_v12  ;;  %298 = vmatpush3.bf16.msra.mxu1 %v306_v12 }
  0x1c   :  { %266 = vmatprep.subr.bf16.mxu0 %v307_v13  ;;  %291 = vmatprep.subr.bf16.mxu1 %v307_v13 }
  0x1f   :  { %267 = vmatpush3.bf16.msra.mxu0 %v307_v13  ;;  %299 = vmatpush3.bf16.msra.mxu1 %v307_v13 }
  0x22   :  { %269 = vmatmul.mubr.bf16.vlgmr.msra.gmra.mrb[0].mxu0 %v32_v22  ;;  %277 = vmatmul.mubr.bf16.vlgmr.msra.gmra.mrb[0].mxu1 %v36_v23 }
  0x23   :  { %272 = vmatprep.mubr.bf16.mxu0 %v33_v24  ;;  %280 = vmatprep.mubr.bf16.mxu1 %v37_v25 }
  0x2a   :  { %273 = vmatmul.mubr.bf16.gmra.mrb[4].mxu0 %v34_v30  ;;  %281 = vmatmul.mubr.bf16.gmra.mrb[4].mxu1 %v38_v31 }
  0xf5   :  { %v270_v33 = vpop.f32.mrb[0].mxu0  ;;  %v278_v34 = vpop.f32.mrb[0].mxu1 }
  0xf6   :  { %v153_v35 = vadd.f32 %v270_v33, %v227_v32  ;;  %v185_v36 = vadd.f32 %v278_v34, %v227_v32  ;;  %v144_v37 = vpop.f32.mrb[1].mxu0  ;;  %v176_v38 = vpop.f32.mrb[1].mxu1 }
  0xf7   :  { %v145_v39 = vadd.f32 %v227_v32, %v144_v37  ;;  %v177_v40 = vadd.f32 %v227_v32, %v176_v38  ;;  %v271_v41 = vpop.f32.mrb[2].mxu0  ;;  %v279_v42 = vpop.f32.mrb[2].mxu1 }
  0xf8   :  { %209 = vst [vmem:[%s454_s3 + $0x10] sm:$0xff] %v153_v35  ;;  %217 = vst [vmem:[%s454_s3 + $0x50] sm:$0xff] %v185_v36  ;;  %v156_v43 = vadd.f32 %v271_v41, %v227_v32  ;;  %v188_v44 = vadd.f32 %v279_v42, %v227_v32  ;;  %v147_v45 = vpop.f32.mrb[3].mxu0  ;;  %v179_v46 = vpop.f32.mrb[3].mxu1 }
  0xf9   :  { %207 = vst [vmem:[%s454_s3] sm:$0xff] %v145_v39  ;;  %215 = vst [vmem:[%s454_s3 + $0x40] sm:$0xff] %v177_v40  ;;  %v148_v47 = vadd.f32 %v227_v32, %v147_v45  ;;  %v180_v48 = vadd.f32 %v227_v32, %v179_v46 }
  0xfa   :  { %210 = vst [vmem:[%s454_s3 + $0x18] sm:$0xff] %v156_v43  ;;  %218 = vst [vmem:[%s454_s3 + $0x58] sm:$0xff] %v188_v44 }
  0xfb   :  { %208 = vst [vmem:[%s454_s3 + $0x8] sm:$0xff] %v148_v47  ;;  %216 = vst [vmem:[%s454_s3 + $0x48] sm:$0xff] %v180_v48 }
  0xfd   :  { %v274_v49 = vpop.f32.mrb[4].mxu0  ;;  %v282_v50 = vpop.f32.mrb[4].mxu1 }
  0xfe   :  { %v169_v51 = vadd.f32 %v274_v49, %v227_v32  ;;  %v201_v52 = vadd.f32 %v282_v50, %v227_v32  ;;  %v160_v53 = vpop.f32.mrb[5].mxu0  ;;  %v192_v54 = vpop.f32.mrb[5].mxu1 }
  0xff   :  { %v161_v55 = vadd.f32 %v227_v32, %v160_v53  ;;  %v193_v56 = vadd.f32 %v227_v32, %v192_v54  ;;  %v275_v57 = vpop.f32.mrb[6].mxu0  ;;  %v283_v58 = vpop.f32.mrb[6].mxu1 }
 0x100   :  { %213 = vst [vmem:[%s454_s3 + $0x30] sm:$0xff] %v169_v51  ;;  %221 = vst [vmem:[%s454_s3 + $0x70] sm:$0xff] %v201_v52  ;;  %v172_v59 = vadd.f32 %v275_v57, %v227_v32  ;;  %v204_v60 = vadd.f32 %v283_v58, %v227_v32  ;;  %v163_v61 = vpop.f32.mrb[7].mxu0  ;;  %v195_v62 = vpop.f32.mrb[7].mxu1 }
 0x101   :  { %211 = vst [vmem:[%s454_s3 + $0x20] sm:$0xff] %v161_v55  ;;  %219 = vst [vmem:[%s454_s3 + $0x60] sm:$0xff] %v193_v56  ;;  %v164_v63 = vadd.f32 %v227_v32, %v163_v61  ;;  %v196_v0 = vadd.f32 %v227_v32, %v195_v62 }
 0x102   :  { %214 = vst [vmem:[%s454_s3 + $0x38] sm:$0xff] %v172_v59  ;;  %222 = vst [vmem:[%s454_s3 + $0x78] sm:$0xff] %v204_v60 }
 0x103   :  { %212 = vst [vmem:[%s454_s3 + $0x28] sm:$0xff] %v164_v63  ;;  %220 = vst [vmem:[%s454_s3 + $0x68] sm:$0xff] %v196_v0 }

</bundles_post_ra>
